<compile_context>
chip_gen: v7x
topology: tpu7x:2x2x1
jax: 0.10.0
libtpu: 0.0.40
codegen_flags: <defaults>
</compile_context>

<pallas_src>
import functools

import jax
import jax.numpy as jnp
from jax import lax
from jax.experimental import pallas as pl
from jax.experimental.pallas import tpu as pltpu

_F32 = jnp.float32
_BF16 = jnp.bfloat16


# ----------------------------- shared math (used by kernel and JAX reference) --------

def _dot(x, w):
    """MXU matmul: bf16 operands, f32 accumulation."""
    return jnp.dot(x.astype(_BF16), w, preferred_element_type=_F32)


def _lstm_gates(pre, c_prev, H):
    gi = jax.nn.sigmoid(pre[:, 0 * H:1 * H])
    gf = jax.nn.sigmoid(pre[:, 1 * H:2 * H])
    gg = jnp.tanh(pre[:, 2 * H:3 * H])
    go = jax.nn.sigmoid(pre[:, 3 * H:4 * H])
    c_new = gf * c_prev + gi * gg
    h_new = go * jnp.tanh(c_new)
    return h_new, c_new


def _attention(query, ctx_list, ctxT_list, negm, w_out, approx_recip):
    """Luong global attention (GlobalAttentionLatent stand-in).
    query:(B,H) f32; ctx_list[b]:(S,H) bf16; ctxT_list[b]:(H,S) bf16 (W_in-projected);
    negm:(B,S) additive mask f32.  All contractions are plain 2-D MXU matmuls."""
    B = query.shape[0]
    scores = jnp.concatenate(
        [_dot(query[b:b + 1, :], ctxT_list[b]) for b in range(B)], axis=0) + negm
    scores = scores - jnp.max(scores, axis=-1, keepdims=True)
    e = jnp.exp(scores)
    denom = jnp.sum(e, axis=-1, keepdims=True)
    inv = pl.reciprocal(denom, approx=True) if approx_recip else 1.0 / denom
    aw = e * inv                                                           # (B,S)
    wc = jnp.concatenate(
        [_dot(aw[b:b + 1, :], ctx_list[b]) for b in range(B)], axis=0)     # (B,H)
    return jnp.tanh(_dot(jnp.concatenate([wc, query], axis=-1), w_out))    # (B,H)


def _step_math(i_f, attn, z_i, h, c, eps_i, consts, approx_recip):
    """One DecoderLatent time step; shared by the Pallas kernel and the JAX reference."""
    (k, ctx_list, ctxT_list, negm, w_out, w_ih0, kbias0, w_ih_rest, w_hh,
     b_rest, w_gen, b_gen, H, LS) = consts
    live = i_f < k                                          # (B,1): still generating

    # layer-0 gates: concat([z, attn]) @ [Wz ; Wa]^T + (k-column + bias) precomputed
    gates = _dot(jnp.concatenate([z_i, attn], axis=-1), w_ih0) + kbias0
    new_h, new_c = [], []
    inp = None
    for l in range(len(w_hh)):
        if l > 0:
            gates = _dot(inp, w_ih_rest[l - 1]) + b_rest[l - 1]
        pre = gates + _dot(h[l], w_hh[l])
        h_new, c_new = _lstm_gates(pre, c[l], H)
        inp = h_new                                         # inter-layer dropout: identity
        new_h.append(jnp.where(live, h_new, h[l]))          # freeze finished rows
        new_c.append(jnp.where(live, c_new, c[l]))
    output = inp                                            # raw top-layer h (pre-freeze)

    # GeneratorLatent: single fused matmul -> [mu | sigma]
    gen = _dot(output, w_gen) + b_gen                       # (B, 2*LS)
    mu, sig = gen[:, :LS], gen[:, LS:]
    z_new = mu + jnp.exp(sig) * eps_i
    zms = jnp.where(live, jnp.concatenate([z_new, gen], axis=-1), 0.0)  # [z | mu | sig]

    attn_new = _attention(output, ctx_list, ctxT_list, negm, w_out, approx_recip)
    return attn_new, z_new, tuple(new_h), tuple(new_c), zms


# ----------------------------- the Pallas kernel --------------------------------------

def _decoder_latent_kernel(k_max, num_layers, H, LS,
                           h0_ref, c0_ref, ctx_ref, ctxT_ref, negm_ref, k_ref,
                           z0_ref, eps_ref,
                           w_out_ref, w_ih0_ref, w_k_ref, w_ih_rest_ref, w_hh_ref,
                           b_ref, w_gen_ref, b_gen_ref,
                           zms_ref, h_out_ref, c_out_ref):
    B = h0_ref.shape[1]

    # --- bind weights / loop invariants exactly once (hoisted out of the time loop) ---
    k = k_ref[...]                                       # (B,1) f32
    negm = negm_ref[...]                                 # (B,S) f32
    ctx_list = [ctx_ref[b] for b in range(B)]            # (S,H) bf16 per batch row
    ctxT_list = [ctxT_ref[b] for b in range(B)]          # (H,S) bf16, W_in-projected
    w_out = w_out_ref[...]                               # (2H,H)   bf16
    w_ih0 = w_ih0_ref[...]                               # (LS+H,4H) bf16
    w_gen = w_gen_ref[...]                               # (H,2LS)  bf16
    b = b_ref[...]                                       # (L,1,4H) f32
    kbias0 = k * w_k_ref[...] + b[0]                     # (B,4H): k column of layer-0 W_ih + bias
    w_hh = [w_hh_ref[l] for l in range(num_layers)]
    w_ih_rest = [w_ih_rest_ref[l] for l in range(num_layers - 1)]
    b_rest = [jnp.broadcast_to(b[l], (B, 4 * H)) for l in range(1, num_layers)]
    b_gen = jnp.broadcast_to(b_gen_ref[...], (B, 2 * LS))
    consts = (k, ctx_list, ctxT_list, negm, w_out, w_ih0, kbias0,
              w_ih_rest, w_hh, b_rest, w_gen, b_gen, H, LS)

    h0 = tuple(h0_ref[l] for l in range(num_layers))
    c0 = tuple(c0_ref[l] for l in range(num_layers))
    attn0 = _attention(c0[num_layers - 1], ctx_list, ctxT_list, negm, w_out, True)

    def body(i, carry):
        attn, z_i, h, c = carry
        attn_n, z_n, h_n, c_n, zms = _step_math(i.astype(_F32), attn, z_i, h, c,
                                                eps_ref[i], consts, True)
        zms_ref[i] = zms                                 # one masked store per step
        return attn_n, z_n, h_n, c_n

    # Recurrent state stays in registers; fully unrolled so the scheduler can
    # interleave MXU / EUP / VPU work across the short recurrence.
    _, _, h_f, c_f = lax.fori_loop(0, k_max, body, (attn0, z0_ref[...], h0, c0),
                                   unroll=True)
    for l in range(num_layers):
        h_out_ref[l] = h_f[l]
        c_out_ref[l] = c_f[l]


# ----------------------------- host-side prep + wrapper -------------------------------

def _prepare(params, context, mask_in):
    """Host-side layout work: batch-major bf16 context, W_in-projected context,
    additive mask, pre-transposed / fused bf16 weights, f32 biases."""
    ctx_f32 = jnp.transpose(context, (1, 0, 2)).astype(_F32)           # (B,S,H)
    # score(q, ctx_s) = ctx_s . (q @ W_in^T) = q . (ctx_s @ W_in): project ctx once.
    ctx_in = jnp.einsum("bsj,jh->bsh", ctx_f32, params["w_in"])        # (B,S,H)
    ctx = ctx_f32.astype(_BF16)
    ctx_in_T = jnp.transpose(ctx_in, (0, 2, 1)).astype(_BF16)          # (B,H,S)
    negm = jnp.where(mask_in, jnp.float32(-1e30), jnp.float32(0.0))    # (B,S)
    P = {
        "w_out": jnp.concatenate([params["w_out_c"].T, params["w_out_q"].T],
                                 axis=0).astype(_BF16),                # (2H,H)
        "w_ih0": jnp.concatenate([params["w_ih0_z"].T, params["w_ih0_a"].T],
                                 axis=0).astype(_BF16),                # (LS+H,4H)
        "w_k": params["w_ih0_k"].astype(_F32),                         # (1,4H)
        "w_ih_rest": jnp.transpose(params["w_ih_rest"], (0, 2, 1)).astype(_BF16),
        "w_hh": jnp.transpose(params["w_hh"], (0, 2, 1)).astype(_BF16),
        "b_gates": params["b_gates"].astype(_F32),                     # (L,1,4H)
        "w_gen": jnp.concatenate([params["w_mu"].T, params["w_sig"].T],
                                 axis=1).astype(_BF16),                # (H,2LS)
        "b_gen": jnp.concatenate([params["b_mu"], params["b_sig"]],
                                 axis=1).astype(_F32),                 # (1,2LS)
    }
    return ctx, ctx_in_T, negm, P


def decoder_latent_forward(hidden, context, z0, k, mask_in, eps, params, k_max):
    """hidden=(h0,c0): (L,B,H); context: (S,B,H); z0: (B,LS); k: (B,1) float;
       mask_in: (B,S) bool (True = masked); eps: (k_max,B,LS) ~ N(0,1)."""
    h0, c0 = hidden
    L, B, H = h0.shape
    LS = z0.shape[1]
    ctx, ctx_in_T, negm, P = _prepare(params, context, mask_in)

    ins = (h0.astype(_F32), c0.astype(_F32), ctx, ctx_in_T, negm,
           k.astype(_F32), z0.astype(_F32), eps.astype(_F32),
           P["w_out"], P["w_ih0"], P["w_k"], P["w_ih_rest"], P["w_hh"],
           P["b_gates"], P["w_gen"], P["b_gen"])

    out_shape = (
        jax.ShapeDtypeStruct((k_max, B, 3 * LS), _F32),   # fused [z | mu | sigma] slab
        jax.ShapeDtypeStruct((L, B, H), _F32),            # final h
        jax.ShapeDtypeStruct((L, B, H), _F32),            # final c
    )
    vmem = pl.BlockSpec(memory_space=pltpu.MemorySpace.VMEM)
    fn = pl.pallas_call(
        functools.partial(_decoder_latent_kernel, k_max, L, H, LS),
        out_shape=out_shape,
        in_specs=[vmem] * len(ins),
        out_specs=tuple(vmem for _ in out_shape),
        compiler_params=pltpu.CompilerParams(vmem_limit_bytes=64 * 1024 * 1024),
    )
    zms, h_f, c_f = fn(*ins)
    zms = jnp.transpose(zms, (1, 0, 2))       # torch.stack(...).transpose(0,1): batch major
    z, mu, sig = zms[..., :LS], zms[..., LS:2 * LS], zms[..., 2 * LS:]
    return z, mu, sig, (h_f, c_f)


# ----------------------------- pure-JAX reference (mirrors the kernel numerics) -------

def reference_forward(hidden, context, z0, k, mask_in, eps, params, k_max):
    h0, c0 = hidden
    L, B, H = h0.shape
    LS = z0.shape[1]
    ctx, ctx_in_T, negm, P = _prepare(params, context, mask_in)
    ctx_list = [ctx[b] for b in range(B)]
    ctxT_list = [ctx_in_T[b] for b in range(B)]
    b_g = P["b_gates"]
    kbias0 = k * P["w_k"] + b_g[0]
    w_hh = [P["w_hh"][l] for l in range(L)]
    w_ih_rest = [P["w_ih_rest"][l] for l in range(L - 1)]
    b_rest = [jnp.broadcast_to(b_g[l], (B, 4 * H)) for l in range(1, L)]
    b_gen = jnp.broadcast_to(P["b_gen"], (B, 2 * LS))
    consts = (k, ctx_list, ctxT_list, negm, P["w_out"], P["w_ih0"], kbias0,
              w_ih_rest, w_hh, b_rest, P["w_gen"], b_gen, H, LS)

    h = tuple(h0[l] for l in range(L))
    c = tuple(c0[l] for l in range(L))
    attn = _attention(c0[L - 1], ctx_list, ctxT_list, negm, P["w_out"], False)
    z_i = z0
    slabs = []
    for i in range(k_max):
        attn, z_i, h, c, zms = _step_math(jnp.float32(i), attn, z_i, h, c, eps[i],
                                          consts, False)
        slabs.append(zms)
    zms = jnp.transpose(jnp.stack(slabs), (1, 0, 2))
    z, mu, sig = zms[..., :LS], zms[..., LS:2 * LS], zms[..., 2 * LS:]
    return z, mu, sig, (jnp.stack(h), jnp.stack(c))


# ----------------------------- main ----------------------------------------------------

if __name__ == "__main__":
    B, L, H, LS, S = 2, 2, 32, 16, 8   # batch, layers, rnn_size, latent_vec_size, sourceL

    key = jax.random.PRNGKey(0)
    ks = jax.random.split(key, 24)
    u = lambda kk, shape: jax.random.uniform(kk, shape, _F32, -0.1, 0.1)

    params = {
        # attention: linear_in (H,H), linear_out (H,2H) split into ctx/query halves
        "w_in": u(ks[0], (H, H)),
        "w_out_c": u(ks[1], (H, H)),
        "w_out_q": u(ks[2], (H, H)),
        # StackedLSTM layer 0: W_ih (4H, LS+1+H) split into [z | k | attn] parts
        "w_ih0_z": u(ks[3], (4 * H, LS)),
        "w_ih0_k": u(ks[4], (1, 4 * H)),
        "w_ih0_a": u(ks[5], (4 * H, H)),
        "w_ih_rest": u(ks[6], (L - 1, 4 * H, H)),
        "w_hh": u(ks[7], (L, 4 * H, H)),
        "b_gates": u(ks[8], (L, 1, 4 * H)) + u(ks[9], (L, 1, 4 * H)),   # b_ih + b_hh
        # GeneratorLatent
        "w_mu": u(ks[10], (LS, H)),
        "b_mu": u(ks[11], (1, LS)),
        "w_sig": u(ks[12], (LS, H)),
        "b_sig": u(ks[13], (1, LS)),
    }

    h0 = jax.random.normal(ks[14], (L, B, H), _F32) * 0.5
    c0 = jax.random.normal(ks[15], (L, B, H), _F32) * 0.5
    context = jax.random.normal(ks[16], (S, B, H), _F32)     # (S,B,H) like the onmt encoder
    z0 = jax.random.normal(ks[17], (B, LS), _F32)
    k = jnp.array([[3.0], [5.0]], _F32)                      # target lengths
    k_max = int(jnp.max(k))
    src_len = jnp.array([6, 8])
    mask_in = jnp.arange(S)[None, :] >= src_len[:, None]     # (B,S) bool, True = masked
    eps = jax.random.normal(ks[18], (k_max, B, LS), _F32)    # GeneratorLatent noise

    z, mu, sig, (h_f, c_f) = decoder_latent_forward(
        (h0, c0), context, z0, k, mask_in, eps, params, k_max)
    jax.block_until_ready((z, mu, sig, h_f, c_f))

    z_r, mu_r, sig_r, (h_r, c_r) = reference_forward(
        (h0, c0), context, z0, k, mask_in, eps, params, k_max)

    assert z.shape == (B, k_max, LS) and mu.shape == (B, k_max, LS) and sig.shape == (B, k_max, LS)
    assert h_f.shape == (L, B, H) and c_f.shape == (L, B, H)
    for got, want in ((z, z_r), (mu, mu_r), (sig, sig_r), (h_f, h_r), (c_f, c_r)):
        assert bool(jnp.all(jnp.isfinite(got)))
        assert bool(jnp.allclose(got, want, atol=5e-3, rtol=5e-3))

    print("KERNEL_OK")
</pallas_src>

<mosaic_0001>
module attributes {stable_mosaic.version = 11 : i64} {
  func.func @_decoder_latent_kernel(%arg0: memref<2x2x32xf32, #tpu.memory_space<vmem>>, %arg1: memref<2x2x32xf32, #tpu.memory_space<vmem>>, %arg2: memref<2x8x32xbf16, #tpu.memory_space<vmem>>, %arg3: memref<2x32x8xbf16, #tpu.memory_space<vmem>>, %arg4: memref<2x8xf32, #tpu.memory_space<vmem>>, %arg5: memref<2x1xf32, #tpu.memory_space<vmem>>, %arg6: memref<2x16xf32, #tpu.memory_space<vmem>>, %arg7: memref<5x2x16xf32, #tpu.memory_space<vmem>>, %arg8: memref<64x32xbf16, #tpu.memory_space<vmem>>, %arg9: memref<48x128xbf16, #tpu.memory_space<vmem>>, %arg10: memref<1x128xf32, #tpu.memory_space<vmem>>, %arg11: memref<1x32x128xbf16, #tpu.memory_space<vmem>>, %arg12: memref<2x32x128xbf16, #tpu.memory_space<vmem>>, %arg13: memref<2x1x128xf32, #tpu.memory_space<vmem>>, %arg14: memref<32x32xbf16, #tpu.memory_space<vmem>>, %arg15: memref<1x32xf32, #tpu.memory_space<vmem>>, %arg16: memref<5x2x48xf32, #tpu.memory_space<vmem>>, %arg17: memref<2x2x32xf32, #tpu.memory_space<vmem>>, %arg18: memref<2x2x32xf32, #tpu.memory_space<vmem>>) attributes {dimension_semantics = [], scalar_prefetch = 0 : i64, scratch_operands = 0 : i64, tpu.core_type = #tpu.core_type<tc>} {
    %c0 = arith.constant 0 : index
    %c0_0 = arith.constant 0 : index
    %0 = vector.load %arg5[%c0, %c0_0] : memref<2x1xf32, #tpu.memory_space<vmem>>, vector<2x1xf32>
    %c0_1 = arith.constant 0 : index
    %c0_2 = arith.constant 0 : index
    %1 = vector.load %arg4[%c0_1, %c0_2] : memref<2x8xf32, #tpu.memory_space<vmem>>, vector<2x8xf32>
    %c0_3 = arith.constant 0 : index
    %c0_4 = arith.constant 0 : index
    %c0_5 = arith.constant 0 : index
    %2 = vector.load %arg2[%c0_3, %c0_4, %c0_5] : memref<2x8x32xbf16, #tpu.memory_space<vmem>>, vector<1x8x32xbf16>
    %3 = vector.shape_cast %2 : vector<1x8x32xbf16> to vector<8x32xbf16>
    %c1 = arith.constant 1 : index
    %c0_6 = arith.constant 0 : index
    %c0_7 = arith.constant 0 : index
    %4 = vector.load %arg2[%c1, %c0_6, %c0_7] : memref<2x8x32xbf16, #tpu.memory_space<vmem>>, vector<1x8x32xbf16>
    %5 = vector.shape_cast %4 : vector<1x8x32xbf16> to vector<8x32xbf16>
    %c0_8 = arith.constant 0 : index
    %c0_9 = arith.constant 0 : index
    %c0_10 = arith.constant 0 : index
    %6 = vector.load %arg3[%c0_8, %c0_9, %c0_10] : memref<2x32x8xbf16, #tpu.memory_space<vmem>>, vector<1x32x8xbf16>
    %7 = vector.shape_cast %6 : vector<1x32x8xbf16> to vector<32x8xbf16>
    %c1_11 = arith.constant 1 : index
    %c0_12 = arith.constant 0 : index
    %c0_13 = arith.constant 0 : index
    %8 = vector.load %arg3[%c1_11, %c0_12, %c0_13] : memref<2x32x8xbf16, #tpu.memory_space<vmem>>, vector<1x32x8xbf16>
    %9 = vector.shape_cast %8 : vector<1x32x8xbf16> to vector<32x8xbf16>
    %c0_14 = arith.constant 0 : index
    %c0_15 = arith.constant 0 : index
    %10 = vector.load %arg8[%c0_14, %c0_15] : memref<64x32xbf16, #tpu.memory_space<vmem>>, vector<64x32xbf16>
    %c0_16 = arith.constant 0 : index
    %c0_17 = arith.constant 0 : index
    %11 = vector.load %arg9[%c0_16, %c0_17] : memref<48x128xbf16, #tpu.memory_space<vmem>>, vector<48x128xbf16>
    %c0_18 = arith.constant 0 : index
    %c0_19 = arith.constant 0 : index
    %12 = vector.load %arg14[%c0_18, %c0_19] : memref<32x32xbf16, #tpu.memory_space<vmem>>, vector<32x32xbf16>
    %c0_20 = arith.constant 0 : index
    %c0_21 = arith.constant 0 : index
    %c0_22 = arith.constant 0 : index
    %13 = vector.load %arg13[%c0_20, %c0_21, %c0_22] : memref<2x1x128xf32, #tpu.memory_space<vmem>>, vector<2x1x128xf32>
    %c0_23 = arith.constant 0 : index
    %c0_24 = arith.constant 0 : index
    %14 = vector.load %arg10[%c0_23, %c0_24] : memref<1x128xf32, #tpu.memory_space<vmem>>, vector<1x128xf32>
    %15 = vector.broadcast %0 : vector<2x1xf32> to vector<2x128xf32>
    %16 = vector.broadcast %14 : vector<1x128xf32> to vector<2x128xf32>
    %17 = arith.mulf %15, %16 : vector<2x128xf32>
    %18 = vector.extract_strided_slice %13 {offsets = [0, 0, 0], sizes = [1, 1, 128], strides = [1, 1, 1]} : vector<2x1x128xf32> to vector<1x1x128xf32>
    %19 = vector.shape_cast %18 : vector<1x1x128xf32> to vector<1x128xf32>
    %20 = vector.broadcast %19 : vector<1x128xf32> to vector<2x128xf32>
    %21 = arith.addf %17, %20 : vector<2x128xf32>
    %c0_25 = arith.constant 0 : index
    %c0_26 = arith.constant 0 : index
    %c0_27 = arith.constant 0 : index
    %22 = vector.load %arg12[%c0_25, %c0_26, %c0_27] : memref<2x32x128xbf16, #tpu.memory_space<vmem>>, vector<1x32x128xbf16>
    %23 = vector.shape_cast %22 : vector<1x32x128xbf16> to vector<32x128xbf16>
    %c1_28 = arith.constant 1 : index
    %c0_29 = arith.constant 0 : index
    %c0_30 = arith.constant 0 : index
    %24 = vector.load %arg12[%c1_28, %c0_29, %c0_30] : memref<2x32x128xbf16, #tpu.memory_space<vmem>>, vector<1x32x128xbf16>
    %25 = vector.shape_cast %24 : vector<1x32x128xbf16> to vector<32x128xbf16>
    %c0_31 = arith.constant 0 : index
    %c0_32 = arith.constant 0 : index
    %c0_33 = arith.constant 0 : index
    %26 = vector.load %arg11[%c0_31, %c0_32, %c0_33] : memref<1x32x128xbf16, #tpu.memory_space<vmem>>, vector<1x32x128xbf16>
    %27 = vector.shape_cast %26 : vector<1x32x128xbf16> to vector<32x128xbf16>
    %28 = vector.extract_strided_slice %13 {offsets = [1, 0, 0], sizes = [1, 1, 128], strides = [1, 1, 1]} : vector<2x1x128xf32> to vector<1x1x128xf32>
    %29 = vector.shape_cast %28 : vector<1x1x128xf32> to vector<1x128xf32>
    %30 = vector.shape_cast %29 : vector<1x128xf32> to vector<1x128xf32>
    %31 = vector.broadcast %30 : vector<1x128xf32> to vector<2x128xf32>
    %c0_34 = arith.constant 0 : index
    %c0_35 = arith.constant 0 : index
    %32 = vector.load %arg15[%c0_34, %c0_35] : memref<1x32xf32, #tpu.memory_space<vmem>>, vector<1x32xf32>
    %33 = vector.shape_cast %32 : vector<1x32xf32> to vector<1x32xf32>
    %34 = vector.broadcast %33 : vector<1x32xf32> to vector<2x32xf32>
    %c0_36 = arith.constant 0 : index
    %c0_37 = arith.constant 0 : index
    %c0_38 = arith.constant 0 : index
    %35 = vector.load %arg0[%c0_36, %c0_37, %c0_38] : memref<2x2x32xf32, #tpu.memory_space<vmem>>, vector<1x2x32xf32>
    %36 = vector.shape_cast %35 : vector<1x2x32xf32> to vector<2x32xf32>
    %c1_39 = arith.constant 1 : index
    %c0_40 = arith.constant 0 : index
    %c0_41 = arith.constant 0 : index
    %37 = vector.load %arg0[%c1_39, %c0_40, %c0_41] : memref<2x2x32xf32, #tpu.memory_space<vmem>>, vector<1x2x32xf32>
    %38 = vector.shape_cast %37 : vector<1x2x32xf32> to vector<2x32xf32>
    %c0_42 = arith.constant 0 : index
    %c0_43 = arith.constant 0 : index
    %c0_44 = arith.constant 0 : index
    %39 = vector.load %arg1[%c0_42, %c0_43, %c0_44] : memref<2x2x32xf32, #tpu.memory_space<vmem>>, vector<1x2x32xf32>
    %40 = vector.shape_cast %39 : vector<1x2x32xf32> to vector<2x32xf32>
    %c1_45 = arith.constant 1 : index
    %c0_46 = arith.constant 0 : index
    %c0_47 = arith.constant 0 : index
    %41 = vector.load %arg1[%c1_45, %c0_46, %c0_47] : memref<2x2x32xf32, #tpu.memory_space<vmem>>, vector<1x2x32xf32>
    %42 = vector.shape_cast %41 : vector<1x2x32xf32> to vector<2x32xf32>
    %43 = vector.extract_strided_slice %42 {offsets = [0, 0], sizes = [1, 32], strides = [1, 1]} : vector<2x32xf32> to vector<1x32xf32>
    %44 = arith.truncf %43 : vector<1x32xf32> to vector<1x32xbf16>
    %cst = arith.constant dense<0.000000e+00> : vector<1x8xf32>
    %45 = tpu.matmul %44, %7, %cst {dimension_numbers = #tpu.dot_dimension_numbers<[1], [0], [0], [1], [0, 0, 1, 1], [], []>} : vector<1x32xbf16>, vector<32x8xbf16>, vector<1x8xf32> -> vector<1x8xf32>
    %46 = vector.extract_strided_slice %42 {offsets = [1, 0], sizes = [1, 32], strides = [1, 1]} : vector<2x32xf32> to vector<1x32xf32>
    %47 = arith.truncf %46 : vector<1x32xf32> to vector<1x32xbf16>
    %cst_48 = arith.constant dense<0.000000e+00> : vector<1x8xf32>
    %48 = tpu.matmul %47, %9, %cst_48 {dimension_numbers = #tpu.dot_dimension_numbers<[1], [0], [0], [1], [0, 0, 1, 1], [], []>} : vector<1x32xbf16>, vector<32x8xbf16>, vector<1x8xf32> -> vector<1x8xf32>
    %49 = tpu.concatenate %45, %48 in 0 : vector<1x8xf32>, vector<1x8xf32> -> vector<2x8xf32>
    %50 = arith.addf %49, %1 : vector<2x8xf32>
    %cst_49 = arith.constant dense<0xFF800000> : vector<2xf32>
    %51 = vector.multi_reduction <maximumf>, %50, %cst_49 [1] : vector<2x8xf32> to vector<2xf32>
    %52 = vector.shape_cast %51 : vector<2xf32> to vector<2x1xf32>
    %53 = vector.broadcast %52 : vector<2x1xf32> to vector<2x8xf32>
    %54 = arith.subf %50, %53 : vector<2x8xf32>
    %55 = math.exp %54 : vector<2x8xf32>
    %cst_50 = arith.constant dense<0.000000e+00> : vector<2xf32>
    %56 = vector.multi_reduction <add>, %55, %cst_50 [1] : vector<2x8xf32> to vector<2xf32>
    %57 = vector.shape_cast %56 : vector<2xf32> to vector<2x1xf32>
    %58 = tpu.reciprocal %57 {approx = true} : vector<2x1xf32> -> vector<2x1xf32>
    %59 = vector.broadcast %58 : vector<2x1xf32> to vector<2x8xf32>
    %60 = arith.mulf %55, %59 : vector<2x8xf32>
    %61 = vector.extract_strided_slice %60 {offsets = [0, 0], sizes = [1, 8], strides = [1, 1]} : vector<2x8xf32> to vector<1x8xf32>
    %62 = arith.truncf %61 : vector<1x8xf32> to vector<1x8xbf16>
    %cst_51 = arith.constant dense<0.000000e+00> : vector<1x32xf32>
    %63 = tpu.matmul %62, %3, %cst_51 {dimension_numbers = #tpu.dot_dimension_numbers<[1], [0], [0], [1], [0, 0, 1, 1], [], []>} : vector<1x8xbf16>, vector<8x32xbf16>, vector<1x32xf32> -> vector<1x32xf32>
    %64 = vector.extract_strided_slice %60 {offsets = [1, 0], sizes = [1, 8], strides = [1, 1]} : vector<2x8xf32> to vector<1x8xf32>
    %65 = arith.truncf %64 : vector<1x8xf32> to vector<1x8xbf16>
    %cst_52 = arith.constant dense<0.000000e+00> : vector<1x32xf32>
    %66 = tpu.matmul %65, %5, %cst_52 {dimension_numbers = #tpu.dot_dimension_numbers<[1], [0], [0], [1], [0, 0, 1, 1], [], []>} : vector<1x8xbf16>, vector<8x32xbf16>, vector<1x32xf32> -> vector<1x32xf32>
    %67 = tpu.concatenate %63, %66 in 0 : vector<1x32xf32>, vector<1x32xf32> -> vector<2x32xf32>
    %68 = tpu.concatenate %67, %42 in 1 : vector<2x32xf32>, vector<2x32xf32> -> vector<2x64xf32>
    %69 = arith.truncf %68 : vector<2x64xf32> to vector<2x64xbf16>
    %cst_53 = arith.constant dense<0.000000e+00> : vector<2x32xf32>
    %70 = tpu.matmul %69, %10, %cst_53 {dimension_numbers = #tpu.dot_dimension_numbers<[1], [0], [0], [1], [0, 0, 1, 1], [], []>} : vector<2x64xbf16>, vector<64x32xbf16>, vector<2x32xf32> -> vector<2x32xf32>
    %71 = math.tanh %70 : vector<2x32xf32>
    %c0_54 = arith.constant 0 : index
    %c0_55 = arith.constant 0 : index
    %72 = vector.load %arg6[%c0_54, %c0_55] : memref<2x16xf32, #tpu.memory_space<vmem>>, vector<2x16xf32>
    %c0_i32 = arith.constant 0 : i32
    %73 = arith.sitofp %c0_i32 : i32 to f32
    %74 = arith.index_cast %c0_i32 : i32 to index
    %c0_56 = arith.constant 0 : index
    %c0_57 = arith.constant 0 : index
    %75 = vector.load %arg7[%74, %c0_56, %c0_57] : memref<5x2x16xf32, #tpu.memory_space<vmem>>, vector<1x2x16xf32>
    %76 = vector.shape_cast %75 : vector<1x2x16xf32> to vector<2x16xf32>
    %77 = vector.broadcast %73 : f32 to vector<2x1xf32>
    %78 = arith.cmpf olt, %77, %0 : vector<2x1xf32>
    %79 = tpu.concatenate %72, %71 in 1 : vector<2x16xf32>, vector<2x32xf32> -> vector<2x48xf32>
    %80 = arith.truncf %79 : vector<2x48xf32> to vector<2x48xbf16>
    %cst_58 = arith.constant dense<0.000000e+00> : vector<2x128xf32>
    %81 = tpu.matmul %80, %11, %cst_58 {dimension_numbers = #tpu.dot_dimension_numbers<[1], [0], [0], [1], [0, 0, 1, 1], [], []>} : vector<2x48xbf16>, vector<48x128xbf16>, vector<2x128xf32> -> vector<2x128xf32>
    %82 = arith.addf %81, %21 : vector<2x128xf32>
    %83 = arith.truncf %36 : vector<2x32xf32> to vector<2x32xbf16>
    %cst_59 = arith.constant dense<0.000000e+00> : vector<2x128xf32>
    %84 = tpu.matmul %83, %23, %cst_59 {dimension_numbers = #tpu.dot_dimension_numbers<[1], [0], [0], [1], [0, 0, 1, 1], [], []>} : vector<2x32xbf16>, vector<32x128xbf16>, vector<2x128xf32> -> vector<2x128xf32>
    %85 = arith.addf %82, %84 : vector<2x128xf32>
    %86 = vector.extract_strided_slice %85 {offsets = [0, 0], sizes = [2, 32], strides = [1, 1]} : vector<2x128xf32> to vector<2x32xf32>
    %87 = arith.negf %86 : vector<2x32xf32>
    %88 = math.exp %87 : vector<2x32xf32>
    %cst_60 = arith.constant 1.000000e+00 : f32
    %89 = vector.broadcast %cst_60 : f32 to vector<2x32xf32>
    %90 = arith.addf %89, %88 : vector<2x32xf32>
    %91 = arith.divf %89, %90 : vector<2x32xf32>
    %92 = vector.extract_strided_slice %85 {offsets = [0, 32], sizes = [2, 32], strides = [1, 1]} : vector<2x128xf32> to vector<2x32xf32>
    %93 = arith.negf %92 : vector<2x32xf32>
    %94 = math.exp %93 : vector<2x32xf32>
    %cst_61 = arith.constant 1.000000e+00 : f32
    %95 = vector.broadcast %cst_61 : f32 to vector<2x32xf32>
    %96 = arith.addf %95, %94 : vector<2x32xf32>
    %97 = arith.divf %95, %96 : vector<2x32xf32>
    %98 = vector.extract_strided_slice %85 {offsets = [0, 64], sizes = [2, 32], strides = [1, 1]} : vector<2x128xf32> to vector<2x32xf32>
    %99 = math.tanh %98 : vector<2x32xf32>
    %100 = vector.extract_strided_slice %85 {offsets = [0, 96], sizes = [2, 32], strides = [1, 1]} : vector<2x128xf32> to vector<2x32xf32>
    %101 = arith.negf %100 : vector<2x32xf32>
    %102 = math.exp %101 : vector<2x32xf32>
    %cst_62 = arith.constant 1.000000e+00 : f32
    %103 = vector.broadcast %cst_62 : f32 to vector<2x32xf32>
    %104 = arith.addf %103, %102 : vector<2x32xf32>
    %105 = arith.divf %103, %104 : vector<2x32xf32>
    %106 = arith.mulf %97, %40 : vector<2x32xf32>
    %107 = arith.mulf %91, %99 : vector<2x32xf32>
    %108 = arith.addf %106, %107 : vector<2x32xf32>
    %109 = math.tanh %108 : vector<2x32xf32>
    %110 = arith.mulf %105, %109 : vector<2x32xf32>
    %111 = vector.shape_cast %78 : vector<2x1xi1> to vector<2x1xi1>
    %112 = vector.broadcast %111 : vector<2x1xi1> to vector<2x32xi1>
    %113 = arith.select %112, %110, %36 : vector<2x32xi1>, vector<2x32xf32>
    %114 = vector.shape_cast %78 : vector<2x1xi1> to vector<2x1xi1>
    %115 = vector.broadcast %114 : vector<2x1xi1> to vector<2x32xi1>
    %116 = arith.select %115, %108, %40 : vector<2x32xi1>, vector<2x32xf32>
    %117 = arith.truncf %110 : vector<2x32xf32> to vector<2x32xbf16>
    %cst_63 = arith.constant dense<0.000000e+00> : vector<2x128xf32>
    %118 = tpu.matmul %117, %27, %cst_63 {dimension_numbers = #tpu.dot_dimension_numbers<[1], [0], [0], [1], [0, 0, 1, 1], [], []>} : vector<2x32xbf16>, vector<32x128xbf16>, vector<2x128xf32> -> vector<2x128xf32>
    %119 = arith.addf %118, %31 : vector<2x128xf32>
    %120 = arith.truncf %38 : vector<2x32xf32> to vector<2x32xbf16>
    %cst_64 = arith.constant dense<0.000000e+00> : vector<2x128xf32>
    %121 = tpu.matmul %120, %25, %cst_64 {dimension_numbers = #tpu.dot_dimension_numbers<[1], [0], [0], [1], [0, 0, 1, 1], [], []>} : vector<2x32xbf16>, vector<32x128xbf16>, vector<2x128xf32> -> vector<2x128xf32>
    %122 = arith.addf %119, %121 : vector<2x128xf32>
    %123 = vector.extract_strided_slice %122 {offsets = [0, 0], sizes = [2, 32], strides = [1, 1]} : vector<2x128xf32> to vector<2x32xf32>
    %124 = arith.negf %123 : vector<2x32xf32>
    %125 = math.exp %124 : vector<2x32xf32>
    %cst_65 = arith.constant 1.000000e+00 : f32
    %126 = vector.broadcast %cst_65 : f32 to vector<2x32xf32>
    %127 = arith.addf %126, %125 : vector<2x32xf32>
    %128 = arith.divf %126, %127 : vector<2x32xf32>
    %129 = vector.extract_strided_slice %122 {offsets = [0, 32], sizes = [2, 32], strides = [1, 1]} : vector<2x128xf32> to vector<2x32xf32>
    %130 = arith.negf %129 : vector<2x32xf32>
    %131 = math.exp %130 : vector<2x32xf32>
    %cst_66 = arith.constant 1.000000e+00 : f32
    %132 = vector.broadcast %cst_66 : f32 to vector<2x32xf32>
    %133 = arith.addf %132, %131 : vector<2x32xf32>
    %134 = arith.divf %132, %133 : vector<2x32xf32>
    %135 = vector.extract_strided_slice %122 {offsets = [0, 64], sizes = [2, 32], strides = [1, 1]} : vector<2x128xf32> to vector<2x32xf32>
    %136 = math.tanh %135 : vector<2x32xf32>
    %137 = vector.extract_strided_slice %122 {offsets = [0, 96], sizes = [2, 32], strides = [1, 1]} : vector<2x128xf32> to vector<2x32xf32>
    %138 = arith.negf %137 : vector<2x32xf32>
    %139 = math.exp %138 : vector<2x32xf32>
    %cst_67 = arith.constant 1.000000e+00 : f32
    %140 = vector.broadcast %cst_67 : f32 to vector<2x32xf32>
    %141 = arith.addf %140, %139 : vector<2x32xf32>
    %142 = arith.divf %140, %141 : vector<2x32xf32>
    %143 = arith.mulf %134, %42 : vector<2x32xf32>
    %144 = arith.mulf %128, %136 : vector<2x32xf32>
    %145 = arith.addf %143, %144 : vector<2x32xf32>
    %146 = math.tanh %145 : vector<2x32xf32>
    %147 = arith.mulf %142, %146 : vector<2x32xf32>
    %148 = vector.shape_cast %78 : vector<2x1xi1> to vector<2x1xi1>
    %149 = vector.broadcast %148 : vector<2x1xi1> to vector<2x32xi1>
    %150 = arith.select %149, %147, %38 : vector<2x32xi1>, vector<2x32xf32>
    %151 = vector.shape_cast %78 : vector<2x1xi1> to vector<2x1xi1>
    %152 = vector.broadcast %151 : vector<2x1xi1> to vector<2x32xi1>
    %153 = arith.select %152, %145, %42 : vector<2x32xi1>, vector<2x32xf32>
    %154 = arith.truncf %147 : vector<2x32xf32> to vector<2x32xbf16>
    %cst_68 = arith.constant dense<0.000000e+00> : vector<2x32xf32>
    %155 = tpu.matmul %154, %12, %cst_68 {dimension_numbers = #tpu.dot_dimension_numbers<[1], [0], [0], [1], [0, 0, 1, 1], [], []>} : vector<2x32xbf16>, vector<32x32xbf16>, vector<2x32xf32> -> vector<2x32xf32>
    %156 = arith.addf %155, %34 : vector<2x32xf32>
    %157 = vector.extract_strided_slice %156 {offsets = [0, 0], sizes = [2, 16], strides = [1, 1]} : vector<2x32xf32> to vector<2x16xf32>
    %158 = vector.extract_strided_slice %156 {offsets = [0, 16], sizes = [2, 16], strides = [1, 1]} : vector<2x32xf32> to vector<2x16xf32>
    %159 = math.exp %158 : vector<2x16xf32>
    %160 = arith.mulf %159, %76 : vector<2x16xf32>
    %161 = arith.addf %157, %160 : vector<2x16xf32>
    %162 = tpu.concatenate %161, %156 in 1 : vector<2x16xf32>, vector<2x32xf32> -> vector<2x48xf32>
    %cst_69 = arith.constant 0.000000e+00 : f32
    %163 = vector.shape_cast %78 : vector<2x1xi1> to vector<2x1xi1>
    %164 = vector.broadcast %163 : vector<2x1xi1> to vector<2x48xi1>
    %165 = vector.broadcast %cst_69 : f32 to vector<2x48xf32>
    %166 = arith.select %164, %162, %165 : vector<2x48xi1>, vector<2x48xf32>
    %167 = vector.extract_strided_slice %147 {offsets = [0, 0], sizes = [1, 32], strides = [1, 1]} : vector<2x32xf32> to vector<1x32xf32>
    %168 = arith.truncf %167 : vector<1x32xf32> to vector<1x32xbf16>
    %cst_70 = arith.constant dense<0.000000e+00> : vector<1x8xf32>
    %169 = tpu.matmul %168, %7, %cst_70 {dimension_numbers = #tpu.dot_dimension_numbers<[1], [0], [0], [1], [0, 0, 1, 1], [], []>} : vector<1x32xbf16>, vector<32x8xbf16>, vector<1x8xf32> -> vector<1x8xf32>
    %170 = vector.extract_strided_slice %147 {offsets = [1, 0], sizes = [1, 32], strides = [1, 1]} : vector<2x32xf32> to vector<1x32xf32>
    %171 = arith.truncf %170 : vector<1x32xf32> to vector<1x32xbf16>
    %cst_71 = arith.constant dense<0.000000e+00> : vector<1x8xf32>
    %172 = tpu.matmul %171, %9, %cst_71 {dimension_numbers = #tpu.dot_dimension_numbers<[1], [0], [0], [1], [0, 0, 1, 1], [], []>} : vector<1x32xbf16>, vector<32x8xbf16>, vector<1x8xf32> -> vector<1x8xf32>
    %173 = tpu.concatenate %169, %172 in 0 : vector<1x8xf32>, vector<1x8xf32> -> vector<2x8xf32>
    %174 = arith.addf %173, %1 : vector<2x8xf32>
    %cst_72 = arith.constant dense<0xFF800000> : vector<2xf32>
    %175 = vector.multi_reduction <maximumf>, %174, %cst_72 [1] : vector<2x8xf32> to vector<2xf32>
    %176 = vector.shape_cast %175 : vector<2xf32> to vector<2x1xf32>
    %177 = vector.broadcast %176 : vector<2x1xf32> to vector<2x8xf32>
    %178 = arith.subf %174, %177 : vector<2x8xf32>
    %179 = math.exp %178 : vector<2x8xf32>
    %cst_73 = arith.constant dense<0.000000e+00> : vector<2xf32>
    %180 = vector.multi_reduction <add>, %179, %cst_73 [1] : vector<2x8xf32> to vector<2xf32>
    %181 = vector.shape_cast %180 : vector<2xf32> to vector<2x1xf32>
    %182 = tpu.reciprocal %181 {approx = true} : vector<2x1xf32> -> vector<2x1xf32>
    %183 = vector.broadcast %182 : vector<2x1xf32> to vector<2x8xf32>
    %184 = arith.mulf %179, %183 : vector<2x8xf32>
    %185 = vector.extract_strided_slice %184 {offsets = [0, 0], sizes = [1, 8], strides = [1, 1]} : vector<2x8xf32> to vector<1x8xf32>
    %186 = arith.truncf %185 : vector<1x8xf32> to vector<1x8xbf16>
    %cst_74 = arith.constant dense<0.000000e+00> : vector<1x32xf32>
    %187 = tpu.matmul %186, %3, %cst_74 {dimension_numbers = #tpu.dot_dimension_numbers<[1], [0], [0], [1], [0, 0, 1, 1], [], []>} : vector<1x8xbf16>, vector<8x32xbf16>, vector<1x32xf32> -> vector<1x32xf32>
    %188 = vector.extract_strided_slice %184 {offsets = [1, 0], sizes = [1, 8], strides = [1, 1]} : vector<2x8xf32> to vector<1x8xf32>
    %189 = arith.truncf %188 : vector<1x8xf32> to vector<1x8xbf16>
    %cst_75 = arith.constant dense<0.000000e+00> : vector<1x32xf32>
    %190 = tpu.matmul %189, %5, %cst_75 {dimension_numbers = #tpu.dot_dimension_numbers<[1], [0], [0], [1], [0, 0, 1, 1], [], []>} : vector<1x8xbf16>, vector<8x32xbf16>, vector<1x32xf32> -> vector<1x32xf32>
    %191 = tpu.concatenate %187, %190 in 0 : vector<1x32xf32>, vector<1x32xf32> -> vector<2x32xf32>
    %192 = tpu.concatenate %191, %147 in 1 : vector<2x32xf32>, vector<2x32xf32> -> vector<2x64xf32>
    %193 = arith.truncf %192 : vector<2x64xf32> to vector<2x64xbf16>
    %cst_76 = arith.constant dense<0.000000e+00> : vector<2x32xf32>
    %194 = tpu.matmul %193, %10, %cst_76 {dimension_numbers = #tpu.dot_dimension_numbers<[1], [0], [0], [1], [0, 0, 1, 1], [], []>} : vector<2x64xbf16>, vector<64x32xbf16>, vector<2x32xf32> -> vector<2x32xf32>
    %195 = math.tanh %194 : vector<2x32xf32>
    %196 = arith.index_cast %c0_i32 : i32 to index
    %c0_77 = arith.constant 0 : index
    %c0_78 = arith.constant 0 : index
    %197 = vector.load %arg16[%196, %c0_77, %c0_78] : memref<5x2x48xf32, #tpu.memory_space<vmem>>, vector<1x2x48xf32>
    %198 = vector.shape_cast %197 : vector<1x2x48xf32> to vector<2x48xf32>
    %199 = vector.shape_cast %166 : vector<2x48xf32> to vector<1x2x48xf32>
    tpu.vector_store %arg16[%196, %c0_77, %c0_78], %199 {strides = array<i32>} : memref<5x2x48xf32, #tpu.memory_space<vmem>>, vector<1x2x48xf32>,
    %c1_i32 = arith.constant 1 : i32
    %200 = arith.sitofp %c1_i32 : i32 to f32
    %201 = arith.index_cast %c1_i32 : i32 to index
    %c0_79 = arith.constant 0 : index
    %c0_80 = arith.constant 0 : index
    %202 = vector.load %arg7[%201, %c0_79, %c0_80] : memref<5x2x16xf32, #tpu.memory_space<vmem>>, vector<1x2x16xf32>
    %203 = vector.shape_cast %202 : vector<1x2x16xf32> to vector<2x16xf32>
    %204 = vector.broadcast %200 : f32 to vector<2x1xf32>
    %205 = arith.cmpf olt, %204, %0 : vector<2x1xf32>
    %206 = tpu.concatenate %161, %195 in 1 : vector<2x16xf32>, vector<2x32xf32> -> vector<2x48xf32>
    %207 = arith.truncf %206 : vector<2x48xf32> to vector<2x48xbf16>
    %cst_81 = arith.constant dense<0.000000e+00> : vector<2x128xf32>
    %208 = tpu.matmul %207, %11, %cst_81 {dimension_numbers = #tpu.dot_dimension_numbers<[1], [0], [0], [1], [0, 0, 1, 1], [], []>} : vector<2x48xbf16>, vector<48x128xbf16>, vector<2x128xf32> -> vector<2x128xf32>
    %209 = arith.addf %208, %21 : vector<2x128xf32>
    %210 = arith.truncf %113 : vector<2x32xf32> to vector<2x32xbf16>
    %cst_82 = arith.constant dense<0.000000e+00> : vector<2x128xf32>
    %211 = tpu.matmul %210, %23, %cst_82 {dimension_numbers = #tpu.dot_dimension_numbers<[1], [0], [0], [1], [0, 0, 1, 1], [], []>} : vector<2x32xbf16>, vector<32x128xbf16>, vector<2x128xf32> -> vector<2x128xf32>
    %212 = arith.addf %209, %211 : vector<2x128xf32>
    %213 = vector.extract_strided_slice %212 {offsets = [0, 0], sizes = [2, 32], strides = [1, 1]} : vector<2x128xf32> to vector<2x32xf32>
    %214 = arith.negf %213 : vector<2x32xf32>
    %215 = math.exp %214 : vector<2x32xf32>
    %cst_83 = arith.constant 1.000000e+00 : f32
    %216 = vector.broadcast %cst_83 : f32 to vector<2x32xf32>
    %217 = arith.addf %216, %215 : vector<2x32xf32>
    %218 = arith.divf %216, %217 : vector<2x32xf32>
    %219 = vector.extract_strided_slice %212 {offsets = [0, 32], sizes = [2, 32], strides = [1, 1]} : vector<2x128xf32> to vector<2x32xf32>
    %220 = arith.negf %219 : vector<2x32xf32>
    %221 = math.exp %220 : vector<2x32xf32>
    %cst_84 = arith.constant 1.000000e+00 : f32
    %222 = vector.broadcast %cst_84 : f32 to vector<2x32xf32>
    %223 = arith.addf %222, %221 : vector<2x32xf32>
    %224 = arith.divf %222, %223 : vector<2x32xf32>
    %225 = vector.extract_strided_slice %212 {offsets = [0, 64], sizes = [2, 32], strides = [1, 1]} : vector<2x128xf32> to vector<2x32xf32>
    %226 = math.tanh %225 : vector<2x32xf32>
    %227 = vector.extract_strided_slice %212 {offsets = [0, 96], sizes = [2, 32], strides = [1, 1]} : vector<2x128xf32> to vector<2x32xf32>
    %228 = arith.negf %227 : vector<2x32xf32>
    %229 = math.exp %228 : vector<2x32xf32>
    %cst_85 = arith.constant 1.000000e+00 : f32
    %230 = vector.broadcast %cst_85 : f32 to vector<2x32xf32>
    %231 = arith.addf %230, %229 : vector<2x32xf32>
    %232 = arith.divf %230, %231 : vector<2x32xf32>
    %233 = arith.mulf %224, %116 : vector<2x32xf32>
    %234 = arith.mulf %218, %226 : vector<2x32xf32>
    %235 = arith.addf %233, %234 : vector<2x32xf32>
    %236 = math.tanh %235 : vector<2x32xf32>
    %237 = arith.mulf %232, %236 : vector<2x32xf32>
    %238 = vector.shape_cast %205 : vector<2x1xi1> to vector<2x1xi1>
    %239 = vector.broadcast %238 : vector<2x1xi1> to vector<2x32xi1>
    %240 = arith.select %239, %237, %113 : vector<2x32xi1>, vector<2x32xf32>
    %241 = vector.shape_cast %205 : vector<2x1xi1> to vector<2x1xi1>
    %242 = vector.broadcast %241 : vector<2x1xi1> to vector<2x32xi1>
    %243 = arith.select %242, %235, %116 : vector<2x32xi1>, vector<2x32xf32>
    %244 = arith.truncf %237 : vector<2x32xf32> to vector<2x32xbf16>
    %cst_86 = arith.constant dense<0.000000e+00> : vector<2x128xf32>
    %245 = tpu.matmul %244, %27, %cst_86 {dimension_numbers = #tpu.dot_dimension_numbers<[1], [0], [0], [1], [0, 0, 1, 1], [], []>} : vector<2x32xbf16>, vector<32x128xbf16>, vector<2x128xf32> -> vector<2x128xf32>
    %246 = arith.addf %245, %31 : vector<2x128xf32>
    %247 = arith.truncf %150 : vector<2x32xf32> to vector<2x32xbf16>
    %cst_87 = arith.constant dense<0.000000e+00> : vector<2x128xf32>
    %248 = tpu.matmul %247, %25, %cst_87 {dimension_numbers = #tpu.dot_dimension_numbers<[1], [0], [0], [1], [0, 0, 1, 1], [], []>} : vector<2x32xbf16>, vector<32x128xbf16>, vector<2x128xf32> -> vector<2x128xf32>
    %249 = arith.addf %246, %248 : vector<2x128xf32>
    %250 = vector.extract_strided_slice %249 {offsets = [0, 0], sizes = [2, 32], strides = [1, 1]} : vector<2x128xf32> to vector<2x32xf32>
    %251 = arith.negf %250 : vector<2x32xf32>
    %252 = math.exp %251 : vector<2x32xf32>
    %cst_88 = arith.constant 1.000000e+00 : f32
    %253 = vector.broadcast %cst_88 : f32 to vector<2x32xf32>
    %254 = arith.addf %253, %252 : vector<2x32xf32>
    %255 = arith.divf %253, %254 : vector<2x32xf32>
    %256 = vector.extract_strided_slice %249 {offsets = [0, 32], sizes = [2, 32], strides = [1, 1]} : vector<2x128xf32> to vector<2x32xf32>
    %257 = arith.negf %256 : vector<2x32xf32>
    %258 = math.exp %257 : vector<2x32xf32>
    %cst_89 = arith.constant 1.000000e+00 : f32
    %259 = vector.broadcast %cst_89 : f32 to vector<2x32xf32>
    %260 = arith.addf %259, %258 : vector<2x32xf32>
    %261 = arith.divf %259, %260 : vector<2x32xf32>
    %262 = vector.extract_strided_slice %249 {offsets = [0, 64], sizes = [2, 32], strides = [1, 1]} : vector<2x128xf32> to vector<2x32xf32>
    %263 = math.tanh %262 : vector<2x32xf32>
    %264 = vector.extract_strided_slice %249 {offsets = [0, 96], sizes = [2, 32], strides = [1, 1]} : vector<2x128xf32> to vector<2x32xf32>
    %265 = arith.negf %264 : vector<2x32xf32>
    %266 = math.exp %265 : vector<2x32xf32>
    %cst_90 = arith.constant 1.000000e+00 : f32
    %267 = vector.broadcast %cst_90 : f32 to vector<2x32xf32>
    %268 = arith.addf %267, %266 : vector<2x32xf32>
    %269 = arith.divf %267, %268 : vector<2x32xf32>
    %270 = arith.mulf %261, %153 : vector<2x32xf32>
    %271 = arith.mulf %255, %263 : vector<2x32xf32>
    %272 = arith.addf %270, %271 : vector<2x32xf32>
    %273 = math.tanh %272 : vector<2x32xf32>
    %274 = arith.mulf %269, %273 : vector<2x32xf32>
    %275 = vector.shape_cast %205 : vector<2x1xi1> to vector<2x1xi1>
    %276 = vector.broadcast %275 : vector<2x1xi1> to vector<2x32xi1>
    %277 = arith.select %276, %274, %150 : vector<2x32xi1>, vector<2x32xf32>
    %278 = vector.shape_cast %205 : vector<2x1xi1> to vector<2x1xi1>
    %279 = vector.broadcast %278 : vector<2x1xi1> to vector<2x32xi1>
    %280 = arith.select %279, %272, %153 : vector<2x32xi1>, vector<2x32xf32>
    %281 = arith.truncf %274 : vector<2x32xf32> to vector<2x32xbf16>
    %cst_91 = arith.constant dense<0.000000e+00> : vector<2x32xf32>
    %282 = tpu.matmul %281, %12, %cst_91 {dimension_numbers = #tpu.dot_dimension_numbers<[1], [0], [0], [1], [0, 0, 1, 1], [], []>} : vector<2x32xbf16>, vector<32x32xbf16>, vector<2x32xf32> -> vector<2x32xf32>
    %283 = arith.addf %282, %34 : vector<2x32xf32>
    %284 = vector.extract_strided_slice %283 {offsets = [0, 0], sizes = [2, 16], strides = [1, 1]} : vector<2x32xf32> to vector<2x16xf32>
    %285 = vector.extract_strided_slice %283 {offsets = [0, 16], sizes = [2, 16], strides = [1, 1]} : vector<2x32xf32> to vector<2x16xf32>
    %286 = math.exp %285 : vector<2x16xf32>
    %287 = arith.mulf %286, %203 : vector<2x16xf32>
    %288 = arith.addf %284, %287 : vector<2x16xf32>
    %289 = tpu.concatenate %288, %283 in 1 : vector<2x16xf32>, vector<2x32xf32> -> vector<2x48xf32>
    %cst_92 = arith.constant 0.000000e+00 : f32
    %290 = vector.shape_cast %205 : vector<2x1xi1> to vector<2x1xi1>
    %291 = vector.broadcast %290 : vector<2x1xi1> to vector<2x48xi1>
    %292 = vector.broadcast %cst_92 : f32 to vector<2x48xf32>
    %293 = arith.select %291, %289, %292 : vector<2x48xi1>, vector<2x48xf32>
    %294 = vector.extract_strided_slice %274 {offsets = [0, 0], sizes = [1, 32], strides = [1, 1]} : vector<2x32xf32> to vector<1x32xf32>
    %295 = arith.truncf %294 : vector<1x32xf32> to vector<1x32xbf16>
    %cst_93 = arith.constant dense<0.000000e+00> : vector<1x8xf32>
    %296 = tpu.matmul %295, %7, %cst_93 {dimension_numbers = #tpu.dot_dimension_numbers<[1], [0], [0], [1], [0, 0, 1, 1], [], []>} : vector<1x32xbf16>, vector<32x8xbf16>, vector<1x8xf32> -> vector<1x8xf32>
    %297 = vector.extract_strided_slice %274 {offsets = [1, 0], sizes = [1, 32], strides = [1, 1]} : vector<2x32xf32> to vector<1x32xf32>
    %298 = arith.truncf %297 : vector<1x32xf32> to vector<1x32xbf16>
    %cst_94 = arith.constant dense<0.000000e+00> : vector<1x8xf32>
    %299 = tpu.matmul %298, %9, %cst_94 {dimension_numbers = #tpu.dot_dimension_numbers<[1], [0], [0], [1], [0, 0, 1, 1], [], []>} : vector<1x32xbf16>, vector<32x8xbf16>, vector<1x8xf32> -> vector<1x8xf32>
    %300 = tpu.concatenate %296, %299 in 0 : vector<1x8xf32>, vector<1x8xf32> -> vector<2x8xf32>
    %301 = arith.addf %300, %1 : vector<2x8xf32>
    %cst_95 = arith.constant dense<0xFF800000> : vector<2xf32>
    %302 = vector.multi_reduction <maximumf>, %301, %cst_95 [1] : vector<2x8xf32> to vector<2xf32>
    %303 = vector.shape_cast %302 : vector<2xf32> to vector<2x1xf32>
    %304 = vector.broadcast %303 : vector<2x1xf32> to vector<2x8xf32>
    %305 = arith.subf %301, %304 : vector<2x8xf32>
    %306 = math.exp %305 : vector<2x8xf32>
    %cst_96 = arith.constant dense<0.000000e+00> : vector<2xf32>
    %307 = vector.multi_reduction <add>, %306, %cst_96 [1] : vector<2x8xf32> to vector<2xf32>
    %308 = vector.shape_cast %307 : vector<2xf32> to vector<2x1xf32>
    %309 = tpu.reciprocal %308 {approx = true} : vector<2x1xf32> -> vector<2x1xf32>
    %310 = vector.broadcast %309 : vector<2x1xf32> to vector<2x8xf32>
    %311 = arith.mulf %306, %310 : vector<2x8xf32>
    %312 = vector.extract_strided_slice %311 {offsets = [0, 0], sizes = [1, 8], strides = [1, 1]} : vector<2x8xf32> to vector<1x8xf32>
    %313 = arith.truncf %312 : vector<1x8xf32> to vector<1x8xbf16>
    %cst_97 = arith.constant dense<0.000000e+00> : vector<1x32xf32>
    %314 = tpu.matmul %313, %3, %cst_97 {dimension_numbers = #tpu.dot_dimension_numbers<[1], [0], [0], [1], [0, 0, 1, 1], [], []>} : vector<1x8xbf16>, vector<8x32xbf16>, vector<1x32xf32> -> vector<1x32xf32>
    %315 = vector.extract_strided_slice %311 {offsets = [1, 0], sizes = [1, 8], strides = [1, 1]} : vector<2x8xf32> to vector<1x8xf32>
    %316 = arith.truncf %315 : vector<1x8xf32> to vector<1x8xbf16>
    %cst_98 = arith.constant dense<0.000000e+00> : vector<1x32xf32>
    %317 = tpu.matmul %316, %5, %cst_98 {dimension_numbers = #tpu.dot_dimension_numbers<[1], [0], [0], [1], [0, 0, 1, 1], [], []>} : vector<1x8xbf16>, vector<8x32xbf16>, vector<1x32xf32> -> vector<1x32xf32>
    %318 = tpu.concatenate %314, %317 in 0 : vector<1x32xf32>, vector<1x32xf32> -> vector<2x32xf32>
    %319 = tpu.concatenate %318, %274 in 1 : vector<2x32xf32>, vector<2x32xf32> -> vector<2x64xf32>
    %320 = arith.truncf %319 : vector<2x64xf32> to vector<2x64xbf16>
    %cst_99 = arith.constant dense<0.000000e+00> : vector<2x32xf32>
    %321 = tpu.matmul %320, %10, %cst_99 {dimension_numbers = #tpu.dot_dimension_numbers<[1], [0], [0], [1], [0, 0, 1, 1], [], []>} : vector<2x64xbf16>, vector<64x32xbf16>, vector<2x32xf32> -> vector<2x32xf32>
    %322 = math.tanh %321 : vector<2x32xf32>
    %323 = arith.index_cast %c1_i32 : i32 to index
    %c0_100 = arith.constant 0 : index
    %c0_101 = arith.constant 0 : index
    %324 = vector.load %arg16[%323, %c0_100, %c0_101] : memref<5x2x48xf32, #tpu.memory_space<vmem>>, vector<1x2x48xf32>
    %325 = vector.shape_cast %324 : vector<1x2x48xf32> to vector<2x48xf32>
    %326 = vector.shape_cast %293 : vector<2x48xf32> to vector<1x2x48xf32>
    tpu.vector_store %arg16[%323, %c0_100, %c0_101], %326 {strides = array<i32>} : memref<5x2x48xf32, #tpu.memory_space<vmem>>, vector<1x2x48xf32>,
    %c2_i32 = arith.constant 2 : i32
    %327 = arith.sitofp %c2_i32 : i32 to f32
    %328 = arith.index_cast %c2_i32 : i32 to index
    %c0_102 = arith.constant 0 : index
    %c0_103 = arith.constant 0 : index
    %329 = vector.load %arg7[%328, %c0_102, %c0_103] : memref<5x2x16xf32, #tpu.memory_space<vmem>>, vector<1x2x16xf32>
    %330 = vector.shape_cast %329 : vector<1x2x16xf32> to vector<2x16xf32>
    %331 = vector.broadcast %327 : f32 to vector<2x1xf32>
    %332 = arith.cmpf olt, %331, %0 : vector<2x1xf32>
    %333 = tpu.concatenate %288, %322 in 1 : vector<2x16xf32>, vector<2x32xf32> -> vector<2x48xf32>
    %334 = arith.truncf %333 : vector<2x48xf32> to vector<2x48xbf16>
    %cst_104 = arith.constant dense<0.000000e+00> : vector<2x128xf32>
    %335 = tpu.matmul %334, %11, %cst_104 {dimension_numbers = #tpu.dot_dimension_numbers<[1], [0], [0], [1], [0, 0, 1, 1], [], []>} : vector<2x48xbf16>, vector<48x128xbf16>, vector<2x128xf32> -> vector<2x128xf32>
    %336 = arith.addf %335, %21 : vector<2x128xf32>
    %337 = arith.truncf %240 : vector<2x32xf32> to vector<2x32xbf16>
    %cst_105 = arith.constant dense<0.000000e+00> : vector<2x128xf32>
    %338 = tpu.matmul %337, %23, %cst_105 {dimension_numbers = #tpu.dot_dimension_numbers<[1], [0], [0], [1], [0, 0, 1, 1], [], []>} : vector<2x32xbf16>, vector<32x128xbf16>, vector<2x128xf32> -> vector<2x128xf32>
    %339 = arith.addf %336, %338 : vector<2x128xf32>
    %340 = vector.extract_strided_slice %339 {offsets = [0, 0], sizes = [2, 32], strides = [1, 1]} : vector<2x128xf32> to vector<2x32xf32>
    %341 = arith.negf %340 : vector<2x32xf32>
    %342 = math.exp %341 : vector<2x32xf32>
    %cst_106 = arith.constant 1.000000e+00 : f32
    %343 = vector.broadcast %cst_106 : f32 to vector<2x32xf32>
    %344 = arith.addf %343, %342 : vector<2x32xf32>
    %345 = arith.divf %343, %344 : vector<2x32xf32>
    %346 = vector.extract_strided_slice %339 {offsets = [0, 32], sizes = [2, 32], strides = [1, 1]} : vector<2x128xf32> to vector<2x32xf32>
    %347 = arith.negf %346 : vector<2x32xf32>
    %348 = math.exp %347 : vector<2x32xf32>
    %cst_107 = arith.constant 1.000000e+00 : f32
    %349 = vector.broadcast %cst_107 : f32 to vector<2x32xf32>
    %350 = arith.addf %349, %348 : vector<2x32xf32>
    %351 = arith.divf %349, %350 : vector<2x32xf32>
    %352 = vector.extract_strided_slice %339 {offsets = [0, 64], sizes = [2, 32], strides = [1, 1]} : vector<2x128xf32> to vector<2x32xf32>
    %353 = math.tanh %352 : vector<2x32xf32>
    %354 = vector.extract_strided_slice %339 {offsets = [0, 96], sizes = [2, 32], strides = [1, 1]} : vector<2x128xf32> to vector<2x32xf32>
    %355 = arith.negf %354 : vector<2x32xf32>
    %356 = math.exp %355 : vector<2x32xf32>
    %cst_108 = arith.constant 1.000000e+00 : f32
    %357 = vector.broadcast %cst_108 : f32 to vector<2x32xf32>
    %358 = arith.addf %357, %356 : vector<2x32xf32>
    %359 = arith.divf %357, %358 : vector<2x32xf32>
    %360 = arith.mulf %351, %243 : vector<2x32xf32>
    %361 = arith.mulf %345, %353 : vector<2x32xf32>
    %362 = arith.addf %360, %361 : vector<2x32xf32>
    %363 = math.tanh %362 : vector<2x32xf32>
    %364 = arith.mulf %359, %363 : vector<2x32xf32>
    %365 = vector.shape_cast %332 : vector<2x1xi1> to vector<2x1xi1>
    %366 = vector.broadcast %365 : vector<2x1xi1> to vector<2x32xi1>
    %367 = arith.select %366, %364, %240 : vector<2x32xi1>, vector<2x32xf32>
    %368 = vector.shape_cast %332 : vector<2x1xi1> to vector<2x1xi1>
    %369 = vector.broadcast %368 : vector<2x1xi1> to vector<2x32xi1>
    %370 = arith.select %369, %362, %243 : vector<2x32xi1>, vector<2x32xf32>
    %371 = arith.truncf %364 : vector<2x32xf32> to vector<2x32xbf16>
    %cst_109 = arith.constant dense<0.000000e+00> : vector<2x128xf32>
    %372 = tpu.matmul %371, %27, %cst_109 {dimension_numbers = #tpu.dot_dimension_numbers<[1], [0], [0], [1], [0, 0, 1, 1], [], []>} : vector<2x32xbf16>, vector<32x128xbf16>, vector<2x128xf32> -> vector<2x128xf32>
    %373 = arith.addf %372, %31 : vector<2x128xf32>
    %374 = arith.truncf %277 : vector<2x32xf32> to vector<2x32xbf16>
    %cst_110 = arith.constant dense<0.000000e+00> : vector<2x128xf32>
    %375 = tpu.matmul %374, %25, %cst_110 {dimension_numbers = #tpu.dot_dimension_numbers<[1], [0], [0], [1], [0, 0, 1, 1], [], []>} : vector<2x32xbf16>, vector<32x128xbf16>, vector<2x128xf32> -> vector<2x128xf32>
    %376 = arith.addf %373, %375 : vector<2x128xf32>
    %377 = vector.extract_strided_slice %376 {offsets = [0, 0], sizes = [2, 32], strides = [1, 1]} : vector<2x128xf32> to vector<2x32xf32>
    %378 = arith.negf %377 : vector<2x32xf32>
    %379 = math.exp %378 : vector<2x32xf32>
    %cst_111 = arith.constant 1.000000e+00 : f32
    %380 = vector.broadcast %cst_111 : f32 to vector<2x32xf32>
    %381 = arith.addf %380, %379 : vector<2x32xf32>
    %382 = arith.divf %380, %381 : vector<2x32xf32>
    %383 = vector.extract_strided_slice %376 {offsets = [0, 32], sizes = [2, 32], strides = [1, 1]} : vector<2x128xf32> to vector<2x32xf32>
    %384 = arith.negf %383 : vector<2x32xf32>
    %385 = math.exp %384 : vector<2x32xf32>
    %cst_112 = arith.constant 1.000000e+00 : f32
    %386 = vector.broadcast %cst_112 : f32 to vector<2x32xf32>
    %387 = arith.addf %386, %385 : vector<2x32xf32>
    %388 = arith.divf %386, %387 : vector<2x32xf32>
    %389 = vector.extract_strided_slice %376 {offsets = [0, 64], sizes = [2, 32], strides = [1, 1]} : vector<2x128xf32> to vector<2x32xf32>
    %390 = math.tanh %389 : vector<2x32xf32>
    %391 = vector.extract_strided_slice %376 {offsets = [0, 96], sizes = [2, 32], strides = [1, 1]} : vector<2x128xf32> to vector<2x32xf32>
    %392 = arith.negf %391 : vector<2x32xf32>
    %393 = math.exp %392 : vector<2x32xf32>
    %cst_113 = arith.constant 1.000000e+00 : f32
    %394 = vector.broadcast %cst_113 : f32 to vector<2x32xf32>
    %395 = arith.addf %394, %393 : vector<2x32xf32>
    %396 = arith.divf %394, %395 : vector<2x32xf32>
    %397 = arith.mulf %388, %280 : vector<2x32xf32>
    %398 = arith.mulf %382, %390 : vector<2x32xf32>
    %399 = arith.addf %397, %398 : vector<2x32xf32>
    %400 = math.tanh %399 : vector<2x32xf32>
    %401 = arith.mulf %396, %400 : vector<2x32xf32>
    %402 = vector.shape_cast %332 : vector<2x1xi1> to vector<2x1xi1>
    %403 = vector.broadcast %402 : vector<2x1xi1> to vector<2x32xi1>
    %404 = arith.select %403, %401, %277 : vector<2x32xi1>, vector<2x32xf32>
    %405 = vector.shape_cast %332 : vector<2x1xi1> to vector<2x1xi1>
    %406 = vector.broadcast %405 : vector<2x1xi1> to vector<2x32xi1>
    %407 = arith.select %406, %399, %280 : vector<2x32xi1>, vector<2x32xf32>
    %408 = arith.truncf %401 : vector<2x32xf32> to vector<2x32xbf16>
    %cst_114 = arith.constant dense<0.000000e+00> : vector<2x32xf32>
    %409 = tpu.matmul %408, %12, %cst_114 {dimension_numbers = #tpu.dot_dimension_numbers<[1], [0], [0], [1], [0, 0, 1, 1], [], []>} : vector<2x32xbf16>, vector<32x32xbf16>, vector<2x32xf32> -> vector<2x32xf32>
    %410 = arith.addf %409, %34 : vector<2x32xf32>
    %411 = vector.extract_strided_slice %410 {offsets = [0, 0], sizes = [2, 16], strides = [1, 1]} : vector<2x32xf32> to vector<2x16xf32>
    %412 = vector.extract_strided_slice %410 {offsets = [0, 16], sizes = [2, 16], strides = [1, 1]} : vector<2x32xf32> to vector<2x16xf32>
    %413 = math.exp %412 : vector<2x16xf32>
    %414 = arith.mulf %413, %330 : vector<2x16xf32>
    %415 = arith.addf %411, %414 : vector<2x16xf32>
    %416 = tpu.concatenate %415, %410 in 1 : vector<2x16xf32>, vector<2x32xf32> -> vector<2x48xf32>
    %cst_115 = arith.constant 0.000000e+00 : f32
    %417 = vector.shape_cast %332 : vector<2x1xi1> to vector<2x1xi1>
    %418 = vector.broadcast %417 : vector<2x1xi1> to vector<2x48xi1>
    %419 = vector.broadcast %cst_115 : f32 to vector<2x48xf32>
    %420 = arith.select %418, %416, %419 : vector<2x48xi1>, vector<2x48xf32>
    %421 = vector.extract_strided_slice %401 {offsets = [0, 0], sizes = [1, 32], strides = [1, 1]} : vector<2x32xf32> to vector<1x32xf32>
    %422 = arith.truncf %421 : vector<1x32xf32> to vector<1x32xbf16>
    %cst_116 = arith.constant dense<0.000000e+00> : vector<1x8xf32>
    %423 = tpu.matmul %422, %7, %cst_116 {dimension_numbers = #tpu.dot_dimension_numbers<[1], [0], [0], [1], [0, 0, 1, 1], [], []>} : vector<1x32xbf16>, vector<32x8xbf16>, vector<1x8xf32> -> vector<1x8xf32>
    %424 = vector.extract_strided_slice %401 {offsets = [1, 0], sizes = [1, 32], strides = [1, 1]} : vector<2x32xf32> to vector<1x32xf32>
    %425 = arith.truncf %424 : vector<1x32xf32> to vector<1x32xbf16>
    %cst_117 = arith.constant dense<0.000000e+00> : vector<1x8xf32>
    %426 = tpu.matmul %425, %9, %cst_117 {dimension_numbers = #tpu.dot_dimension_numbers<[1], [0], [0], [1], [0, 0, 1, 1], [], []>} : vector<1x32xbf16>, vector<32x8xbf16>, vector<1x8xf32> -> vector<1x8xf32>
    %427 = tpu.concatenate %423, %426 in 0 : vector<1x8xf32>, vector<1x8xf32> -> vector<2x8xf32>
    %428 = arith.addf %427, %1 : vector<2x8xf32>
    %cst_118 = arith.constant dense<0xFF800000> : vector<2xf32>
    %429 = vector.multi_reduction <maximumf>, %428, %cst_118 [1] : vector<2x8xf32> to vector<2xf32>
    %430 = vector.shape_cast %429 : vector<2xf32> to vector<2x1xf32>
    %431 = vector.broadcast %430 : vector<2x1xf32> to vector<2x8xf32>
    %432 = arith.subf %428, %431 : vector<2x8xf32>
    %433 = math.exp %432 : vector<2x8xf32>
    %cst_119 = arith.constant dense<0.000000e+00> : vector<2xf32>
    %434 = vector.multi_reduction <add>, %433, %cst_119 [1] : vector<2x8xf32> to vector<2xf32>
    %435 = vector.shape_cast %434 : vector<2xf32> to vector<2x1xf32>
    %436 = tpu.reciprocal %435 {approx = true} : vector<2x1xf32> -> vector<2x1xf32>
    %437 = vector.broadcast %436 : vector<2x1xf32> to vector<2x8xf32>
    %438 = arith.mulf %433, %437 : vector<2x8xf32>
    %439 = vector.extract_strided_slice %438 {offsets = [0, 0], sizes = [1, 8], strides = [1, 1]} : vector<2x8xf32> to vector<1x8xf32>
    %440 = arith.truncf %439 : vector<1x8xf32> to vector<1x8xbf16>
    %cst_120 = arith.constant dense<0.000000e+00> : vector<1x32xf32>
    %441 = tpu.matmul %440, %3, %cst_120 {dimension_numbers = #tpu.dot_dimension_numbers<[1], [0], [0], [1], [0, 0, 1, 1], [], []>} : vector<1x8xbf16>, vector<8x32xbf16>, vector<1x32xf32> -> vector<1x32xf32>
    %442 = vector.extract_strided_slice %438 {offsets = [1, 0], sizes = [1, 8], strides = [1, 1]} : vector<2x8xf32> to vector<1x8xf32>
    %443 = arith.truncf %442 : vector<1x8xf32> to vector<1x8xbf16>
    %cst_121 = arith.constant dense<0.000000e+00> : vector<1x32xf32>
    %444 = tpu.matmul %443, %5, %cst_121 {dimension_numbers = #tpu.dot_dimension_numbers<[1], [0], [0], [1], [0, 0, 1, 1], [], []>} : vector<1x8xbf16>, vector<8x32xbf16>, vector<1x32xf32> -> vector<1x32xf32>
    %445 = tpu.concatenate %441, %444 in 0 : vector<1x32xf32>, vector<1x32xf32> -> vector<2x32xf32>
    %446 = tpu.concatenate %445, %401 in 1 : vector<2x32xf32>, vector<2x32xf32> -> vector<2x64xf32>
    %447 = arith.truncf %446 : vector<2x64xf32> to vector<2x64xbf16>
    %cst_122 = arith.constant dense<0.000000e+00> : vector<2x32xf32>
    %448 = tpu.matmul %447, %10, %cst_122 {dimension_numbers = #tpu.dot_dimension_numbers<[1], [0], [0], [1], [0, 0, 1, 1], [], []>} : vector<2x64xbf16>, vector<64x32xbf16>, vector<2x32xf32> -> vector<2x32xf32>
    %449 = math.tanh %448 : vector<2x32xf32>
    %450 = arith.index_cast %c2_i32 : i32 to index
    %c0_123 = arith.constant 0 : index
    %c0_124 = arith.constant 0 : index
    %451 = vector.load %arg16[%450, %c0_123, %c0_124] : memref<5x2x48xf32, #tpu.memory_space<vmem>>, vector<1x2x48xf32>
    %452 = vector.shape_cast %451 : vector<1x2x48xf32> to vector<2x48xf32>
    %453 = vector.shape_cast %420 : vector<2x48xf32> to vector<1x2x48xf32>
    tpu.vector_store %arg16[%450, %c0_123, %c0_124], %453 {strides = array<i32>} : memref<5x2x48xf32, #tpu.memory_space<vmem>>, vector<1x2x48xf32>,
    %c3_i32 = arith.constant 3 : i32
    %454 = arith.sitofp %c3_i32 : i32 to f32
    %455 = arith.index_cast %c3_i32 : i32 to index
    %c0_125 = arith.constant 0 : index
    %c0_126 = arith.constant 0 : index
    %456 = vector.load %arg7[%455, %c0_125, %c0_126] : memref<5x2x16xf32, #tpu.memory_space<vmem>>, vector<1x2x16xf32>
    %457 = vector.shape_cast %456 : vector<1x2x16xf32> to vector<2x16xf32>
    %458 = vector.broadcast %454 : f32 to vector<2x1xf32>
    %459 = arith.cmpf olt, %458, %0 : vector<2x1xf32>
    %460 = tpu.concatenate %415, %449 in 1 : vector<2x16xf32>, vector<2x32xf32> -> vector<2x48xf32>
    %461 = arith.truncf %460 : vector<2x48xf32> to vector<2x48xbf16>
    %cst_127 = arith.constant dense<0.000000e+00> : vector<2x128xf32>
    %462 = tpu.matmul %461, %11, %cst_127 {dimension_numbers = #tpu.dot_dimension_numbers<[1], [0], [0], [1], [0, 0, 1, 1], [], []>} : vector<2x48xbf16>, vector<48x128xbf16>, vector<2x128xf32> -> vector<2x128xf32>
    %463 = arith.addf %462, %21 : vector<2x128xf32>
    %464 = arith.truncf %367 : vector<2x32xf32> to vector<2x32xbf16>
    %cst_128 = arith.constant dense<0.000000e+00> : vector<2x128xf32>
    %465 = tpu.matmul %464, %23, %cst_128 {dimension_numbers = #tpu.dot_dimension_numbers<[1], [0], [0], [1], [0, 0, 1, 1], [], []>} : vector<2x32xbf16>, vector<32x128xbf16>, vector<2x128xf32> -> vector<2x128xf32>
    %466 = arith.addf %463, %465 : vector<2x128xf32>
    %467 = vector.extract_strided_slice %466 {offsets = [0, 0], sizes = [2, 32], strides = [1, 1]} : vector<2x128xf32> to vector<2x32xf32>
    %468 = arith.negf %467 : vector<2x32xf32>
    %469 = math.exp %468 : vector<2x32xf32>
    %cst_129 = arith.constant 1.000000e+00 : f32
    %470 = vector.broadcast %cst_129 : f32 to vector<2x32xf32>
    %471 = arith.addf %470, %469 : vector<2x32xf32>
    %472 = arith.divf %470, %471 : vector<2x32xf32>
    %473 = vector.extract_strided_slice %466 {offsets = [0, 32], sizes = [2, 32], strides = [1, 1]} : vector<2x128xf32> to vector<2x32xf32>
    %474 = arith.negf %473 : vector<2x32xf32>
    %475 = math.exp %474 : vector<2x32xf32>
    %cst_130 = arith.constant 1.000000e+00 : f32
    %476 = vector.broadcast %cst_130 : f32 to vector<2x32xf32>
    %477 = arith.addf %476, %475 : vector<2x32xf32>
    %478 = arith.divf %476, %477 : vector<2x32xf32>
    %479 = vector.extract_strided_slice %466 {offsets = [0, 64], sizes = [2, 32], strides = [1, 1]} : vector<2x128xf32> to vector<2x32xf32>
    %480 = math.tanh %479 : vector<2x32xf32>
    %481 = vector.extract_strided_slice %466 {offsets = [0, 96], sizes = [2, 32], strides = [1, 1]} : vector<2x128xf32> to vector<2x32xf32>
    %482 = arith.negf %481 : vector<2x32xf32>
    %483 = math.exp %482 : vector<2x32xf32>
    %cst_131 = arith.constant 1.000000e+00 : f32
    %484 = vector.broadcast %cst_131 : f32 to vector<2x32xf32>
    %485 = arith.addf %484, %483 : vector<2x32xf32>
    %486 = arith.divf %484, %485 : vector<2x32xf32>
    %487 = arith.mulf %478, %370 : vector<2x32xf32>
    %488 = arith.mulf %472, %480 : vector<2x32xf32>
    %489 = arith.addf %487, %488 : vector<2x32xf32>
    %490 = math.tanh %489 : vector<2x32xf32>
    %491 = arith.mulf %486, %490 : vector<2x32xf32>
    %492 = vector.shape_cast %459 : vector<2x1xi1> to vector<2x1xi1>
    %493 = vector.broadcast %492 : vector<2x1xi1> to vector<2x32xi1>
    %494 = arith.select %493, %491, %367 : vector<2x32xi1>, vector<2x32xf32>
    %495 = vector.shape_cast %459 : vector<2x1xi1> to vector<2x1xi1>
    %496 = vector.broadcast %495 : vector<2x1xi1> to vector<2x32xi1>
    %497 = arith.select %496, %489, %370 : vector<2x32xi1>, vector<2x32xf32>
    %498 = arith.truncf %491 : vector<2x32xf32> to vector<2x32xbf16>
    %cst_132 = arith.constant dense<0.000000e+00> : vector<2x128xf32>
    %499 = tpu.matmul %498, %27, %cst_132 {dimension_numbers = #tpu.dot_dimension_numbers<[1], [0], [0], [1], [0, 0, 1, 1], [], []>} : vector<2x32xbf16>, vector<32x128xbf16>, vector<2x128xf32> -> vector<2x128xf32>
    %500 = arith.addf %499, %31 : vector<2x128xf32>
    %501 = arith.truncf %404 : vector<2x32xf32> to vector<2x32xbf16>
    %cst_133 = arith.constant dense<0.000000e+00> : vector<2x128xf32>
    %502 = tpu.matmul %501, %25, %cst_133 {dimension_numbers = #tpu.dot_dimension_numbers<[1], [0], [0], [1], [0, 0, 1, 1], [], []>} : vector<2x32xbf16>, vector<32x128xbf16>, vector<2x128xf32> -> vector<2x128xf32>
    %503 = arith.addf %500, %502 : vector<2x128xf32>
    %504 = vector.extract_strided_slice %503 {offsets = [0, 0], sizes = [2, 32], strides = [1, 1]} : vector<2x128xf32> to vector<2x32xf32>
    %505 = arith.negf %504 : vector<2x32xf32>
    %506 = math.exp %505 : vector<2x32xf32>
    %cst_134 = arith.constant 1.000000e+00 : f32
    %507 = vector.broadcast %cst_134 : f32 to vector<2x32xf32>
    %508 = arith.addf %507, %506 : vector<2x32xf32>
    %509 = arith.divf %507, %508 : vector<2x32xf32>
    %510 = vector.extract_strided_slice %503 {offsets = [0, 32], sizes = [2, 32], strides = [1, 1]} : vector<2x128xf32> to vector<2x32xf32>
    %511 = arith.negf %510 : vector<2x32xf32>
    %512 = math.exp %511 : vector<2x32xf32>
    %cst_135 = arith.constant 1.000000e+00 : f32
    %513 = vector.broadcast %cst_135 : f32 to vector<2x32xf32>
    %514 = arith.addf %513, %512 : vector<2x32xf32>
    %515 = arith.divf %513, %514 : vector<2x32xf32>
    %516 = vector.extract_strided_slice %503 {offsets = [0, 64], sizes = [2, 32], strides = [1, 1]} : vector<2x128xf32> to vector<2x32xf32>
    %517 = math.tanh %516 : vector<2x32xf32>
    %518 = vector.extract_strided_slice %503 {offsets = [0, 96], sizes = [2, 32], strides = [1, 1]} : vector<2x128xf32> to vector<2x32xf32>
    %519 = arith.negf %518 : vector<2x32xf32>
    %520 = math.exp %519 : vector<2x32xf32>
    %cst_136 = arith.constant 1.000000e+00 : f32
    %521 = vector.broadcast %cst_136 : f32 to vector<2x32xf32>
    %522 = arith.addf %521, %520 : vector<2x32xf32>
    %523 = arith.divf %521, %522 : vector<2x32xf32>
    %524 = arith.mulf %515, %407 : vector<2x32xf32>
    %525 = arith.mulf %509, %517 : vector<2x32xf32>
    %526 = arith.addf %524, %525 : vector<2x32xf32>
    %527 = math.tanh %526 : vector<2x32xf32>
    %528 = arith.mulf %523, %527 : vector<2x32xf32>
    %529 = vector.shape_cast %459 : vector<2x1xi1> to vector<2x1xi1>
    %530 = vector.broadcast %529 : vector<2x1xi1> to vector<2x32xi1>
    %531 = arith.select %530, %528, %404 : vector<2x32xi1>, vector<2x32xf32>
    %532 = vector.shape_cast %459 : vector<2x1xi1> to vector<2x1xi1>
    %533 = vector.broadcast %532 : vector<2x1xi1> to vector<2x32xi1>
    %534 = arith.select %533, %526, %407 : vector<2x32xi1>, vector<2x32xf32>
    %535 = arith.truncf %528 : vector<2x32xf32> to vector<2x32xbf16>
    %cst_137 = arith.constant dense<0.000000e+00> : vector<2x32xf32>
    %536 = tpu.matmul %535, %12, %cst_137 {dimension_numbers = #tpu.dot_dimension_numbers<[1], [0], [0], [1], [0, 0, 1, 1], [], []>} : vector<2x32xbf16>, vector<32x32xbf16>, vector<2x32xf32> -> vector<2x32xf32>
    %537 = arith.addf %536, %34 : vector<2x32xf32>
    %538 = vector.extract_strided_slice %537 {offsets = [0, 0], sizes = [2, 16], strides = [1, 1]} : vector<2x32xf32> to vector<2x16xf32>
    %539 = vector.extract_strided_slice %537 {offsets = [0, 16], sizes = [2, 16], strides = [1, 1]} : vector<2x32xf32> to vector<2x16xf32>
    %540 = math.exp %539 : vector<2x16xf32>
    %541 = arith.mulf %540, %457 : vector<2x16xf32>
    %542 = arith.addf %538, %541 : vector<2x16xf32>
    %543 = tpu.concatenate %542, %537 in 1 : vector<2x16xf32>, vector<2x32xf32> -> vector<2x48xf32>
    %cst_138 = arith.constant 0.000000e+00 : f32
    %544 = vector.shape_cast %459 : vector<2x1xi1> to vector<2x1xi1>
    %545 = vector.broadcast %544 : vector<2x1xi1> to vector<2x48xi1>
    %546 = vector.broadcast %cst_138 : f32 to vector<2x48xf32>
    %547 = arith.select %545, %543, %546 : vector<2x48xi1>, vector<2x48xf32>
    %548 = vector.extract_strided_slice %528 {offsets = [0, 0], sizes = [1, 32], strides = [1, 1]} : vector<2x32xf32> to vector<1x32xf32>
    %549 = arith.truncf %548 : vector<1x32xf32> to vector<1x32xbf16>
    %cst_139 = arith.constant dense<0.000000e+00> : vector<1x8xf32>
    %550 = tpu.matmul %549, %7, %cst_139 {dimension_numbers = #tpu.dot_dimension_numbers<[1], [0], [0], [1], [0, 0, 1, 1], [], []>} : vector<1x32xbf16>, vector<32x8xbf16>, vector<1x8xf32> -> vector<1x8xf32>
    %551 = vector.extract_strided_slice %528 {offsets = [1, 0], sizes = [1, 32], strides = [1, 1]} : vector<2x32xf32> to vector<1x32xf32>
    %552 = arith.truncf %551 : vector<1x32xf32> to vector<1x32xbf16>
    %cst_140 = arith.constant dense<0.000000e+00> : vector<1x8xf32>
    %553 = tpu.matmul %552, %9, %cst_140 {dimension_numbers = #tpu.dot_dimension_numbers<[1], [0], [0], [1], [0, 0, 1, 1], [], []>} : vector<1x32xbf16>, vector<32x8xbf16>, vector<1x8xf32> -> vector<1x8xf32>
    %554 = tpu.concatenate %550, %553 in 0 : vector<1x8xf32>, vector<1x8xf32> -> vector<2x8xf32>
    %555 = arith.addf %554, %1 : vector<2x8xf32>
    %cst_141 = arith.constant dense<0xFF800000> : vector<2xf32>
    %556 = vector.multi_reduction <maximumf>, %555, %cst_141 [1] : vector<2x8xf32> to vector<2xf32>
    %557 = vector.shape_cast %556 : vector<2xf32> to vector<2x1xf32>
    %558 = vector.broadcast %557 : vector<2x1xf32> to vector<2x8xf32>
    %559 = arith.subf %555, %558 : vector<2x8xf32>
    %560 = math.exp %559 : vector<2x8xf32>
    %cst_142 = arith.constant dense<0.000000e+00> : vector<2xf32>
    %561 = vector.multi_reduction <add>, %560, %cst_142 [1] : vector<2x8xf32> to vector<2xf32>
    %562 = vector.shape_cast %561 : vector<2xf32> to vector<2x1xf32>
    %563 = tpu.reciprocal %562 {approx = true} : vector<2x1xf32> -> vector<2x1xf32>
    %564 = vector.broadcast %563 : vector<2x1xf32> to vector<2x8xf32>
    %565 = arith.mulf %560, %564 : vector<2x8xf32>
    %566 = vector.extract_strided_slice %565 {offsets = [0, 0], sizes = [1, 8], strides = [1, 1]} : vector<2x8xf32> to vector<1x8xf32>
    %567 = arith.truncf %566 : vector<1x8xf32> to vector<1x8xbf16>
    %cst_143 = arith.constant dense<0.000000e+00> : vector<1x32xf32>
    %568 = tpu.matmul %567, %3, %cst_143 {dimension_numbers = #tpu.dot_dimension_numbers<[1], [0], [0], [1], [0, 0, 1, 1], [], []>} : vector<1x8xbf16>, vector<8x32xbf16>, vector<1x32xf32> -> vector<1x32xf32>
    %569 = vector.extract_strided_slice %565 {offsets = [1, 0], sizes = [1, 8], strides = [1, 1]} : vector<2x8xf32> to vector<1x8xf32>
    %570 = arith.truncf %569 : vector<1x8xf32> to vector<1x8xbf16>
    %cst_144 = arith.constant dense<0.000000e+00> : vector<1x32xf32>
    %571 = tpu.matmul %570, %5, %cst_144 {dimension_numbers = #tpu.dot_dimension_numbers<[1], [0], [0], [1], [0, 0, 1, 1], [], []>} : vector<1x8xbf16>, vector<8x32xbf16>, vector<1x32xf32> -> vector<1x32xf32>
    %572 = tpu.concatenate %568, %571 in 0 : vector<1x32xf32>, vector<1x32xf32> -> vector<2x32xf32>
    %573 = tpu.concatenate %572, %528 in 1 : vector<2x32xf32>, vector<2x32xf32> -> vector<2x64xf32>
    %574 = arith.truncf %573 : vector<2x64xf32> to vector<2x64xbf16>
    %cst_145 = arith.constant dense<0.000000e+00> : vector<2x32xf32>
    %575 = tpu.matmul %574, %10, %cst_145 {dimension_numbers = #tpu.dot_dimension_numbers<[1], [0], [0], [1], [0, 0, 1, 1], [], []>} : vector<2x64xbf16>, vector<64x32xbf16>, vector<2x32xf32> -> vector<2x32xf32>
    %576 = math.tanh %575 : vector<2x32xf32>
    %577 = arith.index_cast %c3_i32 : i32 to index
    %c0_146 = arith.constant 0 : index
    %c0_147 = arith.constant 0 : index
    %578 = vector.load %arg16[%577, %c0_146, %c0_147] : memref<5x2x48xf32, #tpu.memory_space<vmem>>, vector<1x2x48xf32>
    %579 = vector.shape_cast %578 : vector<1x2x48xf32> to vector<2x48xf32>
    %580 = vector.shape_cast %547 : vector<2x48xf32> to vector<1x2x48xf32>
    tpu.vector_store %arg16[%577, %c0_146, %c0_147], %580 {strides = array<i32>} : memref<5x2x48xf32, #tpu.memory_space<vmem>>, vector<1x2x48xf32>,
    %c4_i32 = arith.constant 4 : i32
    %581 = arith.sitofp %c4_i32 : i32 to f32
    %582 = arith.index_cast %c4_i32 : i32 to index
    %c0_148 = arith.constant 0 : index
    %c0_149 = arith.constant 0 : index
    %583 = vector.load %arg7[%582, %c0_148, %c0_149] : memref<5x2x16xf32, #tpu.memory_space<vmem>>, vector<1x2x16xf32>
    %584 = vector.shape_cast %583 : vector<1x2x16xf32> to vector<2x16xf32>
    %585 = vector.broadcast %581 : f32 to vector<2x1xf32>
    %586 = arith.cmpf olt, %585, %0 : vector<2x1xf32>
    %587 = tpu.concatenate %542, %576 in 1 : vector<2x16xf32>, vector<2x32xf32> -> vector<2x48xf32>
    %588 = arith.truncf %587 : vector<2x48xf32> to vector<2x48xbf16>
    %cst_150 = arith.constant dense<0.000000e+00> : vector<2x128xf32>
    %589 = tpu.matmul %588, %11, %cst_150 {dimension_numbers = #tpu.dot_dimension_numbers<[1], [0], [0], [1], [0, 0, 1, 1], [], []>} : vector<2x48xbf16>, vector<48x128xbf16>, vector<2x128xf32> -> vector<2x128xf32>
    %590 = arith.addf %589, %21 : vector<2x128xf32>
    %591 = arith.truncf %494 : vector<2x32xf32> to vector<2x32xbf16>
    %cst_151 = arith.constant dense<0.000000e+00> : vector<2x128xf32>
    %592 = tpu.matmul %591, %23, %cst_151 {dimension_numbers = #tpu.dot_dimension_numbers<[1], [0], [0], [1], [0, 0, 1, 1], [], []>} : vector<2x32xbf16>, vector<32x128xbf16>, vector<2x128xf32> -> vector<2x128xf32>
    %593 = arith.addf %590, %592 : vector<2x128xf32>
    %594 = vector.extract_strided_slice %593 {offsets = [0, 0], sizes = [2, 32], strides = [1, 1]} : vector<2x128xf32> to vector<2x32xf32>
    %595 = arith.negf %594 : vector<2x32xf32>
    %596 = math.exp %595 : vector<2x32xf32>
    %cst_152 = arith.constant 1.000000e+00 : f32
    %597 = vector.broadcast %cst_152 : f32 to vector<2x32xf32>
    %598 = arith.addf %597, %596 : vector<2x32xf32>
    %599 = arith.divf %597, %598 : vector<2x32xf32>
    %600 = vector.extract_strided_slice %593 {offsets = [0, 32], sizes = [2, 32], strides = [1, 1]} : vector<2x128xf32> to vector<2x32xf32>
    %601 = arith.negf %600 : vector<2x32xf32>
    %602 = math.exp %601 : vector<2x32xf32>
    %cst_153 = arith.constant 1.000000e+00 : f32
    %603 = vector.broadcast %cst_153 : f32 to vector<2x32xf32>
    %604 = arith.addf %603, %602 : vector<2x32xf32>
    %605 = arith.divf %603, %604 : vector<2x32xf32>
    %606 = vector.extract_strided_slice %593 {offsets = [0, 64], sizes = [2, 32], strides = [1, 1]} : vector<2x128xf32> to vector<2x32xf32>
    %607 = math.tanh %606 : vector<2x32xf32>
    %608 = vector.extract_strided_slice %593 {offsets = [0, 96], sizes = [2, 32], strides = [1, 1]} : vector<2x128xf32> to vector<2x32xf32>
    %609 = arith.negf %608 : vector<2x32xf32>
    %610 = math.exp %609 : vector<2x32xf32>
    %cst_154 = arith.constant 1.000000e+00 : f32
    %611 = vector.broadcast %cst_154 : f32 to vector<2x32xf32>
    %612 = arith.addf %611, %610 : vector<2x32xf32>
    %613 = arith.divf %611, %612 : vector<2x32xf32>
    %614 = arith.mulf %605, %497 : vector<2x32xf32>
    %615 = arith.mulf %599, %607 : vector<2x32xf32>
    %616 = arith.addf %614, %615 : vector<2x32xf32>
    %617 = math.tanh %616 : vector<2x32xf32>
    %618 = arith.mulf %613, %617 : vector<2x32xf32>
    %619 = vector.shape_cast %586 : vector<2x1xi1> to vector<2x1xi1>
    %620 = vector.broadcast %619 : vector<2x1xi1> to vector<2x32xi1>
    %621 = arith.select %620, %618, %494 : vector<2x32xi1>, vector<2x32xf32>
    %622 = vector.shape_cast %586 : vector<2x1xi1> to vector<2x1xi1>
    %623 = vector.broadcast %622 : vector<2x1xi1> to vector<2x32xi1>
    %624 = arith.select %623, %616, %497 : vector<2x32xi1>, vector<2x32xf32>
    %625 = arith.truncf %618 : vector<2x32xf32> to vector<2x32xbf16>
    %cst_155 = arith.constant dense<0.000000e+00> : vector<2x128xf32>
    %626 = tpu.matmul %625, %27, %cst_155 {dimension_numbers = #tpu.dot_dimension_numbers<[1], [0], [0], [1], [0, 0, 1, 1], [], []>} : vector<2x32xbf16>, vector<32x128xbf16>, vector<2x128xf32> -> vector<2x128xf32>
    %627 = arith.addf %626, %31 : vector<2x128xf32>
    %628 = arith.truncf %531 : vector<2x32xf32> to vector<2x32xbf16>
    %cst_156 = arith.constant dense<0.000000e+00> : vector<2x128xf32>
    %629 = tpu.matmul %628, %25, %cst_156 {dimension_numbers = #tpu.dot_dimension_numbers<[1], [0], [0], [1], [0, 0, 1, 1], [], []>} : vector<2x32xbf16>, vector<32x128xbf16>, vector<2x128xf32> -> vector<2x128xf32>
    %630 = arith.addf %627, %629 : vector<2x128xf32>
    %631 = vector.extract_strided_slice %630 {offsets = [0, 0], sizes = [2, 32], strides = [1, 1]} : vector<2x128xf32> to vector<2x32xf32>
    %632 = arith.negf %631 : vector<2x32xf32>
    %633 = math.exp %632 : vector<2x32xf32>
    %cst_157 = arith.constant 1.000000e+00 : f32
    %634 = vector.broadcast %cst_157 : f32 to vector<2x32xf32>
    %635 = arith.addf %634, %633 : vector<2x32xf32>
    %636 = arith.divf %634, %635 : vector<2x32xf32>
    %637 = vector.extract_strided_slice %630 {offsets = [0, 32], sizes = [2, 32], strides = [1, 1]} : vector<2x128xf32> to vector<2x32xf32>
    %638 = arith.negf %637 : vector<2x32xf32>
    %639 = math.exp %638 : vector<2x32xf32>
    %cst_158 = arith.constant 1.000000e+00 : f32
    %640 = vector.broadcast %cst_158 : f32 to vector<2x32xf32>
    %641 = arith.addf %640, %639 : vector<2x32xf32>
    %642 = arith.divf %640, %641 : vector<2x32xf32>
    %643 = vector.extract_strided_slice %630 {offsets = [0, 64], sizes = [2, 32], strides = [1, 1]} : vector<2x128xf32> to vector<2x32xf32>
    %644 = math.tanh %643 : vector<2x32xf32>
    %645 = vector.extract_strided_slice %630 {offsets = [0, 96], sizes = [2, 32], strides = [1, 1]} : vector<2x128xf32> to vector<2x32xf32>
    %646 = arith.negf %645 : vector<2x32xf32>
    %647 = math.exp %646 : vector<2x32xf32>
    %cst_159 = arith.constant 1.000000e+00 : f32
    %648 = vector.broadcast %cst_159 : f32 to vector<2x32xf32>
    %649 = arith.addf %648, %647 : vector<2x32xf32>
    %650 = arith.divf %648, %649 : vector<2x32xf32>
    %651 = arith.mulf %642, %534 : vector<2x32xf32>
    %652 = arith.mulf %636, %644 : vector<2x32xf32>
    %653 = arith.addf %651, %652 : vector<2x32xf32>
    %654 = math.tanh %653 : vector<2x32xf32>
    %655 = arith.mulf %650, %654 : vector<2x32xf32>
    %656 = vector.shape_cast %586 : vector<2x1xi1> to vector<2x1xi1>
    %657 = vector.broadcast %656 : vector<2x1xi1> to vector<2x32xi1>
    %658 = arith.select %657, %655, %531 : vector<2x32xi1>, vector<2x32xf32>
    %659 = vector.shape_cast %586 : vector<2x1xi1> to vector<2x1xi1>
    %660 = vector.broadcast %659 : vector<2x1xi1> to vector<2x32xi1>
    %661 = arith.select %660, %653, %534 : vector<2x32xi1>, vector<2x32xf32>
    %662 = arith.truncf %655 : vector<2x32xf32> to vector<2x32xbf16>
    %cst_160 = arith.constant dense<0.000000e+00> : vector<2x32xf32>
    %663 = tpu.matmul %662, %12, %cst_160 {dimension_numbers = #tpu.dot_dimension_numbers<[1], [0], [0], [1], [0, 0, 1, 1], [], []>} : vector<2x32xbf16>, vector<32x32xbf16>, vector<2x32xf32> -> vector<2x32xf32>
    %664 = arith.addf %663, %34 : vector<2x32xf32>
    %665 = vector.extract_strided_slice %664 {offsets = [0, 0], sizes = [2, 16], strides = [1, 1]} : vector<2x32xf32> to vector<2x16xf32>
    %666 = vector.extract_strided_slice %664 {offsets = [0, 16], sizes = [2, 16], strides = [1, 1]} : vector<2x32xf32> to vector<2x16xf32>
    %667 = math.exp %666 : vector<2x16xf32>
    %668 = arith.mulf %667, %584 : vector<2x16xf32>
    %669 = arith.addf %665, %668 : vector<2x16xf32>
    %670 = tpu.concatenate %669, %664 in 1 : vector<2x16xf32>, vector<2x32xf32> -> vector<2x48xf32>
    %cst_161 = arith.constant 0.000000e+00 : f32
    %671 = vector.shape_cast %586 : vector<2x1xi1> to vector<2x1xi1>
    %672 = vector.broadcast %671 : vector<2x1xi1> to vector<2x48xi1>
    %673 = vector.broadcast %cst_161 : f32 to vector<2x48xf32>
    %674 = arith.select %672, %670, %673 : vector<2x48xi1>, vector<2x48xf32>
    %675 = vector.extract_strided_slice %655 {offsets = [0, 0], sizes = [1, 32], strides = [1, 1]} : vector<2x32xf32> to vector<1x32xf32>
    %676 = arith.truncf %675 : vector<1x32xf32> to vector<1x32xbf16>
    %cst_162 = arith.constant dense<0.000000e+00> : vector<1x8xf32>
    %677 = tpu.matmul %676, %7, %cst_162 {dimension_numbers = #tpu.dot_dimension_numbers<[1], [0], [0], [1], [0, 0, 1, 1], [], []>} : vector<1x32xbf16>, vector<32x8xbf16>, vector<1x8xf32> -> vector<1x8xf32>
    %678 = vector.extract_strided_slice %655 {offsets = [1, 0], sizes = [1, 32], strides = [1, 1]} : vector<2x32xf32> to vector<1x32xf32>
    %679 = arith.truncf %678 : vector<1x32xf32> to vector<1x32xbf16>
    %cst_163 = arith.constant dense<0.000000e+00> : vector<1x8xf32>
    %680 = tpu.matmul %679, %9, %cst_163 {dimension_numbers = #tpu.dot_dimension_numbers<[1], [0], [0], [1], [0, 0, 1, 1], [], []>} : vector<1x32xbf16>, vector<32x8xbf16>, vector<1x8xf32> -> vector<1x8xf32>
    %681 = tpu.concatenate %677, %680 in 0 : vector<1x8xf32>, vector<1x8xf32> -> vector<2x8xf32>
    %682 = arith.addf %681, %1 : vector<2x8xf32>
    %cst_164 = arith.constant dense<0xFF800000> : vector<2xf32>
    %683 = vector.multi_reduction <maximumf>, %682, %cst_164 [1] : vector<2x8xf32> to vector<2xf32>
    %684 = vector.shape_cast %683 : vector<2xf32> to vector<2x1xf32>
    %685 = vector.broadcast %684 : vector<2x1xf32> to vector<2x8xf32>
    %686 = arith.subf %682, %685 : vector<2x8xf32>
    %687 = math.exp %686 : vector<2x8xf32>
    %cst_165 = arith.constant dense<0.000000e+00> : vector<2xf32>
    %688 = vector.multi_reduction <add>, %687, %cst_165 [1] : vector<2x8xf32> to vector<2xf32>
    %689 = vector.shape_cast %688 : vector<2xf32> to vector<2x1xf32>
    %690 = tpu.reciprocal %689 {approx = true} : vector<2x1xf32> -> vector<2x1xf32>
    %691 = vector.broadcast %690 : vector<2x1xf32> to vector<2x8xf32>
    %692 = arith.mulf %687, %691 : vector<2x8xf32>
    %693 = vector.extract_strided_slice %692 {offsets = [0, 0], sizes = [1, 8], strides = [1, 1]} : vector<2x8xf32> to vector<1x8xf32>
    %694 = arith.truncf %693 : vector<1x8xf32> to vector<1x8xbf16>
    %cst_166 = arith.constant dense<0.000000e+00> : vector<1x32xf32>
    %695 = tpu.matmul %694, %3, %cst_166 {dimension_numbers = #tpu.dot_dimension_numbers<[1], [0], [0], [1], [0, 0, 1, 1], [], []>} : vector<1x8xbf16>, vector<8x32xbf16>, vector<1x32xf32> -> vector<1x32xf32>
    %696 = vector.extract_strided_slice %692 {offsets = [1, 0], sizes = [1, 8], strides = [1, 1]} : vector<2x8xf32> to vector<1x8xf32>
    %697 = arith.truncf %696 : vector<1x8xf32> to vector<1x8xbf16>
    %cst_167 = arith.constant dense<0.000000e+00> : vector<1x32xf32>
    %698 = tpu.matmul %697, %5, %cst_167 {dimension_numbers = #tpu.dot_dimension_numbers<[1], [0], [0], [1], [0, 0, 1, 1], [], []>} : vector<1x8xbf16>, vector<8x32xbf16>, vector<1x32xf32> -> vector<1x32xf32>
    %699 = tpu.concatenate %695, %698 in 0 : vector<1x32xf32>, vector<1x32xf32> -> vector<2x32xf32>
    %700 = tpu.concatenate %699, %655 in 1 : vector<2x32xf32>, vector<2x32xf32> -> vector<2x64xf32>
    %701 = arith.truncf %700 : vector<2x64xf32> to vector<2x64xbf16>
    %cst_168 = arith.constant dense<0.000000e+00> : vector<2x32xf32>
    %702 = tpu.matmul %701, %10, %cst_168 {dimension_numbers = #tpu.dot_dimension_numbers<[1], [0], [0], [1], [0, 0, 1, 1], [], []>} : vector<2x64xbf16>, vector<64x32xbf16>, vector<2x32xf32> -> vector<2x32xf32>
    %703 = math.tanh %702 : vector<2x32xf32>
    %704 = arith.index_cast %c4_i32 : i32 to index
    %c0_169 = arith.constant 0 : index
    %c0_170 = arith.constant 0 : index
    %705 = vector.load %arg16[%704, %c0_169, %c0_170] : memref<5x2x48xf32, #tpu.memory_space<vmem>>, vector<1x2x48xf32>
    %706 = vector.shape_cast %705 : vector<1x2x48xf32> to vector<2x48xf32>
    %707 = vector.shape_cast %674 : vector<2x48xf32> to vector<1x2x48xf32>
    tpu.vector_store %arg16[%704, %c0_169, %c0_170], %707 {strides = array<i32>} : memref<5x2x48xf32, #tpu.memory_space<vmem>>, vector<1x2x48xf32>,
    %c5_i32 = arith.constant 5 : i32
    %c0_171 = arith.constant 0 : index
    %c0_172 = arith.constant 0 : index
    %c0_173 = arith.constant 0 : index
    %708 = vector.load %arg17[%c0_171, %c0_172, %c0_173] : memref<2x2x32xf32, #tpu.memory_space<vmem>>, vector<1x2x32xf32>
    %709 = vector.shape_cast %708 : vector<1x2x32xf32> to vector<2x32xf32>
    %710 = vector.shape_cast %621 : vector<2x32xf32> to vector<1x2x32xf32>
    tpu.vector_store %arg17[%c0_171, %c0_172, %c0_173], %710 {strides = array<i32>} : memref<2x2x32xf32, #tpu.memory_space<vmem>>, vector<1x2x32xf32>,
    %c0_174 = arith.constant 0 : index
    %c0_175 = arith.constant 0 : index
    %c0_176 = arith.constant 0 : index
    %711 = vector.load %arg18[%c0_174, %c0_175, %c0_176] : memref<2x2x32xf32, #tpu.memory_space<vmem>>, vector<1x2x32xf32>
    %712 = vector.shape_cast %711 : vector<1x2x32xf32> to vector<2x32xf32>
    %713 = vector.shape_cast %624 : vector<2x32xf32> to vector<1x2x32xf32>
    tpu.vector_store %arg18[%c0_174, %c0_175, %c0_176], %713 {strides = array<i32>} : memref<2x2x32xf32, #tpu.memory_space<vmem>>, vector<1x2x32xf32>,
    %c1_177 = arith.constant 1 : index
    %c0_178 = arith.constant 0 : index
    %c0_179 = arith.constant 0 : index
    %714 = vector.load %arg17[%c1_177, %c0_178, %c0_179] : memref<2x2x32xf32, #tpu.memory_space<vmem>>, vector<1x2x32xf32>
    %715 = vector.shape_cast %714 : vector<1x2x32xf32> to vector<2x32xf32>
    %716 = vector.shape_cast %658 : vector<2x32xf32> to vector<1x2x32xf32>
    tpu.vector_store %arg17[%c1_177, %c0_178, %c0_179], %716 {strides = array<i32>} : memref<2x2x32xf32, #tpu.memory_space<vmem>>, vector<1x2x32xf32>,
    %c1_180 = arith.constant 1 : index
    %c0_181 = arith.constant 0 : index
    %c0_182 = arith.constant 0 : index
    %717 = vector.load %arg18[%c1_180, %c0_181, %c0_182] : memref<2x2x32xf32, #tpu.memory_space<vmem>>, vector<1x2x32xf32>
    %718 = vector.shape_cast %717 : vector<1x2x32xf32> to vector<2x32xf32>
    %719 = vector.shape_cast %661 : vector<2x32xf32> to vector<1x2x32xf32>
    tpu.vector_store %arg18[%c1_180, %c0_181, %c0_182], %719 {strides = array<i32>} : memref<2x2x32xf32, #tpu.memory_space<vmem>>, vector<1x2x32xf32>,
    return
  }
}

</mosaic_0001>

<bundles_post_ra>
// kernel: tpu_custom_call.1
= control target key start
LH: loop header
LB: loop body
LE: loop exit
PB: predicated region body
PF: predicated region fallthrough
CT: control target
= control target key end

     0   :  { %s6016_s0 = inlined_call_operand.hbm [shape: f32[2,2,32], index: 0, kind: input, shape index: {}]   ;;  %s6017_s1 = inlined_call_operand.hbm [shape: f32[2,2,32], index: 1, kind: input, shape index: {}]   ;;  %s6018_s2 = inlined_call_operand.hbm [shape: bf16[2,8,32], index: 2, kind: input, shape index: {}]   ;;  %s6019_s3 = inlined_call_operand.hbm [shape: bf16[2,32,8], index: 3, kind: input, shape index: {}]   ;;  %s6020_s4 = inlined_call_operand.hbm [shape: f32[2,8], index: 4, kind: input, shape index: {}]   ;;  %s6021_s5 = inlined_call_operand.hbm [shape: f32[2,1], index: 5, kind: input, shape index: {}]   ;;  %s6022_s6 = inlined_call_operand.hbm [shape: f32[2,16], index: 6, kind: input, shape index: {}]   ;;  %s6023_s7 = inlined_call_operand.hbm [shape: f32[5,2,16], index: 7, kind: input, shape index: {}]   ;;  %s6024_s8 = inlined_call_operand.hbm [shape: bf16[64,32], index: 8, kind: input, shape index: {}]   ;;  %s6025_s9 = inlined_call_operand.hbm [shape: bf16[48,128], index: 9, kind: input, shape index: {}]   ;;  %s6026_s10 = inlined_call_operand.hbm [shape: f32[1,128], index: 10, kind: input, shape index: {}]   ;;  %s6027_s11 = inlined_call_operand.hbm [shape: bf16[1,32,128], index: 11, kind: input, shape index: {}]   ;;  %s6028_s12 = inlined_call_operand.hbm [shape: bf16[2,32,128], index: 12, kind: input, shape index: {}]   ;;  %s6029_s13 = inlined_call_operand.hbm [shape: f32[2,1,128], index: 13, kind: input, shape index: {}]   ;;  %s6030_s14 = inlined_call_operand.hbm [shape: bf16[32,32], index: 14, kind: input, shape index: {}]   ;;  %s6031_s15 = inlined_call_operand.hbm [shape: f32[1,32], index: 15, kind: input, shape index: {}]   ;;  %s6032_s16 = inlined_call_operand.hbm [shape: f32[5,2,48], index: 16, kind: output, shape index: {0}]   ;;  %s6033_s17 = inlined_call_operand.hbm [shape: f32[2,2,32], index: 17, kind: output, shape index: {1}]   ;;  %s6034_s18 = inlined_call_operand.hbm [shape: f32[2,2,32], index: 18, kind: output, shape index: {2}]  }
   0x1   :  { %6040 = sst [smem:[#allocation43_spill]] %s6016_s0 }
   0x2   :  { %6041 = sst [smem:[#allocation44_spill]] %s6017_s1 }
   0x3   :  { %6042 = sst [smem:[#allocation45_spill]] %s6018_s2 }
   0x4   :  { %6043 = sst [smem:[#allocation46_spill]] %s6032_s16 }
   0x5   :  { %6044 = sst [smem:[#allocation47_spill]] %s6034_s18 }
   0x6   :  { %24 = vsyncpa [#allocation3], 0 }
   0x7   :  { %25 = vsyncpa [#allocation6], 0 }
   0x8   :  { %26 = vsyncpa [#allocation9], 0 }
   0x9   :  { %27 = vsyncpa [#allocation12], 0 }
   0xa   :  { %28 = vsyncpa [#allocation15], 0 }
   0xb   :  { %29 = vsyncpa [#allocation18], 0 }
   0xc   :  { %30 = vsyncpa [#allocation21], 0 }
   0xd   :  { %31 = vsyncpa [#allocation24], 0 }
   0xe   :  { %32 = vsyncpa [#allocation27], 0 }
   0xf   :  { %33 = vsyncpa [#allocation4], 0 }
  0x10   :  { %34 = vsyncpa [#allocation30], 0  ;;  %s4733_s27 = smov [#allocation5]   ;;  %s6045_s0 = sld [smem:[#allocation44_spill]] }
  0x11   :  { %s52_s28 = sshll.u32 %s4733_s27, 4  ;;  %s53_s28 = int_to_ptr.vmem [resolvable:$true] %s52_s28 }
  0x16   :  { %s4293_s19 = scalar_lea.hbm %s6045_s0, 64 }
  0x17   :  { %p4294_p0 = scmp.ne.s32.totalorder %s6045_s0, %s4293_s19  ;;  %p4297_p1 = scmp.lt.u32.totalorder %s4293_s19, %s6045_s0 }
  0x19   :  { %p4299_p2 = pnand %p4297_p1, %p4294_p0 }
  0x1b   :  { %4302 = shalt.err (!%p4299_p2)
}
  0x1c   :  { %s4303_s2 = scalar_lea.vmem %s53_s28, 64  ;;  %p4308_p4 = scmp.lt.s32.totalorder %s53_s28, %s53_s28 }
  0x1d   :  { %p4304_p3 = scmp.ne.s32.totalorder %s53_s28, %s4303_s2  ;;  %p4309_p5 = scmp.lt.s32.totalorder %s4303_s2, %s4303_s2 }
  0x1f   :  { %p4310_p6 = por %p4309_p5, %p4308_p4 }
  0x21   :  { %p4311_p7 = pnand %p4310_p6, %p4304_p3 }
  0x23   :  { %4314 = shalt.err (!%p4311_p7)
}
  0x24   :  { %s4734_s23 = smov 32   ;;  %s4735_s24 = smov 2  }
  0x25   :  { %58 = dma.hbm_to_vmem [thread:$0]  %s6045_s0, 64, %s53_s28, [#allocation6], %s4734_s23, %s4734_s23, %s4735_s24  }
  0x26   :  { %s4736_s27 = smov [#allocation8]   ;;  %s4737_s30 = smov [#allocation11]  }
  0x27   :  { %s76_s29 = sshll.u32 %s4736_s27, 4  ;;  %s99_s19 = sshll.u32 %s4737_s30, 4  ;;  %s77_s29 = int_to_ptr.vmem [resolvable:$true] %s76_s29  ;;  %s100_s19 = int_to_ptr.vmem [resolvable:$true] %s99_s19 }
  0x28   :  { %s4315_s21 = scalar_lea.hbm %s6019_s3, 512 }
  0x29   :  { %p4316_p8 = scmp.ne.s32.totalorder %s6019_s3, %s4315_s21  ;;  %p4319_p9 = scmp.lt.u32.totalorder %s4315_s21, %s6019_s3 }
  0x2b   :  { %p4321_p10 = pnand %p4319_p9, %p4316_p8 }
  0x2d   :  { %4324 = shalt.err (!%p4321_p10)
}
  0x2e   :  { %s4325_s28 = scalar_lea.vmem %s77_s29, 512  ;;  %p4330_p12 = scmp.lt.s32.totalorder %s77_s29, %s77_s29 }
  0x2f   :  { %p4326_p11 = scmp.ne.s32.totalorder %s77_s29, %s4325_s28  ;;  %p4331_p13 = scmp.lt.s32.totalorder %s4325_s28, %s4325_s28 }
  0x31   :  { %p4332_p0 = por %p4331_p13, %p4330_p12 }
  0x33   :  { %p4333_p1 = pnand %p4332_p0, %p4326_p11 }
  0x35   :  { %4336 = shalt.err (!%p4333_p1)
}
  0x36   :  { %s4738_s0 = smov 64   ;;  %s4739_s25 = smov 4  }
  0x37   :  { %82 = dma.hbm_to_vmem [thread:$0]  %s6019_s3, 512, %s77_s29, [#allocation9], %s4738_s0, %s4738_s0, %s4739_s25  }
  0x38   :  { %s4337_s30 = scalar_lea.hbm %s6021_s5, 32 }
  0x39   :  { %p4338_p2 = scmp.ne.s32.totalorder %s6021_s5, %s4337_s30  ;;  %p4341_p3 = scmp.lt.u32.totalorder %s4337_s30, %s6021_s5 }
  0x3b   :  { %p4343_p4 = pnand %p4341_p3, %p4338_p2 }
  0x3d   :  { %4346 = shalt.err (!%p4343_p4)
}
  0x3e   :  { %s4347_s2 = scalar_lea.vmem %s100_s19, 32  ;;  %p4352_p6 = scmp.lt.s32.totalorder %s100_s19, %s100_s19 }
  0x3f   :  { %p4348_p5 = scmp.ne.s32.totalorder %s100_s19, %s4347_s2  ;;  %p4353_p7 = scmp.lt.s32.totalorder %s4347_s2, %s4347_s2 }
  0x41   :  { %p4354_p8 = por %p4353_p7, %p4352_p6 }
  0x43   :  { %p4355_p9 = pnand %p4354_p8, %p4348_p5 }
  0x45   :  { %4358 = shalt.err (!%p4355_p9)
}
  0x46   :  { %102 = dma.hbm_to_vmem [thread:$0]  %s6021_s5, 32, %s100_s19, [#allocation12]  }
  0x47   :  { %s4740_s28 = smov [#allocation14]   ;;  %s4741_s27 = smov [#allocation17]  }
  0x48   :  { %s118_s26 = sshll.u32 %s4740_s28, 4  ;;  %s142_s16 = sshll.u32 %s4741_s27, 4  ;;  %s119_s26 = int_to_ptr.vmem [resolvable:$true] %s118_s26  ;;  %s143_s16 = int_to_ptr.vmem [resolvable:$true] %s142_s16 }
  0x49   :  { %s4359_s1 = scalar_lea.hbm %s6023_s7, 160 }
  0x4a   :  { %p4360_p10 = scmp.ne.s32.totalorder %s6023_s7, %s4359_s1  ;;  %p4363_p11 = scmp.lt.u32.totalorder %s4359_s1, %s6023_s7 }
  0x4c   :  { %p4365_p12 = pnand %p4363_p11, %p4360_p10 }
  0x4e   :  { %4368 = shalt.err (!%p4365_p12)
}
  0x4f   :  { %s4369_s5 = scalar_lea.vmem %s119_s26, 160  ;;  %p4374_p0 = scmp.lt.s32.totalorder %s119_s26, %s119_s26 }
  0x50   :  { %p4370_p13 = scmp.ne.s32.totalorder %s119_s26, %s4369_s5  ;;  %p4375_p1 = scmp.lt.s32.totalorder %s4369_s5, %s4369_s5 }
  0x52   :  { %p4376_p2 = por %p4375_p1, %p4374_p0 }
  0x54   :  { %p4377_p3 = pnand %p4376_p2, %p4370_p13 }
  0x56   :  { %4380 = shalt.err (!%p4377_p3)
}
  0x57   :  { %124 = dma.hbm_to_vmem [thread:$0]  %s6023_s7, 160, %s119_s26, [#allocation15], %s4734_s23, %s4734_s23, %s4735_s24  }
  0x58   :  { %s4381_s27 = scalar_lea.hbm %s6025_s9, 384 }
  0x59   :  { %p4382_p4 = scmp.ne.s32.totalorder %s6025_s9, %s4381_s27  ;;  %p4385_p5 = scmp.lt.u32.totalorder %s4381_s27, %s6025_s9 }
  0x5b   :  { %p4387_p6 = pnand %p4385_p5, %p4382_p4 }
  0x5d   :  { %4390 = shalt.err (!%p4387_p6)
}
  0x5e   :  { %s4391_s21 = scalar_lea.vmem %s143_s16, 384  ;;  %p4396_p8 = scmp.lt.s32.totalorder %s143_s16, %s143_s16 }
  0x5f   :  { %p4392_p7 = scmp.ne.s32.totalorder %s143_s16, %s4391_s21  ;;  %p4397_p9 = scmp.lt.s32.totalorder %s4391_s21, %s4391_s21 }
  0x61   :  { %p4398_p10 = por %p4397_p9, %p4396_p8 }
  0x63   :  { %p4399_p11 = pnand %p4398_p10, %p4392_p7 }
  0x65   :  { %4402 = shalt.err (!%p4399_p11)
}
  0x66   :  { %148 = dma.hbm_to_vmem [thread:$0]  %s6025_s9, 384, %s143_s16, [#allocation18], %s4738_s0, %s4738_s0, %s4739_s25  }
  0x67   :  { %s4742_s22 = smov [#allocation20]   ;;  %s4743_s5 = smov [#allocation23]  }
  0x68   :  { %s164_s2 = sshll.u32 %s4742_s22, 4  ;;  %s188_s19 = sshll.u32 %s4743_s5, 4  ;;  %s165_s2 = int_to_ptr.vmem [resolvable:$true] %s164_s2  ;;  %s189_s19 = int_to_ptr.vmem [resolvable:$true] %s188_s19 }
  0x69   :  { %s4403_s28 = scalar_lea.hbm %s6027_s11, 256 }
  0x6a   :  { %p4404_p12 = scmp.ne.s32.totalorder %s6027_s11, %s4403_s28  ;;  %p4407_p13 = scmp.lt.u32.totalorder %s4403_s28, %s6027_s11 }
  0x6c   :  { %p4409_p0 = pnand %p4407_p13, %p4404_p12 }
  0x6e   :  { %4412 = shalt.err (!%p4409_p0)
}
  0x6f   :  { %s4413_s9 = scalar_lea.vmem %s165_s2, 256  ;;  %p4418_p2 = scmp.lt.s32.totalorder %s165_s2, %s165_s2 }
  0x70   :  { %p4414_p1 = scmp.ne.s32.totalorder %s165_s2, %s4413_s9  ;;  %p4419_p3 = scmp.lt.s32.totalorder %s4413_s9, %s4413_s9 }
  0x72   :  { %p4420_p4 = por %p4419_p3, %p4418_p2 }
  0x74   :  { %p4421_p5 = pnand %p4420_p4, %p4414_p1 }
  0x76   :  { %4424 = shalt.err (!%p4421_p5)
}
  0x77   :  { %170 = dma.hbm_to_vmem [thread:$0]  %s6027_s11, 256, %s165_s2, [#allocation21], %s4738_s0, %s4738_s0, %s4739_s25  }
  0x78   :  { %s4425_s26 = scalar_lea.hbm %s6029_s13, 32 }
  0x79   :  { %p4426_p6 = scmp.ne.s32.totalorder %s6029_s13, %s4425_s26  ;;  %p4429_p7 = scmp.lt.u32.totalorder %s4425_s26, %s6029_s13 }
  0x7b   :  { %p4431_p8 = pnand %p4429_p7, %p4426_p6 }
  0x7d   :  { %4434 = shalt.err (!%p4431_p8)
}
  0x7e   :  { %s4435_s28 = scalar_lea.vmem %s189_s19, 32  ;;  %p4440_p10 = scmp.lt.s32.totalorder %s189_s19, %s189_s19 }
  0x7f   :  { %p4436_p9 = scmp.ne.s32.totalorder %s189_s19, %s4435_s28  ;;  %p4441_p11 = scmp.lt.s32.totalorder %s4435_s28, %s4435_s28 }
  0x81   :  { %p4442_p12 = por %p4441_p11, %p4440_p10 }
  0x83   :  { %p4443_p13 = pnand %p4442_p12, %p4436_p9 }
  0x85   :  { %4446 = shalt.err (!%p4443_p13)
}
  0x86   :  { %s4744_s11 = smov 16   ;;  %s4745_s2 = smov 1  }
  0x87   :  { %194 = dma.hbm_to_vmem [thread:$0]  %s6029_s13, 32, %s189_s19, [#allocation24], %s4744_s11, %s4744_s11, %s4745_s2  }
  0x88   :  { %s4746_s30 = smov [#allocation2]   ;;  %s4747_s9 = smov [#allocation7]  }
  0x89   :  { %s40_s1 = sshll.u32 %s4746_s30, 4  ;;  %s64_s16 = sshll.u32 %s4747_s9, 4  ;;  %s41_s1 = int_to_ptr.vmem [resolvable:$true] %s40_s1  ;;  %s65_s16 = int_to_ptr.vmem [resolvable:$true] %s64_s16 }
  0x8a   :  { %s6046_s7 = sld [smem:[#allocation43_spill]] }
  0x90   :  { %s4447_s26 = scalar_lea.hbm %s6046_s7, 64 }
  0x91   :  { %p4448_p0 = scmp.ne.s32.totalorder %s6046_s7, %s4447_s26  ;;  %p4451_p1 = scmp.lt.u32.totalorder %s4447_s26, %s6046_s7 }
  0x93   :  { %p4453_p2 = pnand %p4451_p1, %p4448_p0 }
  0x95   :  { %4456 = shalt.err (!%p4453_p2)
}
  0x96   :  { %s4457_s13 = scalar_lea.vmem %s41_s1, 64  ;;  %p4462_p4 = scmp.lt.s32.totalorder %s41_s1, %s41_s1 }
  0x97   :  { %p4458_p3 = scmp.ne.s32.totalorder %s41_s1, %s4457_s13  ;;  %p4463_p5 = scmp.lt.s32.totalorder %s4457_s13, %s4457_s13 }
  0x99   :  { %p4464_p6 = por %p4463_p5, %p4462_p4 }
  0x9b   :  { %p4465_p7 = pnand %p4464_p6, %p4458_p3 }
  0x9d   :  { %4468 = shalt.err (!%p4465_p7)
}
  0x9e   :  { %46 = dma.hbm_to_vmem [thread:$0]  %s6046_s7, 64, %s41_s1, [#allocation3], %s4734_s23, %s4734_s23, %s4735_s24  }
  0x9f   :  { %s6047_s18 = sld [smem:[#allocation45_spill]] }
  0xa5   :  { %s4469_s30 = scalar_lea.hbm %s6047_s18, 128 }
  0xa6   :  { %p4470_p8 = scmp.ne.s32.totalorder %s6047_s18, %s4469_s30  ;;  %p4473_p9 = scmp.lt.u32.totalorder %s4469_s30, %s6047_s18 }
  0xa8   :  { %p4475_p10 = pnand %p4473_p9, %p4470_p8 }
  0xaa   :  { %4478 = shalt.err (!%p4475_p10)
}
  0xab   :  { %s4479_s22 = scalar_lea.vmem %s65_s16, 128  ;;  %p4484_p12 = scmp.lt.s32.totalorder %s65_s16, %s65_s16 }
  0xac   :  { %p4480_p11 = scmp.ne.s32.totalorder %s65_s16, %s4479_s22  ;;  %p4485_p13 = scmp.lt.s32.totalorder %s4479_s22, %s4479_s22 }
  0xae   :  { %p4486_p0 = por %p4485_p13, %p4484_p12 }
  0xb0   :  { %p4487_p1 = pnand %p4486_p0, %p4480_p11 }
  0xb2   :  { %4490 = shalt.err (!%p4487_p1)
}
  0xb3   :  { %70 = dma.hbm_to_vmem [thread:$0]  %s6047_s18, 128, %s65_s16, [#allocation6], %s4738_s0, %s4738_s0, %s4739_s25  }
  0xb4   :  { %s4748_s5 = smov [#allocation10]   ;;  %s4749_s29 = smov [#allocation13]  }
  0xb5   :  { %s89_s3 = sshll.u32 %s4748_s5, 4  ;;  %s109_s13 = sshll.u32 %s4749_s29, 4  ;;  %s90_s3 = int_to_ptr.vmem [resolvable:$true] %s89_s3  ;;  %s110_s13 = int_to_ptr.vmem [resolvable:$true] %s109_s13 }
  0xb6   :  { %s4491_s2 = scalar_lea.hbm %s6020_s4, 32 }
  0xb7   :  { %p4492_p2 = scmp.ne.s32.totalorder %s6020_s4, %s4491_s2  ;;  %p4495_p3 = scmp.lt.u32.totalorder %s4491_s2, %s6020_s4 }
  0xb9   :  { %p4497_p4 = pnand %p4495_p3, %p4492_p2 }
  0xbb   :  { %4500 = shalt.err (!%p4497_p4)
}
  0xbc   :  { %s4501_s16 = scalar_lea.vmem %s90_s3, 32  ;;  %p4506_p6 = scmp.lt.s32.totalorder %s90_s3, %s90_s3 }
  0xbd   :  { %p4502_p5 = scmp.ne.s32.totalorder %s90_s3, %s4501_s16  ;;  %p4507_p7 = scmp.lt.s32.totalorder %s4501_s16, %s4501_s16 }
  0xbf   :  { %p4508_p8 = por %p4507_p7, %p4506_p6 }
  0xc1   :  { %p4509_p9 = pnand %p4508_p8, %p4502_p5 }
  0xc3   :  { %4512 = shalt.err (!%p4509_p9)
}
  0xc4   :  { %92 = dma.hbm_to_vmem [thread:$0]  %s6020_s4, 32, %s90_s3, [#allocation9]  }
  0xc5   :  { %s4513_s1 = scalar_lea.hbm %s6022_s6, 32 }
  0xc6   :  { %p4514_p10 = scmp.ne.s32.totalorder %s6022_s6, %s4513_s1  ;;  %p4517_p11 = scmp.lt.u32.totalorder %s4513_s1, %s6022_s6 }
  0xc8   :  { %p4519_p12 = pnand %p4517_p11, %p4514_p10 }
  0xca   :  { %4522 = shalt.err (!%p4519_p12)
}
  0xcb   :  { %s4523_s28 = scalar_lea.vmem %s110_s13, 32  ;;  %p4528_p0 = scmp.lt.s32.totalorder %s110_s13, %s110_s13 }
  0xcc   :  { %p4524_p13 = scmp.ne.s32.totalorder %s110_s13, %s4523_s28  ;;  %p4529_p1 = scmp.lt.s32.totalorder %s4523_s28, %s4523_s28 }
  0xce   :  { %p4530_p2 = por %p4529_p1, %p4528_p0 }
  0xd0   :  { %p4531_p3 = pnand %p4530_p2, %p4524_p13 }
  0xd2   :  { %4534 = shalt.err (!%p4531_p3)
}
  0xd3   :  { %112 = dma.hbm_to_vmem [thread:$0]  %s6022_s6, 32, %s110_s13, [#allocation12]  }
  0xd4   :  { %s4750_s2 = smov [#allocation16]   ;;  %s4751_s30 = smov [#allocation19]  }
  0xd5   :  { %s130_s27 = sshll.u32 %s4750_s2, 4  ;;  %s155_s9 = sshll.u32 %s4751_s30, 4  ;;  %s131_s27 = int_to_ptr.vmem [resolvable:$true] %s130_s27  ;;  %s156_s9 = int_to_ptr.vmem [resolvable:$true] %s155_s9 }
  0xd6   :  { %s4535_s18 = scalar_lea.hbm %s6024_s8, 512 }
  0xd7   :  { %p4536_p4 = scmp.ne.s32.totalorder %s6024_s8, %s4535_s18  ;;  %p4539_p5 = scmp.lt.u32.totalorder %s4535_s18, %s6024_s8 }
  0xd9   :  { %p4541_p6 = pnand %p4539_p5, %p4536_p4 }
  0xdb   :  { %4544 = shalt.err (!%p4541_p6)
}
  0xdc   :  { %s4545_s6 = scalar_lea.vmem %s131_s27, 512  ;;  %p4550_p8 = scmp.lt.s32.totalorder %s131_s27, %s131_s27 }
  0xdd   :  { %p4546_p7 = scmp.ne.s32.totalorder %s131_s27, %s4545_s6  ;;  %p4551_p9 = scmp.lt.s32.totalorder %s4545_s6, %s4545_s6 }
  0xdf   :  { %p4552_p10 = por %p4551_p9, %p4550_p8 }
  0xe1   :  { %p4553_p11 = pnand %p4552_p10, %p4546_p7 }
  0xe3   :  { %4556 = shalt.err (!%p4553_p11)
}
  0xe4   :  { %136 = dma.hbm_to_vmem [thread:$0]  %s6024_s8, 512, %s131_s27, [#allocation15], %s4738_s0, %s4738_s0, %s4739_s25  }
  0xe5   :  { %s4557_s19 = scalar_lea.hbm %s6026_s10, 16 }
  0xe6   :  { %p4558_p12 = scmp.ne.s32.totalorder %s6026_s10, %s4557_s19  ;;  %p4561_p13 = scmp.lt.u32.totalorder %s4557_s19, %s6026_s10 }
  0xe8   :  { %p4563_p0 = pnand %p4561_p13, %p4558_p12 }
  0xea   :  { %4566 = shalt.err (!%p4563_p0)
}
  0xeb   :  { %s4567_s30 = scalar_lea.vmem %s156_s9, 16  ;;  %s4571_s20 = scalar_lea.vmem %s156_s9, 32 }
  0xec   :  { %p4568_p1 = scmp.ne.s32.totalorder %s156_s9, %s4567_s30  ;;  %p4572_p2 = scmp.lt.s32.totalorder %s156_s9, %s156_s9 }
  0xed   :  { %p4573_p3 = scmp.lt.s32.totalorder %s4571_s20, %s4567_s30 }
  0xef   :  { %p4574_p4 = por %p4573_p3, %p4572_p2 }
  0xf1   :  { %p4575_p5 = pnand %p4574_p4, %p4568_p1 }
  0xf3   :  { %4578 = shalt.err (!%p4575_p5)
}
  0xf4   :  { %158 = dma.hbm_to_vmem [thread:$0]  %s6026_s10, 16, %s156_s9, [#allocation18]  }
  0xf5   :  { %s4752_s16 = smov [#allocation22]   ;;  %s4753_s21 = smov [#allocation25]  }
  0xf6   :  { %s176_s18 = sshll.u32 %s4752_s16, 4  ;;  %s200_s26 = sshll.u32 %s4753_s21, 4  ;;  %s177_s18 = int_to_ptr.vmem [resolvable:$true] %s176_s18  ;;  %s201_s26 = int_to_ptr.vmem [resolvable:$true] %s200_s26 }
  0xf7   :  { %s4579_s6 = scalar_lea.hbm %s6028_s12, 512 }
  0xf8   :  { %p4580_p6 = scmp.ne.s32.totalorder %s6028_s12, %s4579_s6  ;;  %p4583_p7 = scmp.lt.u32.totalorder %s4579_s6, %s6028_s12 }
  0xfa   :  { %p4585_p8 = pnand %p4583_p7, %p4580_p6 }
  0xfc   :  { %4588 = shalt.err (!%p4585_p8)
}
  0xfd   :  { %s4589_s10 = scalar_lea.vmem %s177_s18, 512  ;;  %p4594_p10 = scmp.lt.s32.totalorder %s177_s18, %s177_s18 }
  0xfe   :  { %p4590_p9 = scmp.ne.s32.totalorder %s177_s18, %s4589_s10  ;;  %p4595_p11 = scmp.lt.s32.totalorder %s4589_s10, %s4589_s10 }
 0x100   :  { %p4596_p12 = por %p4595_p11, %p4594_p10 }
 0x102   :  { %p4597_p13 = pnand %p4596_p12, %p4590_p9 }
 0x104   :  { %4600 = shalt.err (!%p4597_p13)
}
 0x105   :  { %182 = dma.hbm_to_vmem [thread:$0]  %s6028_s12, 512, %s177_s18, [#allocation21], %s4738_s0, %s4738_s0, %s4739_s25  }
 0x106   :  { %s4601_s3 = scalar_lea.hbm %s6030_s14, 256 }
 0x107   :  { %p4602_p0 = scmp.ne.s32.totalorder %s6030_s14, %s4601_s3  ;;  %p4605_p1 = scmp.lt.u32.totalorder %s4601_s3, %s6030_s14 }
 0x109   :  { %p4607_p2 = pnand %p4605_p1, %p4602_p0 }
 0x10b   :  { %4610 = shalt.err (!%p4607_p2)
}
 0x10c   :  { %s4611_s27 = scalar_lea.vmem %s201_s26, 256  ;;  %p4616_p4 = scmp.lt.s32.totalorder %s201_s26, %s201_s26 }
 0x10d   :  { %p4612_p3 = scmp.ne.s32.totalorder %s201_s26, %s4611_s27  ;;  %p4617_p5 = scmp.lt.s32.totalorder %s4611_s27, %s4611_s27 }
 0x10f   :  { %p4618_p6 = por %p4617_p5, %p4616_p4 }
 0x111   :  { %p4619_p7 = pnand %p4618_p6, %p4612_p3 }
 0x113   :  { %4622 = shalt.err (!%p4619_p7)
}
 0x114   :  { %206 = dma.hbm_to_vmem [thread:$0]  %s6030_s14, 256, %s201_s26, [#allocation24], %s4738_s0, %s4738_s0, %s4739_s25  }
 0x115   :  { %s4754_s18 = smov [#allocation26]   ;;  %s4623_s6 = scalar_lea.hbm %s6031_s15, 16 }
 0x116   :  { %s213_s21 = sshll.u32 %s4754_s18, 4  ;;  %p4624_p8 = scmp.ne.s32.totalorder %s6031_s15, %s4623_s6  ;;  %s214_s21 = int_to_ptr.vmem [resolvable:$true] %s213_s21 }
 0x117   :  { %p4627_p9 = scmp.lt.u32.totalorder %s4623_s6, %s6031_s15 }
 0x119   :  { %p4629_p10 = pnand %p4627_p9, %p4624_p8 }
 0x11b   :  { %4632 = shalt.err (!%p4629_p10)
}
 0x11c   :  { %s4633_s10 = scalar_lea.vmem %s214_s21, 16  ;;  %s4637_s14 = scalar_lea.vmem %s214_s21, 32 }
 0x11d   :  { %p4634_p11 = scmp.ne.s32.totalorder %s214_s21, %s4633_s10  ;;  %p4638_p12 = scmp.lt.s32.totalorder %s214_s21, %s214_s21 }
 0x11e   :  { %p4639_p13 = scmp.lt.s32.totalorder %s4637_s14, %s4633_s10 }
 0x120   :  { %p4640_p0 = por %p4639_p13, %p4638_p12 }
 0x122   :  { %p4641_p1 = pnand %p4640_p0, %p4634_p11 }
 0x124   :  { %4644 = shalt.err (!%p4641_p1)
}
 0x125   :  { %216 = dma.hbm_to_vmem [thread:$0]  %s6031_s15, 16, %s214_s21, [#allocation27]  }
 0x126   :  { %4711 = dma.done.wait [#allocation3], 64  }
 0x127   :  { %4712 = vsyncadd [#allocation3], 4294967232 }
 0x128   :  { %4713 = dma.done.wait [#allocation6], 192  }
 0x129   :  { %4714 = vsyncadd [#allocation6], 4294967104 }
 0x12a   :  { %4715 = dma.done.wait [#allocation9], 544  }
 0x12b   :  { %4716 = vsyncadd [#allocation9], 4294966752 }
 0x12c   :  { %4717 = dma.done.wait [#allocation12], 64  }
 0x12d   :  { %4718 = vsyncadd [#allocation12], 4294967232 }
 0x12e   :  { %4719 = dma.done.wait [#allocation15], 672  }
 0x12f   :  { %4720 = vsyncadd [#allocation15], 4294966624 }
 0x130   :  { %4721 = dma.done.wait [#allocation18], 400  }
 0x131   :  { %4722 = vsyncadd [#allocation18], 4294966896 }
 0x132   :  { %4723 = dma.done.wait [#allocation21], 768  }
 0x133   :  { %4724 = vsyncadd [#allocation21], 4294966528 }
 0x134   :  { %4725 = dma.done.wait [#allocation24], 288  }
 0x135   :  { %4726 = vsyncadd [#allocation24], 4294967008 }
 0x136   :  { %4727 = dma.done.wait [#allocation27], 16  }
 0x137   :  { %4728 = vsyncadd [#allocation27], 4294967280  ;;  %v4755_v0 = vmov 0.0   ;;  %vm4756_vm0 = vmmov 0   ;;  %v5088_v1 = vld [vmem:[#allocation8] sm:$0xff]   ;;  %v5090_v2 = vld [vmem:[#allocation8 + $0x10] sm:$0xff]  }
 0x138   :  { %3639 = vmatprep.subr.bf16.mxu0 %v4755_v0  ;;  %3647 = vmatprep.subr.bf16.mxu1 %v4755_v0  ;;  %v5093_v3 = vld [vmem:[#allocation8 + $0x8] sm:$0xff]   ;;  %v5097_v4 = vld [vmem:[#allocation8 + $0x18] sm:$0xff]   ;;  %vm365_vm1 = vcmask 261120   ;;  %v351_v5 = vld [vmem:[#allocation5 + $0x2] sm:$0x3]  ;;  %vm469_vm2 = vcmask 1040384  }
 0x139   :  { %3643 = vmatprep.mubr.msk.bf16.mxu0 %vm4756_vm0, %v4755_v0  ;;  %3651 = vmatprep.mubr.msk.bf16.mxu1 %vm4756_vm0, %v4755_v0  ;;  %v352_v6 = vpack.c.bf16 %v351_v5, %v351_v5  ;;  %v5111_v14 = vld [vmem:[#allocation10] sm:$0x3]  ;;  %vm472_vm3 = vcmask 58368   ;;  %vm489_vm4 = vcmask 1043456   ;;  %v268_v26 = vld [vmem:[#allocation7] sm:$0xf] }
 0x13a   :  { %3640 = vmatpush3.bf16.msra.mxu0 %v5088_v1  ;;  %3648 = vmatpush3.bf16.msra.mxu1 %v5090_v2  ;;  %v270_v27 = vld [vmem:[#allocation7 + $0x4] sm:$0xf]  ;;  %v5117_v28 = vsel %vm489_vm4, %v268_v26, 0  ;;  %vm485_vm5 = vcmask 64512   ;;  %v5125_v33 = vld [vmem:[#allocation16] sm:$0xff]   ;;  %v5139_v37 = vld [vmem:[#allocation16 + $0x10] sm:$0xff]  }
 0x13b   :  { %3641 = vmatprep.subr.bf16.mxu0 %v4755_v0  ;;  %3649 = vmatprep.subr.bf16.mxu1 %v4755_v0  ;;  %v409_v7 = vshrl.u32 %v352_v6, 16  ;;  %v5119_v29 = vsel %vm489_vm4, %v270_v27, 0  ;;  %v5129_v36 = vld [vmem:[#allocation16 + $0x8] sm:$0xff]   ;;  %v5143_v38 = vld [vmem:[#allocation16 + $0x18] sm:$0xff]   ;;  %vm615_vm6 = vcmask 523264   ;;  %v5155_v52 = vld [vmem:[#allocation17] sm:$0xff]  }
 0x13c   :  { %586 = vrot.lane.b32.xlu1 %v351_v5, %s4734_s23  ;;  %v5158_v53 = vld [vmem:[#allocation17 + $0x8] sm:$0xff]   ;;  %v5162_v54 = vld [vmem:[#allocation17 + $0x10] sm:$0xff]   ;;  %v4757_v61 = vmov 0   ;;  %vm667_vm7 = vcmask 130048   ;;  %vm688_vm8 = vcmask 392192   ;;  %s4758_s15 = smov 112  }
 0x13d   :  { %v5168_v60 = vld [vmem:[#allocation11] sm:$0x3]  ;;  %4129 = vset.pattern.permute.xlu0 %v4757_v61  ;;  %4130 = vset.pattern.permute.xlu1 %v4757_v61  ;;  %v660_v62 = vld [vmem:[#allocation13] sm:$0x3]  ;;  %s4759_s9 = smov 96  }
 0x13e   :  { %3642 = vmatpush3.bf16.msra.mxu0 %v5093_v3  ;;  %3650 = vmatpush3.bf16.msra.mxu1 %v5097_v4  ;;  %vm3413_vm9 = vcmp.gt.f32.partialorder %v5168_v60, 0.0  ;;  %vm3437_vm11 = vcmp.gt.f32.partialorder %v5168_v60, 1.0 }
 0x13f   :  { %3655 = vmatprep.subr.bf16.mxu0 %v4755_v0  ;;  %3661 = vmatprep.subr.bf16.mxu1 %v4755_v0 }
 0x141   :  { %3644 = vmatmul.mubr.msk.bf16.vlgmr.msra.gmra.mrb[0].mxu0 %vm365_vm1, %v352_v6  ;;  %3652 = vmatmul.mubr.msk.bf16.vlgmr.msra.gmra.mrb[0].mxu1 %vm365_vm1, %v409_v7  ;;  %v5174_v6 = vld [vmem:[#allocation22] sm:$0xff]  }
 0x142   :  { %3657 = vmatprep.mubr.msk.bf16.mxu0 %vm4756_vm0, %v4755_v0  ;;  %3663 = vmatprep.mubr.msk.bf16.mxu1 %vm4756_vm0, %v4755_v0 }
 0x143   :  { %3656 = vmatpush3.bf16.msra.mxu0 %v5117_v28  ;;  %3662 = vmatpush3.bf16.msra.mxu1 %v5119_v29 }
 0x144   :  { %3667 = vmatprep.subr.bf16.mxu0 %v4755_v0  ;;  %3679 = vmatprep.subr.bf16.mxu1 %v4755_v0 }
 0x1ae   :  { %v5147_v41 = vpop.permute.xlu1 %586 }
 0x214   :  { %v403_v8 = vpop.f32.mrb[0].mxu0  ;;  %v460_v9 = vpop.f32.mrb[0].mxu1 }
 0x215   :  { %v3645_v10 = vpop.f32.mrb[1].mxu0  ;;  %v467_v11 = vrot.slane %v460_v9, 7  ;;  %v3653_v12 = vpop.f32.mrb[1].mxu1  ;;  %v5184_v9 = vld [vmem:[#allocation2] sm:$0x3] }
 0x216   :  { %v406_v13 = vpop.f32.mrb[2].mxu0  ;;  %v463_v15 = vpop.f32.mrb[2].mxu1  ;;  %v732_v10 = vpack.c.bf16 %v5184_v9, %v5184_v9 }
 0x217   :  { %v3646_v16 = vpop.f32.mrb[3].mxu0  ;;  %v3654_v17 = vpop.f32.mrb[3].mxu1  ;;  %v470_v18 = vsel %vm469_vm2, %v403_v8, %v467_v11  ;;  %v5178_v8 = vld [vmem:[#allocation22 + $0x8] sm:$0xff]   ;;  %v3397_v15 = vld [vmem:[#allocation23] ss:$0 sm:$0xff] }
 0x218   :  { %v471_v19 = vadd.f32 %v470_v18, %v5111_v14  ;;  %v3396_v11 = vld [vmem:[#allocation19] ss:$0 sm:$0xff] }
 0x21a   :  { %v473_v20 = vsel %vm472_vm3, %v471_v19, -inf }
 0x21b   :  { %474 = vmax.xlane.f32.xlu0 %v473_v20 }
 0x2a8   :  { %v475_v21 = vpop.xlane.xlu0 %474 }
 0x2a9   :  { %v476_v22 = vsub.f32 %v471_v19, %v475_v21 }
 0x2ab   :  { %v477_v23 = vmul.f32 1.442695, %v476_v22 }
 0x2ad   :  { %4150 = vpow2.f32 %v477_v23  ;;  %v349_v23 = vld [vmem:[#allocation5] sm:$0x3] }
 0x2b7   :  { %v4151_v24 = vpop.eup %4150 }
 0x2b8   :  { %v479_v25 = vsel %vm472_vm3, %v4151_v24, 0.0 }
 0x2b9   :  { %480 = vadd.xlane.f32.xlu0 %v479_v25 }
 0x2cf   :  { %303 = vperm.xlu0 %4129, %v5168_v60  }
 0x346   :  { %v481_v30 = vpop.xlane.xlu0 %480 }
 0x347   :  { %4152 = vrcp.f32 %v481_v30 }
 0x34e   :  { %v304_v12 = vpop.permute.xlu0 %303 }
 0x34f   :  { %v312_v13 = vmul.f32 %v3396_v11, %v304_v12 }
 0x351   :  { %v4153_v31 = vpop.eup %4152  ;;  %v5192_v16 = vadd.f32 %v3397_v15, %v312_v13 }
 0x352   :  { %v483_v32 = vmul.f32 %v4153_v31, %v4151_v24 }
 0x354   :  { %v484_v34 = vpack.c.bf16 %v483_v32, %v483_v32 }
 0x356   :  { %3658 = vmatmul.mubr.msk.bf16.vlgmr.msra.gmra.mrb[4].mxu0 %vm485_vm5, %v484_v34  ;;  %v533_v35 = vshrl.u32 %v484_v34, 16 }
 0x357   :  { %3668 = vmatpush3.bf16.msra.mxu0 %v5125_v33  ;;  %3675 = vmatprep.mubr.msk.bf16.mxu0 %vm4756_vm0, %v4755_v0 }
 0x358   :  { %3664 = vmatmul.mubr.msk.bf16.vlgmr.msra.gmra.mrb[4].mxu1 %vm485_vm5, %v533_v35  ;;  %3669 = vmatprep.subr.bf16.mxu0 %v4755_v0 }
 0x359   :  { %3685 = vmatprep.mubr.msk.bf16.mxu1 %vm4756_vm0, %v4755_v0  ;;  %3680 = vmatpush3.bf16.msra.mxu1 %v5155_v52 }
 0x35a   :  { %3681 = vmatprep.subr.bf16.mxu1 %v4755_v0 }
 0x35b   :  { %3670 = vmatpush3.bf16.msra.mxu0 %v5129_v36 }
 0x35c   :  { %3671 = vmatprep.subr.bf16.mxu0 %v4755_v0 }
 0x35d   :  { %3682 = vmatpush3.bf16.msra.mxu1 %v5158_v53 }
 0x35e   :  { %3683 = vmatprep.subr.bf16.mxu1 %v4755_v0 }
 0x35f   :  { %3672 = vmatpush3.bf16.msra.mxu0 %v5139_v37 }
 0x360   :  { %3673 = vmatprep.subr.bf16.mxu0 %v4755_v0 }
 0x361   :  { %3684 = vmatpush3.bf16.msra.mxu1 %v5162_v54 }
 0x362   :  { %3689 = vmatprep.subr.bf16.mxu1 %v4755_v0 }
 0x363   :  { %3674 = vmatpush3.bf16.msra.mxu0 %v5143_v38 }
 0x364   :  { %3697 = vmatprep.subr.bf16.mxu0 %v4755_v0 }
 0x429   :  { %v527_v39 = vpop.f32.mrb[4].mxu0 }
 0x42a   :  { %v3659_v40 = vpop.f32.mrb[5].mxu0 }
 0x42b   :  { %v530_v42 = vpop.f32.mrb[6].mxu0  ;;  %v575_v43 = vpop.f32.mrb[4].mxu1  ;;  %v5204_v40 = vld [vmem:[#allocation20] sm:$0xff]  }
 0x42c   :  { %v582_v44 = vrot.slane %v575_v43, 7  ;;  %v3660_v45 = vpop.f32.mrb[7].mxu0  ;;  %v3665_v46 = vpop.f32.mrb[5].mxu1  ;;  %v5207_v42 = vld [vmem:[#allocation20 + $0x8] sm:$0xff]  }
 0x42d   :  { %v578_v47 = vpop.f32.mrb[6].mxu1 }
 0x42e   :  { %v584_v48 = vsel %vm469_vm2, %v527_v39, %v582_v44  ;;  %v3666_v49 = vpop.f32.mrb[7].mxu1  ;;  %v5218_v47 = vld [vmem:[#allocation22 + $0x10] sm:$0xff]  }
 0x42f   :  { %v589_v50 = vsel %vm365_vm1, %v584_v48, %v5147_v41  ;;  %v5222_v49 = vld [vmem:[#allocation22 + $0x18] sm:$0xff]  }
 0x430   :  { %v590_v51 = vpack.c.bf16 %v589_v50, %v589_v50  ;;  %v5228_v50 = vld [vmem:[#allocation2 + $0x2] sm:$0x3] }
 0x432   :  { %3676 = vmatmul.mubr.msk.bf16.vlgmr.msra.gmra.mrb[8].mxu0 %vm615_vm6, %v590_v51  ;;  %v887_v51 = vpack.c.bf16 %v5228_v50, %v5228_v50 }
 0x433   :  { %3701 = vmatprep.mubr.msk.bf16.mxu0 %vm4756_vm0, %v4755_v0  ;;  %3698 = vmatpush3.bf16.msra.mxu0 %v5204_v40 }
 0x434   :  { %3699 = vmatprep.subr.bf16.mxu0 %v4755_v0 }
 0x437   :  { %3700 = vmatpush3.bf16.msra.mxu0 %v5207_v42 }
 0x438   :  { %3705 = vmatprep.subr.bf16.mxu0 %v4755_v0 }
 0x505   :  { %v653_v55 = vpop.f32.mrb[8].mxu0 }
 0x506   :  { %4154 = vtanh.f32 %v653_v55  ;;  %v3677_v56 = vpop.f32.mrb[9].mxu0  ;;  %v5240_v55 = vld [vmem:[#allocation23 + $0x1] ss:$0 sm:$0xff] }
 0x507   :  { %v656_v57 = vpop.f32.mrb[10].mxu0 }
 0x508   :  { %v3678_v58 = vpop.f32.mrb[11].mxu0 }
 0x510   :  { %v4155_v59 = vpop.eup %4154 }
 0x511   :  { %664 = vrot.lane.b32.xlu1 %v4155_v59, %s4744_s11 }
 0x583   :  { %v665_v63 = vpop.permute.xlu1 %664 }
 0x584   :  { %v668_v5 = vsel %vm667_vm7, %v660_v62, %v665_v63 }
 0x585   :  { %v669_v7 = vpack.c.bf16 %v668_v5, %v668_v5 }
 0x587   :  { %3686 = vmatmul.mubr.msk.bf16.vlgmr.msra.gmra.mrb[8].mxu1 %vm688_vm8, %v669_v7 }
 0x588   :  { %3690 = vmatpush3.bf16.msra.mxu1 %v5174_v6  ;;  %3693 = vmatprep.mubr.msk.bf16.mxu1 %vm4756_vm0, %v4755_v0 }
 0x589   :  { %3691 = vmatprep.subr.bf16.mxu1 %v4755_v0 }
 0x58c   :  { %3692 = vmatpush3.bf16.msra.mxu1 %v5178_v8 }
 0x58d   :  { %3713 = vmatprep.subr.bf16.mxu1 %v4755_v0 }
 0x593   :  { %3694 = vmatmul.mubr.msk.bf16.vlgmr.msra.gmra.mrb[8].mxu1 %vm365_vm1, %v732_v10 }
 0x594   :  { %3717 = vmatprep.mubr.msk.bf16.mxu1 %vm4756_vm0, %v4755_v0 }
 0x666   :  { %v782_v17 = vpop.f32.mrb[8].mxu1 }
 0x667   :  { %v4049_v18 = vadd.f32 %v782_v17, %v5192_v16  ;;  %v3695_v19 = vpop.f32.mrb[9].mxu1 }
 0x668   :  { %v785_v20 = vpop.f32.mrb[10].mxu1  ;;  %v5249_v19 = vld [vmem:[#allocation25] sm:$0xff]  }
 0x669   :  { %4156 = vtanh.f32 %v4049_v18  ;;  %v3696_v21 = vpop.f32.mrb[11].mxu1  ;;  %v3421_v24 = vmul.f32 -1.442695, %v4049_v18  ;;  %3714 = vmatpush3.bf16.msra.mxu1 %v5249_v19  ;;  %v5252_v20 = vld [vmem:[#allocation25 + $0x8] sm:$0xff]  }
 0x66a   :  { %3715 = vmatprep.subr.bf16.mxu1 %v4755_v0 }
 0x66b   :  { %4158 = vpow2.f32 %v3421_v24 }
 0x66d   :  { %3716 = vmatpush3.bf16.msra.mxu1 %v5252_v20 }
 0x66e   :  { %3721 = vmatprep.subr.bf16.mxu1 %v4755_v0 }
 0x673   :  { %v4157_v22 = vpop.eup %4156 }
 0x674   :  { %802 = vrot.lane.b32.xlu1 %v4157_v22, %s4738_s0 }
 0x675   :  { %v4159_v25 = vpop.eup %4158 }
 0x676   :  { %v792_v26 = vadd.f32 1.0, %v4159_v25 }
 0x678   :  { %797 = vrot.lane.b32.xlu1 %v349_v23, %s4734_s23  ;;  %4160 = vrcp.f32 %v792_v26 }
 0x682   :  { %v4161_v27 = vpop.eup %4160 }
 0x6e6   :  { %v803_v30 = vpop.permute.xlu1 %802 }
 0x6e7   :  { %v805_v31 = vmul.f32 %v4161_v27, %v803_v30 }
 0x6e9   :  { %807 = vrot.lane.b32.xlu1 %v805_v31, %s4734_s23 }
 0x6ea   :  { %v5198_v32 = vpop.permute.xlu1 %797 }
 0x6eb   :  { %v800_v34 = vmul.f32 %v4161_v27, %v5198_v32 }
 0x75b   :  { %v808_v35 = vpop.permute.xlu1 %807 }
 0x75c   :  { %v5201_v39 = vadd.f32 %v808_v35, %v800_v34 }
 0x75e   :  { %4162 = vtanh.f32 %v5201_v39 }
 0x768   :  { %v4163_v43 = vpop.eup %4162 }
 0x769   :  { %813 = vrot.lane.b32.xlu1 %v4163_v43, %s4738_s0 }
 0x7db   :  { %v814_v44 = vpop.permute.xlu1 %813 }
 0x7dc   :  { %v5213_v45 = vmul.f32 %v4161_v27, %v814_v44 }
 0x7de   :  { %v828_v46 = vpack.c.bf16 %v5213_v45, %v5213_v45 }
 0x7e0   :  { %830 = vrot.lane.b32.xlu1 %v828_v46, %s4734_s23 }
 0x852   :  { %v831_v48 = vpop.permute.xlu1 %830 }
 0x853   :  { %3702 = vmatmul.mubr.msk.bf16.vlgmr.msra.gmra.mrb[12].mxu0 %vm365_vm1, %v831_v48 }
 0x854   :  { %3706 = vmatpush3.bf16.msra.mxu0 %v5218_v47  ;;  %3709 = vmatprep.mubr.msk.bf16.mxu0 %vm4756_vm0, %v4755_v0 }
 0x855   :  { %3707 = vmatprep.subr.bf16.mxu0 %v4755_v0 }
 0x858   :  { %3708 = vmatpush3.bf16.msra.mxu0 %v5222_v49 }
 0x859   :  { %3729 = vmatprep.subr.bf16.mxu0 %v4755_v0 }
 0x85f   :  { %3710 = vmatmul.mubr.msk.bf16.vlgmr.msra.gmra.mrb[12].mxu0 %vm365_vm1, %v887_v51 }
 0x860   :  { %3730 = vmatpush3.bf16.msra.mxu0 %v5090_v2  ;;  %3733 = vmatprep.mubr.msk.bf16.mxu0 %vm4756_vm0, %v4755_v0 }
 0x861   :  { %3731 = vmatprep.subr.bf16.mxu0 %v4755_v0 }
 0x864   :  { %3732 = vmatpush3.bf16.msra.mxu0 %v5097_v4 }
 0x865   :  { %3743 = vmatprep.subr.bf16.mxu0 %v4755_v0 }
 0x932   :  { %v937_v56 = vpop.f32.mrb[12].mxu0 }
 0x933   :  { %v4050_v57 = vadd.f32 %v5240_v55, %v937_v56  ;;  %v3711_v58 = vpop.f32.mrb[13].mxu0 }
 0x934   :  { %v940_v59 = vpop.f32.mrb[14].mxu0 }
 0x935   :  { %4164 = vtanh.f32 %v4050_v57  ;;  %v3712_v62 = vpop.f32.mrb[15].mxu0  ;;  %v3428_v5 = vmul.f32 -1.442695, %v4050_v57 }
 0x937   :  { %4166 = vpow2.f32 %v3428_v5 }
 0x93f   :  { %v4165_v63 = vpop.eup %4164 }
 0x940   :  { %953 = vrot.lane.b32.xlu1 %v4165_v63, %s4738_s0 }
 0x941   :  { %v4167_v7 = vpop.eup %4166 }
 0x942   :  { %v947_v10 = vadd.f32 1.0, %v4167_v7  ;;  %v661_v7 = vld [vmem:[#allocation14] sm:$0x3] }
 0x944   :  { %4168 = vrcp.f32 %v947_v10  ;;  %v817_v10 = vsel %vm3413_vm9, 1, %v4757_v61 }
 0x94e   :  { %v4169_v11 = vpop.eup %4168 }
 0x94f   :  { %v951_v15 = vmul.f32 %v4169_v11, %v5147_v41 }
 0x9b2   :  { %v954_v12 = vpop.permute.xlu1 %953 }
 0x9b3   :  { %v956_v13 = vmul.f32 %v4169_v11, %v954_v12 }
 0x9b5   :  { %958 = vrot.lane.b32.xlu1 %v956_v13, %s4734_s23 }
 0xa27   :  { %v959_v17 = vpop.permute.xlu1 %958 }
 0xa28   :  { %v5246_v18 = vadd.f32 %v959_v17, %v951_v15 }
 0xa2a   :  { %4170 = vtanh.f32 %v5246_v18 }
 0xa34   :  { %v4171_v21 = vpop.eup %4170 }
 0xa35   :  { %964 = vrot.lane.b32.xlu1 %v4171_v21, %s4738_s0 }
 0xaa7   :  { %v965_v22 = vpop.permute.xlu1 %964 }
 0xaa8   :  { %v5258_v23 = vmul.f32 %v4169_v11, %v965_v22  ;;  %v5287_v11 = vld [vmem:[#allocation26] ss:$0 sm:$0xff] }
 0xaaa   :  { %v974_v24 = vpack.c.bf16 %v5258_v23, %v5258_v23 }
 0xaac   :  { %976 = vrot.lane.b32.xlu1 %v974_v24, %s4734_s23  ;;  %v1092_v25 = vshrl.u32 %v974_v24, 16 }
 0xab0   :  { %1094 = vrot.lane.b32.xlu1 %v1092_v25, %s4734_s23 }
 0xb1e   :  { %v977_v26 = vpop.permute.xlu1 %976 }
 0xb1f   :  { %3718 = vmatmul.mubr.msk.bf16.vlgmr.msra.gmra.mrb[12].mxu1 %vm365_vm1, %v977_v26 }
 0xb20   :  { %3722 = vmatpush3.bf16.msra.mxu1 %v5088_v1  ;;  %3725 = vmatprep.mubr.msk.bf16.mxu1 %vm4756_vm0, %v4755_v0 }
 0xb21   :  { %3723 = vmatprep.subr.bf16.mxu1 %v4755_v0 }
 0xb22   :  { %v1095_v27 = vpop.permute.xlu1 %1094 }
 0xb23   :  { %3734 = vmatmul.mubr.msk.bf16.vlgmr.msra.gmra.mrb[16].mxu0 %vm365_vm1, %v1095_v27 }
 0xb24   :  { %3724 = vmatpush3.bf16.msra.mxu1 %v5093_v3  ;;  %3744 = vmatpush3.bf16.msra.mxu0 %v5119_v29 }
 0xb25   :  { %3737 = vmatprep.subr.bf16.mxu1 %v4755_v0  ;;  %3745 = vmatprep.mubr.msk.bf16.mxu0 %vm4756_vm0, %v4755_v0 }
 0xb26   :  { %3761 = vmatprep.subr.bf16.mxu0 %v4755_v0 }
 0xb27   :  { %3726 = vmatmul.mubr.msk.bf16.vlgmr.msra.gmra.mrb[16].mxu1 %vm365_vm1, %v977_v26 }
 0xb28   :  { %3738 = vmatpush3.bf16.msra.mxu1 %v5117_v28  ;;  %3739 = vmatprep.mubr.msk.bf16.mxu1 %vm4756_vm0, %v4755_v0 }
 0xb29   :  { %3749 = vmatprep.subr.bf16.mxu1 %v4755_v0 }
 0xbf2   :  { %v1027_v30 = vpop.f32.mrb[12].mxu1 }
 0xbf3   :  { %v3719_v31 = vpop.f32.mrb[13].mxu1  ;;  %v5290_v12 = vadd.f32 %v5287_v11, %v1027_v30 }
 0xbf4   :  { %v1030_v34 = vpop.f32.mrb[14].mxu1 }
 0xbf5   :  { %v3720_v35 = vpop.f32.mrb[15].mxu1  ;;  %v1033_v13 = vmul.f32 1.442695, %v5290_v12 }
 0xbf6   :  { %v1133_v43 = vpop.f32.mrb[16].mxu0 }
 0xbf7   :  { %v3735_v44 = vpop.f32.mrb[17].mxu0  ;;  %v1140_v48 = vrot.slane %v1133_v43, 7  ;;  %4172 = vpow2.f32 %v1033_v13 }
 0xbf8   :  { %v1136_v46 = vpop.f32.mrb[18].mxu0 }
 0xbf9   :  { %v3736_v51 = vpop.f32.mrb[19].mxu0 }
 0xbfa   :  { %v1085_v56 = vpop.f32.mrb[16].mxu1 }
 0xbfb   :  { %v1142_v57 = vsel %vm469_vm2, %v1085_v56, %v1140_v48  ;;  %v3727_v58 = vpop.f32.mrb[17].mxu1 }
 0xbfc   :  { %v1088_v59 = vpop.f32.mrb[18].mxu1  ;;  %v1143_v62 = vadd.f32 %v1142_v57, %v5111_v14 }
 0xbfd   :  { %v3728_v63 = vpop.f32.mrb[19].mxu1 }
 0xbfe   :  { %v1144_v5 = vsel %vm472_vm3, %v1143_v62, -inf }
 0xbff   :  { %1145 = vmax.xlane.f32.xlu1 %v1144_v5 }
 0xc01   :  { %v4173_v22 = vpop.eup %4172 }
 0xc10   :  { %1036 = vrot.lane.b32.xlu1 %v661_v7, %s4744_s11 }
 0xc14   :  { %819 = vperm.xlu1 %4130, %v817_v10  }
 0xc8c   :  { %v1146_v15 = vpop.xlane.xlu1 %1145 }
 0xc8d   :  { %v1147_v17 = vsub.f32 %v1143_v62, %v1146_v15 }
 0xc8f   :  { %v1148_v21 = vmul.f32 1.442695, %v1147_v17 }
 0xc90   :  { %v1037_v24 = vpop.permute.xlu1 %1036 }
 0xc91   :  { %4174 = vpow2.f32 %v1148_v21  ;;  %v1039_v25 = vmul.f32 %v4173_v22, %v1037_v24 }
 0xc93   :  { %1041 = vrot.lane.b32.xlu1 %v1039_v25, %s4758_s15 }
 0xc94   :  { %v5299_v34 = vpop.permute.xlu1 %819 }
 0xc95   :  { %vm821_vm10 = vcmp.eq.s32.totalorder %v5299_v34, 1 }
 0xc9b   :  { %v4175_v26 = vpop.eup %4174 }
 0xc9c   :  { %v1150_v27 = vsel %vm472_vm3, %v4175_v26, 0.0 }
 0xc9d   :  { %1151 = vadd.xlane.f32.xlu0 %v1150_v27 }
 0xcb3   :  { %1249 = vrot.lane.b32.xlu0 %v5258_v23, %s4738_s0 }
 0xcb7   :  { %823 = vrot.lane.b32.xlu0 %v5184_v9, %s4759_s9 }
 0xd2a   :  { %v1152_v30 = vpop.xlane.xlu0 %1151 }
 0xd2b   :  { %4176 = vrcp.f32 %v1152_v30 }
 0xd2e   :  { %v1250_v31 = vpop.permute.xlu0 %1249 }
 0xd32   :  { %v824_v35 = vpop.permute.xlu0 %823 }
 0xd33   :  { %v5305_v43 = vsel %vm821_vm10, %v5213_v45, %v824_v35 }
 0xd34   :  { %v1352_v44 = vpack.c.bf16 %v5305_v43, %v5305_v43 }
 0xd35   :  { %v4177_v46 = vpop.eup %4176 }
 0xd36   :  { %v1154_v48 = vmul.f32 %v4177_v46, %v4175_v26  ;;  %1354 = vrot.lane.b32.xlu1 %v1352_v44, %s4734_s23  ;;  %v1042_v26 = vpop.permute.xlu1 %1041 }
 0xd37   :  { %v5341_v27 = vadd.f32 %v1042_v26, %v5290_v12 }
 0xd38   :  { %v1155_v9 = vpack.c.bf16 %v1154_v48, %v1154_v48 }
 0xd3a   :  { %3740 = vmatmul.mubr.msk.bf16.vlgmr.msra.gmra.mrb[20].mxu1 %vm485_vm5, %v1155_v9  ;;  %v1199_v51 = vshrl.u32 %v1155_v9, 16 }
 0xd3b   :  { %3750 = vmatpush3.bf16.msra.mxu1 %v5125_v33  ;;  %3757 = vmatprep.mubr.msk.bf16.mxu1 %vm4756_vm0, %v4755_v0 }
 0xd3c   :  { %3746 = vmatmul.mubr.msk.bf16.vlgmr.msra.gmra.mrb[20].mxu0 %vm485_vm5, %v1199_v51  ;;  %3751 = vmatprep.subr.bf16.mxu1 %v4755_v0 }
 0xd3d   :  { %3762 = vmatpush3.bf16.msra.mxu0 %v5155_v52  ;;  %3767 = vmatprep.mubr.msk.bf16.mxu0 %vm4756_vm0, %v4755_v0 }
 0xd3e   :  { %3763 = vmatprep.subr.bf16.mxu0 %v4755_v0 }
 0xd3f   :  { %3752 = vmatpush3.bf16.msra.mxu1 %v5129_v36 }
 0xd40   :  { %3753 = vmatprep.subr.bf16.mxu1 %v4755_v0 }
 0xd41   :  { %3764 = vmatpush3.bf16.msra.mxu0 %v5158_v53 }
 0xd42   :  { %3765 = vmatprep.subr.bf16.mxu0 %v4755_v0 }
 0xd43   :  { %3754 = vmatpush3.bf16.msra.mxu1 %v5139_v37 }
 0xd44   :  { %3755 = vmatprep.subr.bf16.mxu1 %v4755_v0 }
 0xd45   :  { %3766 = vmatpush3.bf16.msra.mxu0 %v5162_v54 }
 0xd46   :  { %3771 = vmatprep.subr.bf16.mxu0 %v4755_v0 }
 0xd47   :  { %3756 = vmatpush3.bf16.msra.mxu1 %v5143_v38 }
 0xd48   :  { %3779 = vmatprep.subr.bf16.mxu1 %v4755_v0 }
 0xda8   :  { %v1355_v44 = vpop.permute.xlu1 %1354 }
 0xe0d   :  { %v1193_v45 = vpop.f32.mrb[20].mxu1 }
 0xe0e   :  { %v3741_v56 = vpop.f32.mrb[21].mxu1 }
 0xe0f   :  { %v1196_v57 = vpop.f32.mrb[22].mxu1  ;;  %v1238_v58 = vpop.f32.mrb[20].mxu0 }
 0xe10   :  { %v1245_v59 = vrot.slane %v1238_v58, 7  ;;  %v3742_v62 = vpop.f32.mrb[23].mxu1  ;;  %v3747_v63 = vpop.f32.mrb[21].mxu0 }
 0xe11   :  { %v1241_v5 = vpop.f32.mrb[22].mxu0 }
 0xe12   :  { %v1247_v7 = vsel %vm469_vm2, %v1193_v45, %v1245_v59  ;;  %v3748_v10 = vpop.f32.mrb[23].mxu0 }
 0xe13   :  { %v1252_v13 = vsel %vm365_vm1, %v1247_v7, %v1250_v31  ;;  %v5368_v7 = vsel %vm821_vm10, %v5201_v39, %v5198_v32 }
 0xe14   :  { %v1253_v15 = vpack.c.bf16 %v1252_v13, %v1252_v13 }
 0xe16   :  { %3758 = vmatmul.mubr.msk.bf16.vlgmr.msra.gmra.mrb[24].mxu1 %vm615_vm6, %v1253_v15 }
 0xe17   :  { %3780 = vmatpush3.bf16.msra.mxu1 %v5204_v40  ;;  %3783 = vmatprep.mubr.msk.bf16.mxu1 %vm4756_vm0, %v4755_v0 }
 0xe18   :  { %3781 = vmatprep.subr.bf16.mxu1 %v4755_v0 }
 0xe1b   :  { %3782 = vmatpush3.bf16.msra.mxu1 %v5207_v42 }
 0xe1c   :  { %3787 = vmatprep.subr.bf16.mxu1 %v4755_v0 }
 0xee9   :  { %v1291_v17 = vpop.f32.mrb[24].mxu1 }
 0xeea   :  { %4178 = vtanh.f32 %v1291_v17  ;;  %v3759_v21 = vpop.f32.mrb[25].mxu1 }
 0xeeb   :  { %v1294_v22 = vpop.f32.mrb[26].mxu1 }
 0xeec   :  { %v3760_v24 = vpop.f32.mrb[27].mxu1 }
 0xef4   :  { %v4179_v25 = vpop.eup %4178 }
 0xef5   :  { %1304 = vrot.lane.b32.xlu0 %v4179_v25, %s4744_s11 }
 0xf67   :  { %v1305_v30 = vpop.permute.xlu0 %1304 }
 0xf68   :  { %v1307_v31 = vsel %vm667_vm7, %v5341_v27, %v1305_v30 }
 0xf69   :  { %v1308_v35 = vpack.c.bf16 %v1307_v31, %v1307_v31 }
 0xf6b   :  { %3768 = vmatmul.mubr.msk.bf16.vlgmr.msra.gmra.mrb[24].mxu0 %vm688_vm8, %v1308_v35 }
 0xf6c   :  { %3772 = vmatpush3.bf16.msra.mxu0 %v5174_v6  ;;  %3775 = vmatprep.mubr.msk.bf16.mxu0 %vm4756_vm0, %v4755_v0 }
 0xf6d   :  { %3773 = vmatprep.subr.bf16.mxu0 %v4755_v0 }
 0xf70   :  { %3774 = vmatpush3.bf16.msra.mxu0 %v5178_v8 }
 0xf71   :  { %3795 = vmatprep.subr.bf16.mxu0 %v4755_v0 }
 0xf77   :  { %3776 = vmatmul.mubr.msk.bf16.vlgmr.msra.gmra.mrb[24].mxu0 %vm365_vm1, %v1355_v44 }
 0xf78   :  { %3796 = vmatpush3.bf16.msra.mxu0 %v5249_v19  ;;  %3799 = vmatprep.mubr.msk.bf16.mxu0 %vm4756_vm0, %v4755_v0 }
 0xf79   :  { %3797 = vmatprep.subr.bf16.mxu0 %v4755_v0 }
 0xf7c   :  { %3798 = vmatpush3.bf16.msra.mxu0 %v5252_v20 }
 0xf7d   :  { %3803 = vmatprep.subr.bf16.mxu0 %v4755_v0 }
0x104a   :  { %v1393_v46 = vpop.f32.mrb[24].mxu0 }
0x104b   :  { %v4051_v48 = vadd.f32 %v1393_v46, %v5192_v16  ;;  %v3777_v9 = vpop.f32.mrb[25].mxu0 }
0x104c   :  { %v1396_v51 = vpop.f32.mrb[26].mxu0 }
0x104d   :  { %4180 = vtanh.f32 %v4051_v48  ;;  %v3778_v45 = vpop.f32.mrb[27].mxu0  ;;  %v3440_v57 = vmul.f32 -1.442695, %v4051_v48 }
0x104f   :  { %4182 = vpow2.f32 %v3440_v57 }
0x1057   :  { %v4181_v56 = vpop.eup %4180 }
0x1058   :  { %1409 = vrot.lane.b32.xlu0 %v4181_v56, %s4738_s0  ;;  %v5409_v56 = vsel %vm821_vm10, %v5246_v18, %v5147_v41 }
0x1059   :  { %v4183_v58 = vpop.eup %4182 }
0x105a   :  { %v1403_v59 = vadd.f32 1.0, %v4183_v58 }
0x105c   :  { %4184 = vrcp.f32 %v1403_v59 }
0x1066   :  { %v4185_v62 = vpop.eup %4184 }
0x1067   :  { %v1407_v10 = vmul.f32 %v4185_v62, %v5368_v7 }
0x10ca   :  { %v1410_v63 = vpop.permute.xlu0 %1409 }
0x10cb   :  { %v1412_v5 = vmul.f32 %v4185_v62, %v1410_v63 }
0x10cd   :  { %1414 = vrot.lane.b32.xlu1 %v1412_v5, %s4734_s23 }
0x10d1   :  { %969 = vrot.lane.b32.xlu1 %v5228_v50, %s4759_s9 }
0x113f   :  { %v1415_v13 = vpop.permute.xlu1 %1414 }
0x1140   :  { %v5371_v15 = vadd.f32 %v1415_v13, %v1407_v10 }
0x1142   :  { %4186 = vtanh.f32 %v5371_v15 }
0x1143   :  { %v970_v17 = vpop.permute.xlu1 %969 }
0x1144   :  { %v5377_v21 = vsel %vm821_vm10, %v5258_v23, %v970_v17 }
0x1145   :  { %v1478_v50 = vpack.c.bf16 %v5377_v21, %v5377_v21 }
0x1147   :  { %1480 = vrot.lane.b32.xlu1 %v1478_v50, %s4734_s23 }
0x114c   :  { %v4187_v32 = vpop.eup %4186 }
0x114d   :  { %1420 = vrot.lane.b32.xlu0 %v4187_v32, %s4738_s0 }
0x11b9   :  { %v1481_v23 = vpop.permute.xlu1 %1480 }
0x11bf   :  { %v1421_v39 = vpop.permute.xlu0 %1420 }
0x11c0   :  { %v5383_v22 = vmul.f32 %v4185_v62, %v1421_v39 }
0x11c2   :  { %v1431_v24 = vpack.c.bf16 %v5383_v22, %v5383_v22 }
0x11c4   :  { %1433 = vrot.lane.b32.xlu0 %v1431_v24, %s4734_s23 }
0x1236   :  { %v1434_v25 = vpop.permute.xlu0 %1433 }
0x1237   :  { %3784 = vmatmul.mubr.msk.bf16.vlgmr.msra.gmra.mrb[28].mxu1 %vm365_vm1, %v1434_v25 }
0x1238   :  { %3788 = vmatpush3.bf16.msra.mxu1 %v5218_v47  ;;  %3791 = vmatprep.mubr.msk.bf16.mxu1 %vm4756_vm0, %v4755_v0 }
0x1239   :  { %3789 = vmatprep.subr.bf16.mxu1 %v4755_v0 }
0x123c   :  { %3790 = vmatpush3.bf16.msra.mxu1 %v5222_v49 }
0x123d   :  { %3811 = vmatprep.subr.bf16.mxu1 %v4755_v0 }
0x1243   :  { %3792 = vmatmul.mubr.msk.bf16.vlgmr.msra.gmra.mrb[28].mxu1 %vm365_vm1, %v1481_v23 }
0x1244   :  { %3812 = vmatpush3.bf16.msra.mxu1 %v5090_v2  ;;  %3815 = vmatprep.mubr.msk.bf16.mxu1 %vm4756_vm0, %v4755_v0 }
0x1245   :  { %3813 = vmatprep.subr.bf16.mxu1 %v4755_v0 }
0x1248   :  { %3814 = vmatpush3.bf16.msra.mxu1 %v5097_v4 }
0x1249   :  { %3825 = vmatprep.subr.bf16.mxu1 %v4755_v0 }
0x1316   :  { %v1519_v26 = vpop.f32.mrb[28].mxu1 }
0x1317   :  { %v4052_v30 = vadd.f32 %v5240_v55, %v1519_v26  ;;  %v3793_v31 = vpop.f32.mrb[29].mxu1 }
0x1318   :  { %v1522_v35 = vpop.f32.mrb[30].mxu1 }
0x1319   :  { %4188 = vtanh.f32 %v4052_v30  ;;  %v3794_v44 = vpop.f32.mrb[31].mxu1  ;;  %v3443_v2 = vmul.f32 -1.442695, %v4052_v30 }
0x131b   :  { %4190 = vpow2.f32 %v3443_v2 }
0x1323   :  { %v4189_v46 = vpop.eup %4188 }
0x1324   :  { %1535 = vrot.lane.b32.xlu0 %v4189_v46, %s4738_s0 }
0x1325   :  { %v4191_v48 = vpop.eup %4190 }
0x1326   :  { %v1529_v9 = vadd.f32 1.0, %v4191_v48  ;;  %v1301_v48 = vld [vmem:[#allocation14 + $0x2] sm:$0x3] }
0x1328   :  { %4192 = vrcp.f32 %v1529_v9  ;;  %v1424_v9 = vsel %vm3437_vm11, 1, %v4757_v61 }
0x1332   :  { %v4193_v51 = vpop.eup %4192 }
0x1333   :  { %v1533_v57 = vmul.f32 %v4193_v51, %v5409_v56 }
0x1396   :  { %v1536_v45 = vpop.permute.xlu0 %1535 }
0x1397   :  { %v1538_v4 = vmul.f32 %v4193_v51, %v1536_v45 }
0x1399   :  { %1540 = vrot.lane.b32.xlu1 %v1538_v4, %s4734_s23 }
0x140b   :  { %v1541_v58 = vpop.permute.xlu1 %1540 }
0x140c   :  { %v5412_v59 = vadd.f32 %v1541_v58, %v1533_v57 }
0x140e   :  { %4194 = vtanh.f32 %v5412_v59 }
0x1418   :  { %v4195_v62 = vpop.eup %4194 }
0x1419   :  { %1546 = vrot.lane.b32.xlu0 %v4195_v62, %s4738_s0 }
0x148b   :  { %v1547_v63 = vpop.permute.xlu0 %1546 }
0x148c   :  { %v5416_v5 = vmul.f32 %v4193_v51, %v1547_v63 }
0x148e   :  { %v1552_v10 = vpack.c.bf16 %v5416_v5, %v5416_v5 }
0x1490   :  { %1554 = vrot.lane.b32.xlu1 %v1552_v10, %s4734_s23  ;;  %v1658_v41 = vshrl.u32 %v1552_v10, 16 }
0x1492   :  { %1660 = vrot.lane.b32.xlu0 %v1658_v41, %s4734_s23 }
0x1502   :  { %v1555_v18 = vpop.permute.xlu1 %1554 }
0x1503   :  { %3800 = vmatmul.mubr.msk.bf16.vlgmr.msra.gmra.mrb[28].mxu0 %vm365_vm1, %v1555_v18 }
0x1504   :  { %3804 = vmatpush3.bf16.msra.mxu0 %v5088_v1  ;;  %v1661_v13 = vpop.permute.xlu0 %1660  ;;  %3807 = vmatprep.mubr.msk.bf16.mxu0 %vm4756_vm0, %v4755_v0 }
0x1505   :  { %3816 = vmatmul.mubr.msk.bf16.vlgmr.msra.gmra.mrb[32].mxu1 %vm365_vm1, %v1661_v13  ;;  %3805 = vmatprep.subr.bf16.mxu0 %v4755_v0 }
0x1506   :  { %3826 = vmatpush3.bf16.msra.mxu1 %v5119_v29  ;;  %3827 = vmatprep.mubr.msk.bf16.mxu1 %vm4756_vm0, %v4755_v0 }
0x1507   :  { %3843 = vmatprep.subr.bf16.mxu1 %v4755_v0 }
0x1508   :  { %3806 = vmatpush3.bf16.msra.mxu0 %v5093_v3 }
0x1509   :  { %3819 = vmatprep.subr.bf16.mxu0 %v4755_v0 }
0x150b   :  { %3808 = vmatmul.mubr.msk.bf16.vlgmr.msra.gmra.mrb[32].mxu0 %vm365_vm1, %v1555_v18 }
0x150c   :  { %3820 = vmatpush3.bf16.msra.mxu0 %v5117_v28  ;;  %3821 = vmatprep.mubr.msk.bf16.mxu0 %vm4756_vm0, %v4755_v0 }
0x150d   :  { %3831 = vmatprep.subr.bf16.mxu0 %v4755_v0 }
0x15d6   :  { %v1593_v1 = vpop.f32.mrb[28].mxu0 }
0x15d7   :  { %v3801_v17 = vpop.f32.mrb[29].mxu0 }
0x15d8   :  { %v1596_v50 = vpop.f32.mrb[30].mxu0  ;;  %v1699_v32 = vpop.f32.mrb[32].mxu1 }
0x15d9   :  { %v3802_v39 = vpop.f32.mrb[31].mxu0  ;;  %v3817_v24 = vpop.f32.mrb[33].mxu1  ;;  %v1706_v3 = vrot.slane %v1699_v32, 7 }
0x15da   :  { %v1702_v25 = vpop.f32.mrb[34].mxu1 }
0x15db   :  { %v3818_v23 = vpop.f32.mrb[35].mxu1 }
0x15de   :  { %v1651_v26 = vpop.f32.mrb[32].mxu0 }
0x15df   :  { %v1708_v30 = vsel %vm469_vm2, %v1651_v26, %v1706_v3  ;;  %v3809_v31 = vpop.f32.mrb[33].mxu0 }
0x15e0   :  { %v1654_v35 = vpop.f32.mrb[34].mxu0  ;;  %v1709_v44 = vadd.f32 %v1708_v30, %v5111_v14  ;;  %v5447_v14 = vadd.f32 %v5287_v11, %v1593_v1 }
0x15e1   :  { %v3810_v46 = vpop.f32.mrb[35].mxu0 }
0x15e2   :  { %v1710_v2 = vsel %vm472_vm3, %v1709_v44, -inf  ;;  %v1599_v62 = vmul.f32 1.442695, %v5447_v14 }
0x15e3   :  { %1711 = vmax.xlane.f32.xlu1 %v1710_v2 }
0x15f4   :  { %1602 = vrot.lane.b32.xlu1 %v1301_v48, %s4744_s11 }
0x15f8   :  { %1426 = vperm.xlu1 %4130, %v1424_v9  }
0x1670   :  { %v1712_v51 = vpop.xlane.xlu1 %1711 }
0x1671   :  { %v1713_v45 = vsub.f32 %v1709_v44, %v1712_v51 }
0x1673   :  { %v1714_v4 = vmul.f32 1.442695, %v1713_v45 }
0x1674   :  { %v1603_v60 = vpop.permute.xlu1 %1602 }
0x1675   :  { %4196 = vpow2.f32 %v1714_v4 }
0x1676   :  { %4198 = vpow2.f32 %v1599_v62 }
0x1678   :  { %v5450_v63 = vpop.permute.xlu1 %1426 }
0x1679   :  { %vm1428_vm12 = vcmp.eq.s32.totalorder %v5450_v63, 1 }
0x167a   :  { %v5459_v18 = vsel %vm1428_vm12, %v5383_v22, %v5305_v43 }
0x167b   :  { %v1918_v13 = vpack.c.bf16 %v5459_v18, %v5459_v18 }
0x167f   :  { %v4197_v57 = vpop.eup %4196 }
0x1680   :  { %v1716_v58 = vsel %vm472_vm3, %v4197_v57, 0.0  ;;  %v4199_v10 = vpop.eup %4198 }
0x1681   :  { %1717 = vadd.xlane.f32.xlu0 %v1716_v58  ;;  %v1605_v41 = vmul.f32 %v4199_v10, %v1603_v60 }
0x1697   :  { %1815 = vrot.lane.b32.xlu0 %v5416_v5, %s4738_s0 }
0x169b   :  { %1607 = vrot.lane.b32.xlu0 %v1605_v41, %s4758_s15  ;;  %v5521_v41 = vsel %vm1428_vm12, %v5371_v15, %v5368_v7 }
0x169f   :  { %1920 = vrot.lane.b32.xlu0 %v1918_v13, %s4734_s23 }
0x170e   :  { %v1718_v1 = vpop.xlane.xlu0 %1717 }
0x170f   :  { %4200 = vrcp.f32 %v1718_v1 }
0x1712   :  { %v1816_v23 = vpop.permute.xlu0 %1815 }
0x1716   :  { %v1608_v46 = vpop.permute.xlu0 %1607 }
0x1719   :  { %v4201_v17 = vpop.eup %4200 }
0x171a   :  { %v1720_v50 = vmul.f32 %v4201_v17, %v4197_v57 }
0x171c   :  { %v1721_v32 = vpack.c.bf16 %v1720_v50, %v1720_v50 }
0x171e   :  { %3822 = vmatmul.mubr.msk.bf16.vlgmr.msra.gmra.mrb[36].mxu0 %vm485_vm5, %v1721_v32  ;;  %v1765_v39 = vshrl.u32 %v1721_v32, 16  ;;  %v5531_v32 = vsel %vm1428_vm12, %v5416_v5, %v5377_v21  ;;  %v5550_v5 = vld [vmem:[#allocation8 + $0x10] sm:$0xff]  }
0x171f   :  { %3832 = vmatpush3.bf16.msra.mxu0 %v5125_v33  ;;  %3839 = vmatprep.mubr.msk.bf16.mxu0 %vm4756_vm0, %v4755_v0  ;;  %v2044_v7 = vpack.c.bf16 %v5531_v32, %v5531_v32 }
0x1720   :  { %3828 = vmatmul.mubr.msk.bf16.vlgmr.msra.gmra.mrb[36].mxu1 %vm485_vm5, %v1765_v39  ;;  %3833 = vmatprep.subr.bf16.mxu0 %v4755_v0 }
0x1721   :  { %3844 = vmatpush3.bf16.msra.mxu1 %v5155_v52  ;;  %3849 = vmatprep.mubr.msk.bf16.mxu1 %vm4756_vm0, %v4755_v0 }
0x1722   :  { %3845 = vmatprep.subr.bf16.mxu1 %v4755_v0 }
0x1723   :  { %3834 = vmatpush3.bf16.msra.mxu0 %v5129_v36 }
0x1724   :  { %3835 = vmatprep.subr.bf16.mxu0 %v4755_v0 }
0x1725   :  { %3846 = vmatpush3.bf16.msra.mxu1 %v5158_v53 }
0x1726   :  { %3847 = vmatprep.subr.bf16.mxu1 %v4755_v0 }
0x1727   :  { %3836 = vmatpush3.bf16.msra.mxu0 %v5139_v37 }
0x1728   :  { %3837 = vmatprep.subr.bf16.mxu0 %v4755_v0 }
0x1729   :  { %3848 = vmatpush3.bf16.msra.mxu1 %v5162_v54 }
0x172a   :  { %3853 = vmatprep.subr.bf16.mxu1 %v4755_v0 }
0x172b   :  { %3838 = vmatpush3.bf16.msra.mxu0 %v5143_v38 }
0x172c   :  { %3861 = vmatprep.subr.bf16.mxu0 %v4755_v0 }
0x17f1   :  { %v1759_v33 = vpop.f32.mrb[36].mxu0 }
0x17f2   :  { %v3823_v36 = vpop.f32.mrb[37].mxu0 }
0x17f3   :  { %v1762_v52 = vpop.f32.mrb[38].mxu0  ;;  %v1804_v43 = vpop.f32.mrb[36].mxu1 }
0x17f4   :  { %v1811_v22 = vrot.slane %v1804_v43, 7  ;;  %v3824_v53 = vpop.f32.mrb[39].mxu0  ;;  %v3829_v24 = vpop.f32.mrb[37].mxu1 }
0x17f5   :  { %v1807_v25 = vpop.f32.mrb[38].mxu1 }
0x17f6   :  { %v1813_v37 = vsel %vm469_vm2, %v1759_v33, %v1811_v22  ;;  %v3830_v3 = vpop.f32.mrb[39].mxu1 }
0x17f7   :  { %v1818_v54 = vsel %vm365_vm1, %v1813_v37, %v1816_v23 }
0x17f8   :  { %v1819_v26 = vpack.c.bf16 %v1818_v54, %v1818_v54 }
0x17fa   :  { %3840 = vmatmul.mubr.msk.bf16.vlgmr.msra.gmra.mrb[40].mxu0 %vm615_vm6, %v1819_v26 }
0x17fb   :  { %3862 = vmatpush3.bf16.msra.mxu0 %v5204_v40  ;;  %3865 = vmatprep.mubr.msk.bf16.mxu0 %vm4756_vm0, %v4755_v0  ;;  %v5496_v40 = vadd.f32 %v1608_v46, %v5447_v14 }
0x17fc   :  { %3863 = vmatprep.subr.bf16.mxu0 %v4755_v0 }
0x17ff   :  { %3864 = vmatpush3.bf16.msra.mxu0 %v5207_v42  ;;  %v1921_v42 = vpop.permute.xlu0 %1920 }
0x1800   :  { %3869 = vmatprep.subr.bf16.mxu0 %v4755_v0 }
0x18cd   :  { %v1857_v38 = vpop.f32.mrb[40].mxu0 }
0x18ce   :  { %4202 = vtanh.f32 %v1857_v38  ;;  %v3841_v30 = vpop.f32.mrb[41].mxu0 }
0x18cf   :  { %v1860_v31 = vpop.f32.mrb[42].mxu0 }
0x18d0   :  { %v3842_v35 = vpop.f32.mrb[43].mxu0 }
0x18d8   :  { %v4203_v44 = vpop.eup %4202 }
0x18d9   :  { %1870 = vrot.lane.b32.xlu1 %v4203_v44, %s4744_s11 }
0x194b   :  { %v1871_v2 = vpop.permute.xlu1 %1870 }
0x194c   :  { %v1873_v48 = vsel %vm667_vm7, %v5496_v40, %v1871_v2 }
0x194d   :  { %v1874_v9 = vpack.c.bf16 %v1873_v48, %v1873_v48  ;;  %v5581_v48 = vld [vmem:[#allocation8] sm:$0xff]  }
0x194f   :  { %3850 = vmatmul.mubr.msk.bf16.vlgmr.msra.gmra.mrb[40].mxu1 %vm688_vm8, %v1874_v9 }
0x1950   :  { %3854 = vmatpush3.bf16.msra.mxu1 %v5174_v6  ;;  %3857 = vmatprep.mubr.msk.bf16.mxu1 %vm4756_vm0, %v4755_v0 }
0x1951   :  { %3855 = vmatprep.subr.bf16.mxu1 %v4755_v0 }
0x1954   :  { %3856 = vmatpush3.bf16.msra.mxu1 %v5178_v8 }
0x1955   :  { %3877 = vmatprep.subr.bf16.mxu1 %v4755_v0 }
0x195b   :  { %3858 = vmatmul.mubr.msk.bf16.vlgmr.msra.gmra.mrb[40].mxu1 %vm365_vm1, %v1921_v42  ;;  %v5592_v42 = vld [vmem:[#allocation8 + $0x8] sm:$0xff]  }
0x195c   :  { %3878 = vmatpush3.bf16.msra.mxu1 %v5249_v19  ;;  %3881 = vmatprep.mubr.msk.bf16.mxu1 %vm4756_vm0, %v4755_v0 }
0x195d   :  { %3879 = vmatprep.subr.bf16.mxu1 %v4755_v0 }
0x1960   :  { %3880 = vmatpush3.bf16.msra.mxu1 %v5252_v20 }
0x1961   :  { %3885 = vmatprep.subr.bf16.mxu1 %v4755_v0 }
0x1a2e   :  { %v1959_v6 = vpop.f32.mrb[40].mxu1 }
0x1a2f   :  { %v4053_v51 = vadd.f32 %v1959_v6, %v5192_v16  ;;  %v3859_v8 = vpop.f32.mrb[41].mxu1 }
0x1a30   :  { %v1962_v45 = vpop.f32.mrb[42].mxu1 }
0x1a31   :  { %4204 = vtanh.f32 %v4053_v51  ;;  %v3860_v4 = vpop.f32.mrb[43].mxu1  ;;  %v3453_v19 = vmul.f32 -1.442695, %v4053_v51 }
0x1a33   :  { %4206 = vpow2.f32 %v3453_v19 }
0x1a3b   :  { %v4205_v57 = vpop.eup %4204 }
0x1a3c   :  { %1975 = vrot.lane.b32.xlu1 %v4205_v57, %s4738_s0 }
0x1a3d   :  { %v4207_v58 = vpop.eup %4206 }
0x1a3e   :  { %v1969_v62 = vadd.f32 1.0, %v4207_v58 }
0x1a40   :  { %4208 = vrcp.f32 %v1969_v62 }
0x1a4a   :  { %v4209_v60 = vpop.eup %4208 }
0x1a4b   :  { %v1973_v13 = vmul.f32 %v4209_v60, %v5521_v41 }
0x1aae   :  { %v1976_v10 = vpop.permute.xlu1 %1975 }
0x1aaf   :  { %v1978_v20 = vmul.f32 %v4209_v60, %v1976_v10 }
0x1ab1   :  { %1980 = vrot.lane.b32.xlu0 %v1978_v20, %s4734_s23 }
0x1b23   :  { %v1981_v1 = vpop.permute.xlu0 %1980 }
0x1b24   :  { %v5524_v17 = vadd.f32 %v1981_v1, %v1973_v13  ;;  %v5602_v1 = vld [vmem:[#allocation10] sm:$0x3] }
0x1b26   :  { %4210 = vtanh.f32 %v5524_v17 }
0x1b30   :  { %v4211_v50 = vpop.eup %4210 }
0x1b31   :  { %1986 = vrot.lane.b32.xlu1 %v4211_v50, %s4738_s0 }
0x1b35   :  { %2046 = vrot.lane.b32.xlu1 %v2044_v7, %s4734_s23 }
0x1ba3   :  { %v1987_v15 = vpop.permute.xlu1 %1986 }
0x1ba4   :  { %v5537_v39 = vmul.f32 %v4209_v60, %v1987_v15 }
0x1ba6   :  { %v1997_v33 = vpack.c.bf16 %v5537_v39, %v5537_v39 }
0x1ba7   :  { %v2047_v21 = vpop.permute.xlu1 %2046 }
0x1ba8   :  { %1999 = vrot.lane.b32.xlu0 %v1997_v33, %s4734_s23  ;;  %v1867_v33 = vld [vmem:[#allocation14 + $0x4] sm:$0x3] }
0x1c1a   :  { %v2000_v36 = vpop.permute.xlu0 %1999 }
0x1c1b   :  { %3866 = vmatmul.mubr.msk.bf16.vlgmr.msra.gmra.mrb[44].mxu0 %vm365_vm1, %v2000_v36  ;;  %v5606_v36 = vld [vmem:[#allocation11] sm:$0x3] }
0x1c1c   :  { %3870 = vmatpush3.bf16.msra.mxu0 %v5218_v47  ;;  %3873 = vmatprep.mubr.msk.bf16.mxu0 %vm4756_vm0, %v4755_v0  ;;  %v5556_v47 = vld [vmem:[#allocation8 + $0x18] sm:$0xff]   ;;  %vm3450_vm13 = vcmp.gt.f32.partialorder %v5606_v36, 2.0  ;;  %vm3463_vm15 = vcmp.gt.f32.partialorder %v5606_v36, 3.0 }
0x1c1d   :  { %3871 = vmatprep.subr.bf16.mxu0 %v4755_v0 }
0x1c20   :  { %3872 = vmatpush3.bf16.msra.mxu0 %v5222_v49 }
0x1c21   :  { %3893 = vmatprep.subr.bf16.mxu0 %v4755_v0 }
0x1c27   :  { %3874 = vmatmul.mubr.msk.bf16.vlgmr.msra.gmra.mrb[44].mxu0 %vm365_vm1, %v2047_v21  ;;  %v1990_v21 = vsel %vm3450_vm13, 1, %v4757_v61 }
0x1c28   :  { %3894 = vmatpush3.bf16.msra.mxu0 %v5550_v5  ;;  %3897 = vmatprep.mubr.msk.bf16.mxu0 %vm4756_vm0, %v4755_v0 }
0x1c29   :  { %3895 = vmatprep.subr.bf16.mxu0 %v4755_v0 }
0x1c2c   :  { %3896 = vmatpush3.bf16.msra.mxu0 %v5556_v47 }
0x1c2d   :  { %3907 = vmatprep.subr.bf16.mxu0 %v4755_v0 }
0x1cfa   :  { %v2085_v49 = vpop.f32.mrb[44].mxu0 }
0x1cfb   :  { %v4054_v52 = vadd.f32 %v5240_v55, %v2085_v49  ;;  %v3875_v43 = vpop.f32.mrb[45].mxu0  ;;  %v5567_v55 = vsel %vm1428_vm12, %v5412_v59, %v5409_v56 }
0x1cfc   :  { %v2088_v22 = vpop.f32.mrb[46].mxu0 }
0x1cfd   :  { %4212 = vtanh.f32 %v4054_v52  ;;  %v3876_v53 = vpop.f32.mrb[47].mxu0  ;;  %v3456_v25 = vmul.f32 -1.442695, %v4054_v52 }
0x1cff   :  { %4214 = vpow2.f32 %v3456_v25 }
0x1d07   :  { %v4213_v24 = vpop.eup %4212 }
0x1d08   :  { %2101 = vrot.lane.b32.xlu0 %v4213_v24, %s4738_s0 }
0x1d09   :  { %v4215_v23 = vpop.eup %4214 }
0x1d0a   :  { %v2095_v37 = vadd.f32 1.0, %v4215_v23 }
0x1d0c   :  { %4216 = vrcp.f32 %v2095_v37 }
0x1d16   :  { %v4217_v3 = vpop.eup %4216 }
0x1d17   :  { %v2099_v38 = vmul.f32 %v4217_v3, %v5567_v55 }
0x1d7a   :  { %v2102_v54 = vpop.permute.xlu0 %2101 }
0x1d7b   :  { %v2104_v26 = vmul.f32 %v4217_v3, %v2102_v54 }
0x1d7d   :  { %2106 = vrot.lane.b32.xlu1 %v2104_v26, %s4734_s23 }
0x1def   :  { %v2107_v30 = vpop.permute.xlu1 %2106 }
0x1df0   :  { %v5570_v31 = vadd.f32 %v2107_v30, %v2099_v38 }
0x1df2   :  { %4218 = vtanh.f32 %v5570_v31 }
0x1dfc   :  { %v4219_v35 = vpop.eup %4218 }
0x1dfd   :  { %2112 = vrot.lane.b32.xlu0 %v4219_v35, %s4738_s0 }
0x1e6f   :  { %v2113_v44 = vpop.permute.xlu0 %2112 }
0x1e70   :  { %v5574_v46 = vmul.f32 %v4217_v3, %v2113_v44 }
0x1e72   :  { %v2118_v2 = vpack.c.bf16 %v5574_v46, %v5574_v46 }
0x1e74   :  { %2120 = vrot.lane.b32.xlu1 %v2118_v2, %s4734_s23  ;;  %v2224_v56 = vshrl.u32 %v2118_v2, 16 }
0x1e76   :  { %2226 = vrot.lane.b32.xlu0 %v2224_v56, %s4734_s23  ;;  %v5632_v56 = vld [vmem:[#allocation16] sm:$0xff]  }
0x1ee6   :  { %v2121_v59 = vpop.permute.xlu1 %2120 }
0x1ee7   :  { %3882 = vmatmul.mubr.msk.bf16.vlgmr.msra.gmra.mrb[44].mxu1 %vm365_vm1, %v2121_v59 }
0x1ee8   :  { %3886 = vmatpush3.bf16.msra.mxu1 %v5581_v48  ;;  %v2227_v9 = vpop.permute.xlu0 %2226  ;;  %3889 = vmatprep.mubr.msk.bf16.mxu1 %vm4756_vm0, %v4755_v0 }
0x1ee9   :  { %3898 = vmatmul.mubr.msk.bf16.vlgmr.msra.gmra.mrb[48].mxu0 %vm365_vm1, %v2227_v9  ;;  %3887 = vmatprep.subr.bf16.mxu1 %v4755_v0  ;;  %v5653_v9 = vld [vmem:[#allocation16 + $0x10] sm:$0xff]  }
0x1eea   :  { %3908 = vmatpush3.bf16.msra.mxu0 %v5119_v29  ;;  %3909 = vmatprep.mubr.msk.bf16.mxu0 %vm4756_vm0, %v4755_v0 }
0x1eeb   :  { %3925 = vmatprep.subr.bf16.mxu0 %v4755_v0 }
0x1eec   :  { %3888 = vmatpush3.bf16.msra.mxu1 %v5592_v42 }
0x1eed   :  { %3901 = vmatprep.subr.bf16.mxu1 %v4755_v0 }
0x1eef   :  { %3890 = vmatmul.mubr.msk.bf16.vlgmr.msra.gmra.mrb[48].mxu1 %vm365_vm1, %v2121_v59  ;;  %v5649_v59 = vld [vmem:[#allocation17 + $0x8] sm:$0xff]  }
0x1ef0   :  { %3902 = vmatpush3.bf16.msra.mxu1 %v5117_v28  ;;  %3903 = vmatprep.mubr.msk.bf16.mxu1 %vm4756_vm0, %v4755_v0 }
0x1ef1   :  { %3913 = vmatprep.subr.bf16.mxu1 %v4755_v0 }
0x1fba   :  { %v2159_v6 = vpop.f32.mrb[44].mxu1 }
0x1fbb   :  { %v3883_v51 = vpop.f32.mrb[45].mxu1  ;;  %v5613_v24 = vadd.f32 %v5287_v11, %v2159_v6  ;;  %v5657_v6 = vld [vmem:[#allocation17 + $0x10] sm:$0xff]  }
0x1fbc   :  { %v2162_v8 = vpop.f32.mrb[46].mxu1  ;;  %v2265_v45 = vpop.f32.mrb[48].mxu0  ;;  %v5661_v51 = vld [vmem:[#allocation16 + $0x18] sm:$0xff]  }
0x1fbd   :  { %v3884_v4 = vpop.f32.mrb[47].mxu1  ;;  %v3899_v57 = vpop.f32.mrb[49].mxu0  ;;  %v2272_v62 = vrot.slane %v2265_v45, 7  ;;  %v2165_v25 = vmul.f32 1.442695, %v5613_v24 }
0x1fbe   :  { %v2268_v19 = vpop.f32.mrb[50].mxu0 }
0x1fbf   :  { %v3900_v58 = vpop.f32.mrb[51].mxu0 }
0x1fc2   :  { %v2217_v60 = vpop.f32.mrb[48].mxu1 }
0x1fc3   :  { %v2274_v10 = vsel %vm469_vm2, %v2217_v60, %v2272_v62  ;;  %v3891_v20 = vpop.f32.mrb[49].mxu1 }
0x1fc4   :  { %v2220_v13 = vpop.f32.mrb[50].mxu1  ;;  %v2275_v50 = vadd.f32 %v5602_v1, %v2274_v10 }
0x1fc5   :  { %v3892_v7 = vpop.f32.mrb[51].mxu1 }
0x1fc6   :  { %v2276_v15 = vsel %vm472_vm3, %v2275_v50, -inf }
0x1fc7   :  { %2277 = vmax.xlane.f32.xlu1 %v2276_v15  ;;  %v5668_v15 = vld [vmem:[#allocation20] sm:$0xff]  }
0x1fd8   :  { %2168 = vrot.lane.b32.xlu1 %v1867_v33, %s4744_s11  ;;  %v5674_v33 = vld [vmem:[#allocation20 + $0x8] sm:$0xff]  }
0x1fdc   :  { %1992 = vperm.xlu1 %4130, %v1990_v21  }
0x2054   :  { %v2278_v49 = vpop.xlane.xlu1 %2277 }
0x2055   :  { %v2279_v52 = vsub.f32 %v2275_v50, %v2278_v49 }
0x2057   :  { %v2280_v43 = vmul.f32 1.442695, %v2279_v52 }
0x2058   :  { %v2169_v23 = vpop.permute.xlu1 %2168 }
0x2059   :  { %4220 = vpow2.f32 %v2280_v43 }
0x205a   :  { %4222 = vpow2.f32 %v2165_v25 }
0x205c   :  { %v5616_v37 = vpop.permute.xlu1 %1992 }
0x205d   :  { %vm1994_vm14 = vcmp.eq.s32.totalorder %v5616_v37, 1 }
0x205e   :  { %v5625_v26 = vsel %vm1994_vm14, %v5537_v39, %v5459_v18  ;;  %v5639_v18 = vld [vmem:[#allocation17] sm:$0xff]   ;;  %v5645_v39 = vld [vmem:[#allocation16 + $0x8] sm:$0xff]  }
0x205f   :  { %v2484_v11 = vpack.c.bf16 %v5625_v26, %v5625_v26 }
0x2063   :  { %v4221_v22 = vpop.eup %4220 }
0x2064   :  { %v2282_v53 = vsel %vm472_vm3, %v4221_v22, 0.0  ;;  %v4223_v3 = vpop.eup %4222 }
0x2065   :  { %2283 = vadd.xlane.f32.xlu0 %v2282_v53  ;;  %v2171_v54 = vmul.f32 %v4223_v3, %v2169_v23 }
0x207b   :  { %2381 = vrot.lane.b32.xlu0 %v5574_v46, %s4738_s0 }
0x207f   :  { %2173 = vrot.lane.b32.xlu0 %v2171_v54, %s4758_s15 }
0x2083   :  { %2486 = vrot.lane.b32.xlu0 %v2484_v11, %s4734_s23  ;;  %v5685_v11 = vld [vmem:[#allocation22] sm:$0xff]  }
0x20f2   :  { %v2284_v38 = vpop.xlane.xlu0 %2283 }
0x20f3   :  { %4224 = vrcp.f32 %v2284_v38  ;;  %v5691_v38 = vld [vmem:[#allocation22 + $0x8] sm:$0xff]  }
0x20f6   :  { %v2382_v10 = vpop.permute.xlu0 %2381 }
0x20fa   :  { %v2174_v53 = vpop.permute.xlu0 %2173 }
0x20fb   :  { %v5680_v25 = vadd.f32 %v2174_v53, %v5613_v24 }
0x20fd   :  { %v4225_v30 = vpop.eup %4224 }
0x20fe   :  { %v2286_v35 = vmul.f32 %v4225_v30, %v4221_v22  ;;  %v2487_v30 = vpop.permute.xlu0 %2486 }
0x2100   :  { %v2287_v44 = vpack.c.bf16 %v2286_v35, %v2286_v35  ;;  %v5696_v35 = vld [vmem:[#allocation25] sm:$0xff]  }
0x2102   :  { %3904 = vmatmul.mubr.msk.bf16.vlgmr.msra.gmra.mrb[52].mxu1 %vm485_vm5, %v2287_v44  ;;  %v2331_v2 = vshrl.u32 %v2287_v44, 16  ;;  %v5702_v44 = vld [vmem:[#allocation25 + $0x8] sm:$0xff]  }
0x2103   :  { %3914 = vmatpush3.bf16.msra.mxu1 %v5632_v56  ;;  %3921 = vmatprep.mubr.msk.bf16.mxu1 %vm4756_vm0, %v4755_v0 }
0x2104   :  { %3910 = vmatmul.mubr.msk.bf16.vlgmr.msra.gmra.mrb[52].mxu0 %vm485_vm5, %v2331_v2  ;;  %3915 = vmatprep.subr.bf16.mxu1 %v4755_v0 }
0x2105   :  { %3926 = vmatpush3.bf16.msra.mxu0 %v5639_v18  ;;  %3931 = vmatprep.mubr.msk.bf16.mxu0 %vm4756_vm0, %v4755_v0 }
0x2106   :  { %3927 = vmatprep.subr.bf16.mxu0 %v4755_v0 }
0x2107   :  { %3916 = vmatpush3.bf16.msra.mxu1 %v5645_v39 }
0x2108   :  { %3917 = vmatprep.subr.bf16.mxu1 %v4755_v0 }
0x2109   :  { %3928 = vmatpush3.bf16.msra.mxu0 %v5649_v59 }
0x210a   :  { %3929 = vmatprep.subr.bf16.mxu0 %v4755_v0 }
0x210b   :  { %3918 = vmatpush3.bf16.msra.mxu1 %v5653_v9 }
0x210c   :  { %3919 = vmatprep.subr.bf16.mxu1 %v4755_v0 }
0x210d   :  { %3930 = vmatpush3.bf16.msra.mxu0 %v5657_v6 }
0x210e   :  { %3935 = vmatprep.subr.bf16.mxu0 %v4755_v0 }
0x210f   :  { %3920 = vmatpush3.bf16.msra.mxu1 %v5661_v51 }
0x2110   :  { %3943 = vmatprep.subr.bf16.mxu1 %v4755_v0 }
0x21d5   :  { %v2325_v8 = vpop.f32.mrb[52].mxu1 }
0x21d6   :  { %v3905_v45 = vpop.f32.mrb[53].mxu1 }
0x21d7   :  { %v2328_v4 = vpop.f32.mrb[54].mxu1  ;;  %v2370_v57 = vpop.f32.mrb[52].mxu0 }
0x21d8   :  { %v2377_v19 = vrot.slane %v2370_v57, 7  ;;  %v3906_v58 = vpop.f32.mrb[55].mxu1  ;;  %v3911_v62 = vpop.f32.mrb[53].mxu0 }
0x21d9   :  { %v2373_v60 = vpop.f32.mrb[54].mxu0 }
0x21da   :  { %v2379_v20 = vsel %vm469_vm2, %v2325_v8, %v2377_v19  ;;  %v3912_v13 = vpop.f32.mrb[55].mxu0 }
0x21db   :  { %v2384_v50 = vsel %vm365_vm1, %v2379_v20, %v2382_v10 }
0x21dc   :  { %v2385_v7 = vpack.c.bf16 %v2384_v50, %v2384_v50  ;;  %v5713_v50 = vsel %vm1994_vm14, %v5524_v17, %v5521_v41 }
0x21de   :  { %3922 = vmatmul.mubr.msk.bf16.vlgmr.msra.gmra.mrb[56].mxu1 %vm615_vm6, %v2385_v7 }
0x21df   :  { %3944 = vmatpush3.bf16.msra.mxu1 %v5668_v15  ;;  %3947 = vmatprep.mubr.msk.bf16.mxu1 %vm4756_vm0, %v4755_v0 }
0x21e0   :  { %3945 = vmatprep.subr.bf16.mxu1 %v4755_v0 }
0x21e3   :  { %3946 = vmatpush3.bf16.msra.mxu1 %v5674_v33 }
0x21e4   :  { %3951 = vmatprep.subr.bf16.mxu1 %v4755_v0 }
0x22b1   :  { %v2423_v21 = vpop.f32.mrb[56].mxu1 }
0x22b2   :  { %4226 = vtanh.f32 %v2423_v21  ;;  %v3923_v49 = vpop.f32.mrb[57].mxu1 }
0x22b3   :  { %v2426_v52 = vpop.f32.mrb[58].mxu1 }
0x22b4   :  { %v3924_v43 = vpop.f32.mrb[59].mxu1 }
0x22b5   :  { %v5723_v43 = vsel %vm1994_vm14, %v5574_v46, %v5531_v32  ;;  %v5735_v32 = vld [vmem:[#allocation22 + $0x10] sm:$0xff]   ;;  %v5741_v46 = vld [vmem:[#allocation22 + $0x18] sm:$0xff]  }
0x22b6   :  { %v2610_v41 = vpack.c.bf16 %v5723_v43, %v5723_v43 }
0x22bc   :  { %v4227_v22 = vpop.eup %4226 }
0x22bd   :  { %2436 = vrot.lane.b32.xlu1 %v4227_v22, %s4744_s11 }
0x232f   :  { %v2437_v23 = vpop.permute.xlu1 %2436 }
0x2330   :  { %v2439_v3 = vsel %vm667_vm7, %v5680_v25, %v2437_v23 }
0x2331   :  { %v2440_v54 = vpack.c.bf16 %v2439_v3, %v2439_v3 }
0x2333   :  { %3932 = vmatmul.mubr.msk.bf16.vlgmr.msra.gmra.mrb[56].mxu0 %vm688_vm8, %v2440_v54 }
0x2334   :  { %3936 = vmatpush3.bf16.msra.mxu0 %v5685_v11  ;;  %3939 = vmatprep.mubr.msk.bf16.mxu0 %vm4756_vm0, %v4755_v0 }
0x2335   :  { %3937 = vmatprep.subr.bf16.mxu0 %v4755_v0 }
0x2338   :  { %3938 = vmatpush3.bf16.msra.mxu0 %v5691_v38 }
0x2339   :  { %3959 = vmatprep.subr.bf16.mxu0 %v4755_v0 }
0x233f   :  { %3940 = vmatmul.mubr.msk.bf16.vlgmr.msra.gmra.mrb[56].mxu0 %vm365_vm1, %v2487_v30  ;;  %v5752_v30 = vld [vmem:[#allocation23 + $0x1] ss:$0 sm:$0xff] }
0x2340   :  { %3960 = vmatpush3.bf16.msra.mxu0 %v5696_v35  ;;  %3963 = vmatprep.mubr.msk.bf16.mxu0 %vm4756_vm0, %v4755_v0 }
0x2341   :  { %3961 = vmatprep.subr.bf16.mxu0 %v4755_v0 }
0x2344   :  { %3962 = vmatpush3.bf16.msra.mxu0 %v5702_v44 }
0x2345   :  { %3967 = vmatprep.subr.bf16.mxu0 %v4755_v0 }
0x2412   :  { %v2525_v2 = vpop.f32.mrb[56].mxu0 }
0x2413   :  { %v4055_v8 = vadd.f32 %v2525_v2, %v5192_v16  ;;  %v3941_v45 = vpop.f32.mrb[57].mxu0 }
0x2414   :  { %v2528_v4 = vpop.f32.mrb[58].mxu0 }
0x2415   :  { %4228 = vtanh.f32 %v4055_v8  ;;  %v3942_v57 = vpop.f32.mrb[59].mxu0  ;;  %v3466_v58 = vmul.f32 -1.442695, %v4055_v8 }
0x2417   :  { %4230 = vpow2.f32 %v3466_v58 }
0x241f   :  { %v4229_v19 = vpop.eup %4228 }
0x2420   :  { %2541 = vrot.lane.b32.xlu1 %v4229_v19, %s4738_s0 }
0x2421   :  { %v4231_v62 = vpop.eup %4230 }
0x2422   :  { %v2535_v60 = vadd.f32 1.0, %v4231_v62 }
0x2424   :  { %4232 = vrcp.f32 %v2535_v60 }
0x242e   :  { %v4233_v10 = vpop.eup %4232 }
0x242f   :  { %v2539_v7 = vmul.f32 %v4233_v10, %v5713_v50 }
0x2492   :  { %v2542_v20 = vpop.permute.xlu1 %2541 }
0x2493   :  { %v2544_v13 = vmul.f32 %v4233_v10, %v2542_v20 }
0x2495   :  { %2546 = vrot.lane.b32.xlu0 %v2544_v13, %s4734_s23 }
0x2507   :  { %v2547_v21 = vpop.permute.xlu0 %2546 }
0x2508   :  { %v5716_v49 = vadd.f32 %v2547_v21, %v2539_v7 }
0x250a   :  { %4234 = vtanh.f32 %v5716_v49 }
0x2514   :  { %v4235_v52 = vpop.eup %4234 }
0x2515   :  { %2552 = vrot.lane.b32.xlu1 %v4235_v52, %s4738_s0 }
0x2519   :  { %2612 = vrot.lane.b32.xlu1 %v2610_v41, %s4734_s23 }
0x2587   :  { %v2553_v17 = vpop.permute.xlu1 %2552 }
0x2588   :  { %v5729_v22 = vmul.f32 %v4233_v10, %v2553_v17  ;;  %v5761_v10 = vsel %vm1994_vm14, %v5570_v31, %v5567_v55 }
0x258a   :  { %v2563_v53 = vpack.c.bf16 %v5729_v22, %v5729_v22 }
0x258b   :  { %v2613_v3 = vpop.permute.xlu1 %2612 }
0x258c   :  { %2565 = vrot.lane.b32.xlu0 %v2563_v53, %s4734_s23 }
0x25fe   :  { %v2566_v23 = vpop.permute.xlu0 %2565 }
0x25ff   :  { %3948 = vmatmul.mubr.msk.bf16.vlgmr.msra.gmra.mrb[60].mxu1 %vm365_vm1, %v2566_v23 }
0x2600   :  { %3952 = vmatpush3.bf16.msra.mxu1 %v5735_v32  ;;  %3955 = vmatprep.mubr.msk.bf16.mxu1 %vm4756_vm0, %v4755_v0 }
0x2601   :  { %3953 = vmatprep.subr.bf16.mxu1 %v4755_v0 }
0x2604   :  { %3954 = vmatpush3.bf16.msra.mxu1 %v5741_v46 }
0x2605   :  { %3975 = vmatprep.subr.bf16.mxu1 %v4755_v0 }
0x260b   :  { %3956 = vmatmul.mubr.msk.bf16.vlgmr.msra.gmra.mrb[60].mxu1 %vm365_vm1, %v2613_v3 }
0x260c   :  { %3976 = vmatpush3.bf16.msra.mxu1 %v5550_v5  ;;  %3979 = vmatprep.mubr.msk.bf16.mxu1 %vm4756_vm0, %v4755_v0 }
0x260d   :  { %3977 = vmatprep.subr.bf16.mxu1 %v4755_v0 }
0x2610   :  { %3978 = vmatpush3.bf16.msra.mxu1 %v5556_v47 }
0x2611   :  { %3989 = vmatprep.subr.bf16.mxu1 %v4755_v0 }
0x26de   :  { %v2651_v54 = vpop.f32.mrb[60].mxu1 }
0x26df   :  { %v4056_v2 = vadd.f32 %v5752_v30, %v2651_v54  ;;  %v3957_v8 = vpop.f32.mrb[61].mxu1 }
0x26e0   :  { %v2654_v45 = vpop.f32.mrb[62].mxu1 }
0x26e1   :  { %4236 = vtanh.f32 %v4056_v2  ;;  %v3958_v4 = vpop.f32.mrb[63].mxu1  ;;  %v3469_v5 = vmul.f32 -1.442695, %v4056_v2 }
0x26e3   :  { %4238 = vpow2.f32 %v3469_v5 }
0x26eb   :  { %v4237_v57 = vpop.eup %4236 }
0x26ec   :  { %2667 = vrot.lane.b32.xlu0 %v4237_v57, %s4738_s0 }
0x26ed   :  { %v4239_v19 = vpop.eup %4238 }
0x26ee   :  { %v2661_v58 = vadd.f32 1.0, %v4239_v19 }
0x26f0   :  { %4240 = vrcp.f32 %v2661_v58 }
0x26fa   :  { %v4241_v47 = vpop.eup %4240 }
0x26fb   :  { %v2665_v20 = vmul.f32 %v4241_v47, %v5761_v10 }
0x275e   :  { %v2668_v62 = vpop.permute.xlu0 %2667 }
0x275f   :  { %v2670_v60 = vmul.f32 %v4241_v47, %v2668_v62  ;;  %v2433_v62 = vld [vmem:[#allocation14 + $0x6] sm:$0x3] }
0x2761   :  { %2672 = vrot.lane.b32.xlu1 %v2670_v60, %s4734_s23  ;;  %v2556_v60 = vsel %vm3463_vm15, 1, %v4757_v61 }
0x27d3   :  { %v2673_v13 = vpop.permute.xlu1 %2672 }
0x27d4   :  { %v5764_v7 = vadd.f32 %v2673_v13, %v2665_v20 }
0x27d6   :  { %4242 = vtanh.f32 %v5764_v7 }
0x27e0   :  { %v4243_v21 = vpop.eup %4242 }
0x27e1   :  { %2678 = vrot.lane.b32.xlu0 %v4243_v21, %s4738_s0 }
0x2853   :  { %v2679_v52 = vpop.permute.xlu0 %2678 }
0x2854   :  { %v5768_v41 = vmul.f32 %v4241_v47, %v2679_v52 }
0x2856   :  { %v2684_v17 = vpack.c.bf16 %v5768_v41, %v5768_v41 }
0x2858   :  { %2686 = vrot.lane.b32.xlu1 %v2684_v17, %s4734_s23  ;;  %v2790_v55 = vshrl.u32 %v2684_v17, 16 }
0x285a   :  { %2792 = vrot.lane.b32.xlu0 %v2790_v55, %s4734_s23 }
0x28ca   :  { %v2687_v31 = vpop.permute.xlu1 %2686 }
0x28cb   :  { %3964 = vmatmul.mubr.msk.bf16.vlgmr.msra.gmra.mrb[60].mxu0 %vm365_vm1, %v2687_v31 }
0x28cc   :  { %3968 = vmatpush3.bf16.msra.mxu0 %v5581_v48  ;;  %v2793_v53 = vpop.permute.xlu0 %2792  ;;  %3971 = vmatprep.mubr.msk.bf16.mxu0 %vm4756_vm0, %v4755_v0 }
0x28cd   :  { %3980 = vmatmul.mubr.msk.bf16.vlgmr.msra.gmra.mrb[64].mxu1 %vm365_vm1, %v2793_v53  ;;  %3969 = vmatprep.subr.bf16.mxu0 %v4755_v0 }
0x28ce   :  { %3990 = vmatpush3.bf16.msra.mxu1 %v5119_v29  ;;  %3991 = vmatprep.mubr.msk.bf16.mxu1 %vm4756_vm0, %v4755_v0 }
0x28cf   :  { %4007 = vmatprep.subr.bf16.mxu1 %v4755_v0 }
0x28d0   :  { %3970 = vmatpush3.bf16.msra.mxu0 %v5592_v42 }
0x28d1   :  { %3983 = vmatprep.subr.bf16.mxu0 %v4755_v0 }
0x28d3   :  { %3972 = vmatmul.mubr.msk.bf16.vlgmr.msra.gmra.mrb[64].mxu0 %vm365_vm1, %v2687_v31 }
0x28d4   :  { %3984 = vmatpush3.bf16.msra.mxu0 %v5117_v28  ;;  %3985 = vmatprep.mubr.msk.bf16.mxu0 %vm4756_vm0, %v4755_v0 }
0x28d5   :  { %3995 = vmatprep.subr.bf16.mxu0 %v4755_v0 }
0x299e   :  { %v2725_v48 = vpop.f32.mrb[60].mxu0 }
0x299f   :  { %v3965_v29 = vpop.f32.mrb[61].mxu0 }
0x29a0   :  { %v2728_v23 = vpop.f32.mrb[62].mxu0  ;;  %v2831_v3 = vpop.f32.mrb[64].mxu1 }
0x29a1   :  { %v3966_v54 = vpop.f32.mrb[63].mxu0  ;;  %v3981_v2 = vpop.f32.mrb[65].mxu1  ;;  %v2838_v42 = vrot.slane %v2831_v3, 7 }
0x29a2   :  { %v2834_v8 = vpop.f32.mrb[66].mxu1 }
0x29a3   :  { %v3982_v45 = vpop.f32.mrb[67].mxu1 }
0x29a6   :  { %v2783_v4 = vpop.f32.mrb[64].mxu0 }
0x29a7   :  { %v2840_v57 = vsel %vm469_vm2, %v2783_v4, %v2838_v42  ;;  %v3973_v5 = vpop.f32.mrb[65].mxu0 }
0x29a8   :  { %v2786_v19 = vpop.f32.mrb[66].mxu0  ;;  %v2841_v28 = vadd.f32 %v5602_v1, %v2840_v57  ;;  %v5798_v1 = vld [vmem:[#allocation26] ss:$0 sm:$0xff] }
0x29a9   :  { %v3974_v58 = vpop.f32.mrb[67].mxu0  ;;  %v5801_v55 = vadd.f32 %v5798_v1, %v2725_v48 }
0x29aa   :  { %v2842_v47 = vsel %vm472_vm3, %v2841_v28, -inf }
0x29ab   :  { %2843 = vmax.xlane.f32.xlu1 %v2842_v47  ;;  %v2731_v31 = vmul.f32 1.442695, %v5801_v55 }
0x29bc   :  { %2734 = vrot.lane.b32.xlu1 %v2433_v62, %s4744_s11 }
0x29c0   :  { %2558 = vperm.xlu1 %4130, %v2556_v60  }
0x2a38   :  { %v2844_v20 = vpop.xlane.xlu1 %2843 }
0x2a39   :  { %v2845_v13 = vsub.f32 %v2841_v28, %v2844_v20 }
0x2a3b   :  { %v2846_v21 = vmul.f32 1.442695, %v2845_v13 }
0x2a3c   :  { %v2735_v53 = vpop.permute.xlu1 %2734 }
0x2a3d   :  { %4244 = vpow2.f32 %v2846_v21 }
0x2a3e   :  { %4246 = vpow2.f32 %v2731_v31 }
0x2a40   :  { %v5804_v29 = vpop.permute.xlu1 %2558 }
0x2a41   :  { %vm2560_vm4 = vcmp.eq.s32.totalorder %v5804_v29, 1 }
0x2a42   :  { %v5813_v54 = vsel %vm2560_vm4, %v5729_v22, %v5625_v26 }
0x2a43   :  { %v3050_v48 = vpack.c.bf16 %v5813_v54, %v5813_v54 }
0x2a47   :  { %v4245_v52 = vpop.eup %4244 }
0x2a48   :  { %v2848_v17 = vsel %vm472_vm3, %v4245_v52, 0.0  ;;  %v4247_v23 = vpop.eup %4246  ;;  %vm1298_vm3 = vcmask 386048  }
0x2a49   :  { %2849 = vadd.xlane.f32.xlu0 %v2848_v17  ;;  %v2737_v3 = vmul.f32 %v4247_v23, %v2735_v53 }
0x2a5f   :  { %2947 = vrot.lane.b32.xlu0 %v5768_v41, %s4738_s0 }
0x2a63   :  { %2739 = vrot.lane.b32.xlu0 %v2737_v3, %s4758_s15 }
0x2a67   :  { %3052 = vrot.lane.b32.xlu0 %v3050_v48, %s4734_s23 }
0x2ad6   :  { %v2850_v2 = vpop.xlane.xlu0 %2849 }
0x2ad7   :  { %4248 = vrcp.f32 %v2850_v2 }
0x2ada   :  { %v2948_v19 = vpop.permute.xlu0 %2947 }
0x2ade   :  { %v2740_v13 = vpop.permute.xlu0 %2739 }
0x2ae1   :  { %v4249_v8 = vpop.eup %4248 }
0x2ae2   :  { %v2852_v45 = vmul.f32 %v4249_v8, %v4245_v52 }
0x2ae4   :  { %v2853_v42 = vpack.c.bf16 %v2852_v45, %v2852_v45 }
0x2ae6   :  { %3986 = vmatmul.mubr.msk.bf16.vlgmr.msra.gmra.mrb[68].mxu0 %vm485_vm5, %v2853_v42  ;;  %v2897_v4 = vshrl.u32 %v2853_v42, 16 }
0x2ae7   :  { %3996 = vmatpush3.bf16.msra.mxu0 %v5632_v56  ;;  %4003 = vmatprep.mubr.msk.bf16.mxu0 %vm4756_vm0, %v4755_v0 }
0x2ae8   :  { %3992 = vmatmul.mubr.msk.bf16.vlgmr.msra.gmra.mrb[68].mxu1 %vm485_vm5, %v2897_v4  ;;  %3997 = vmatprep.subr.bf16.mxu0 %v4755_v0  ;;  %vm3321_vm5 = vcmask 254976  }
0x2ae9   :  { %4008 = vmatpush3.bf16.msra.mxu1 %v5639_v18  ;;  %4013 = vmatprep.mubr.msk.bf16.mxu1 %vm4756_vm0, %v4755_v0 }
0x2aea   :  { %4009 = vmatprep.subr.bf16.mxu1 %v4755_v0 }
0x2aeb   :  { %3998 = vmatpush3.bf16.msra.mxu0 %v5645_v39 }
0x2aec   :  { %3999 = vmatprep.subr.bf16.mxu0 %v4755_v0 }
0x2aed   :  { %4010 = vmatpush3.bf16.msra.mxu1 %v5649_v59 }
0x2aee   :  { %4011 = vmatprep.subr.bf16.mxu1 %v4755_v0 }
0x2aef   :  { %4000 = vmatpush3.bf16.msra.mxu0 %v5653_v9 }
0x2af0   :  { %4001 = vmatprep.subr.bf16.mxu0 %v4755_v0 }
0x2af1   :  { %4012 = vmatpush3.bf16.msra.mxu1 %v5657_v6 }
0x2af2   :  { %4017 = vmatprep.subr.bf16.mxu1 %v4755_v0 }
0x2af3   :  { %4002 = vmatpush3.bf16.msra.mxu0 %v5661_v51 }
0x2af4   :  { %4025 = vmatprep.subr.bf16.mxu0 %v4755_v0 }
0x2bb9   :  { %v2891_v26 = vpop.f32.mrb[68].mxu0 }
0x2bba   :  { %v3987_v56 = vpop.f32.mrb[69].mxu0 }
0x2bbb   :  { %v2894_v18 = vpop.f32.mrb[70].mxu0  ;;  %v2936_v39 = vpop.f32.mrb[68].mxu1 }
0x2bbc   :  { %v2943_v22 = vrot.slane %v2936_v39, 7  ;;  %v3988_v59 = vpop.f32.mrb[71].mxu0  ;;  %v3993_v57 = vpop.f32.mrb[69].mxu1  ;;  %v2682_v18 = vsel %vm2560_vm4, %v5768_v41, %v5723_v43 }
0x2bbd   :  { %v2939_v5 = vpop.f32.mrb[70].mxu1  ;;  %v3176_v39 = vpack.c.bf16 %v2682_v18, %v2682_v18 }
0x2bbe   :  { %v2945_v9 = vsel %vm469_vm2, %v2891_v26, %v2943_v22  ;;  %v3994_v28 = vpop.f32.mrb[71].mxu1 }
0x2bbf   :  { %v2950_v6 = vsel %vm365_vm1, %v2945_v9, %v2948_v19 }
0x2bc0   :  { %v2951_v58 = vpack.c.bf16 %v2950_v6, %v2950_v6 }
0x2bc2   :  { %4004 = vmatmul.mubr.msk.bf16.vlgmr.msra.gmra.mrb[72].mxu0 %vm615_vm6, %v2951_v58 }
0x2bc3   :  { %4026 = vmatpush3.bf16.msra.mxu0 %v5668_v15  ;;  %4029 = vmatprep.mubr.msk.bf16.mxu0 %vm4756_vm0, %v4755_v0  ;;  %v5850_v15 = vadd.f32 %v2740_v13, %v5801_v55 }
0x2bc4   :  { %4027 = vmatprep.subr.bf16.mxu0 %v4755_v0 }
0x2bc7   :  { %4028 = vmatpush3.bf16.msra.mxu0 %v5674_v33  ;;  %v3053_v33 = vpop.permute.xlu0 %3052 }
0x2bc8   :  { %4033 = vmatprep.subr.bf16.mxu0 %v4755_v0 }
0x2c95   :  { %v2989_v51 = vpop.f32.mrb[72].mxu0 }
0x2c96   :  { %4250 = vtanh.f32 %v2989_v51  ;;  %v4005_v47 = vpop.f32.mrb[73].mxu0 }
0x2c97   :  { %v2992_v62 = vpop.f32.mrb[74].mxu0 }
0x2c98   :  { %v4006_v60 = vpop.f32.mrb[75].mxu0 }
0x2ca0   :  { %v4251_v20 = vpop.eup %4250 }
0x2ca1   :  { %3002 = vrot.lane.b32.xlu1 %v4251_v20, %s4744_s11 }
0x2d13   :  { %v3003_v21 = vpop.permute.xlu1 %3002 }
0x2d14   :  { %v3005_v52 = vsel %vm667_vm7, %v5850_v15, %v3003_v21 }
0x2d15   :  { %v3006_v17 = vpack.c.bf16 %v3005_v52, %v3005_v52  ;;  %v2999_v52 = vld [vmem:[#allocation14 + $0x8] sm:$0x3] }
0x2d17   :  { %4014 = vmatmul.mubr.msk.bf16.vlgmr.msra.gmra.mrb[72].mxu1 %vm688_vm8, %v3006_v17 }
0x2d18   :  { %4018 = vmatpush3.bf16.msra.mxu1 %v5685_v11  ;;  %4021 = vmatprep.mubr.msk.bf16.mxu1 %vm4756_vm0, %v4755_v0 }
0x2d19   :  { %4019 = vmatprep.subr.bf16.mxu1 %v4755_v0 }
0x2d1c   :  { %4020 = vmatpush3.bf16.msra.mxu1 %v5691_v38 }
0x2d1d   :  { %4041 = vmatprep.subr.bf16.mxu1 %v4755_v0 }
0x2d23   :  { %4022 = vmatmul.mubr.msk.bf16.vlgmr.msra.gmra.mrb[72].mxu1 %vm365_vm1, %v3053_v33 }
0x2d24   :  { %4042 = vmatpush3.bf16.msra.mxu1 %v5696_v35  ;;  %4045 = vmatprep.mubr.msk.bf16.mxu1 %vm4756_vm0, %v4755_v0 }
0x2d25   :  { %4043 = vmatprep.subr.bf16.mxu1 %v4755_v0 }
0x2d28   :  { %4044 = vmatpush3.bf16.msra.mxu1 %v5702_v44 }
0x2df6   :  { %v3091_v11 = vpop.f32.mrb[72].mxu1 }
0x2df7   :  { %v4057_v31 = vadd.f32 %v3091_v11, %v5192_v16  ;;  %v4023_v53 = vpop.f32.mrb[73].mxu1  ;;  %v5874_v16 = vsel %vm2560_vm4, %v5716_v49, %v5713_v50 }
0x2df8   :  { %v3094_v23 = vpop.f32.mrb[74].mxu1 }
0x2df9   :  { %4252 = vtanh.f32 %v4057_v31  ;;  %v4024_v38 = vpop.f32.mrb[75].mxu1  ;;  %v3479_v48 = vmul.f32 -1.442695, %v4057_v31 }
0x2dfb   :  { %4254 = vpow2.f32 %v3479_v48 }
0x2e03   :  { %v4253_v3 = vpop.eup %4252 }
0x2e04   :  { %3107 = vrot.lane.b32.xlu1 %v4253_v3, %s4738_s0 }
0x2e05   :  { %v4255_v35 = vpop.eup %4254 }
0x2e06   :  { %v3101_v2 = vadd.f32 1.0, %v4255_v35 }
0x2e08   :  { %4256 = vrcp.f32 %v3101_v2 }
0x2e12   :  { %v4257_v8 = vpop.eup %4256 }
0x2e13   :  { %v3105_v44 = vmul.f32 %v4257_v8, %v5874_v16 }
0x2e76   :  { %v3108_v45 = vpop.permute.xlu1 %3107 }
0x2e77   :  { %v3110_v42 = vmul.f32 %v4257_v8, %v3108_v45 }
0x2e79   :  { %3112 = vrot.lane.b32.xlu0 %v3110_v42, %s4734_s23 }
0x2eeb   :  { %v3113_v4 = vpop.permute.xlu0 %3112 }
0x2eec   :  { %v5877_v26 = vadd.f32 %v3113_v4, %v3105_v44 }
0x2eee   :  { %4258 = vtanh.f32 %v5877_v26 }
0x2ef8   :  { %v4259_v56 = vpop.eup %4258 }
0x2ef9   :  { %3118 = vrot.lane.b32.xlu1 %v4259_v56, %s4738_s0 }
0x2efd   :  { %3178 = vrot.lane.b32.xlu1 %v3176_v39, %s4734_s23 }
0x2f6b   :  { %v3119_v50 = vpop.permute.xlu1 %3118 }
0x2f6c   :  { %v3121_v49 = vmul.f32 %v4257_v8, %v3119_v50 }
0x2f6e   :  { %v3129_v22 = vpack.c.bf16 %v3121_v49, %v3121_v49 }
0x2f6f   :  { %v3179_v43 = vpop.permute.xlu1 %3178 }
0x2f70   :  { %3131 = vrot.lane.b32.xlu0 %v3129_v22, %s4734_s23 }
0x2fe2   :  { %v3132_v59 = vpop.permute.xlu0 %3131 }
0x2fe3   :  { %4030 = vmatmul.mubr.msk.bf16.vlgmr.msra.gmra.mrb[76].mxu0 %vm365_vm1, %v3132_v59 }
0x2fe4   :  { %4034 = vmatpush3.bf16.msra.mxu0 %v5735_v32  ;;  %4037 = vmatprep.mubr.msk.bf16.mxu0 %vm4756_vm0, %v4755_v0  ;;  %vm3476_vm0 = vcmp.gt.f32.partialorder %v5606_v36, 4.0 }
0x2fe5   :  { %4035 = vmatprep.subr.bf16.mxu0 %v4755_v0  ;;  %v3122_v13 = vsel %vm3476_vm0, 1, %v4757_v61 }
0x2fe8   :  { %4036 = vmatpush3.bf16.msra.mxu0 %v5741_v46 }
0x2fef   :  { %4038 = vmatmul.mubr.msk.bf16.vlgmr.msra.gmra.mrb[76].mxu0 %vm365_vm1, %v3179_v43 }
0x30c2   :  { %v3217_v41 = vpop.f32.mrb[76].mxu0 }
0x30c3   :  { %v4058_v57 = vadd.f32 %v5752_v30, %v3217_v41  ;;  %v4039_v5 = vpop.f32.mrb[77].mxu0  ;;  %v2683_v30 = vsel %vm2560_vm4, %v5764_v7, %v5761_v10 }
0x30c4   :  { %v3220_v19 = vpop.f32.mrb[78].mxu0 }
0x30c5   :  { %4260 = vtanh.f32 %v4058_v57  ;;  %v4040_v9 = vpop.f32.mrb[79].mxu0  ;;  %v3482_v32 = vmul.f32 -1.442695, %v4058_v57 }
0x30c7   :  { %4262 = vpow2.f32 %v3482_v32 }
0x30cf   :  { %v4261_v28 = vpop.eup %4260 }
0x30d0   :  { %3233 = vrot.lane.b32.xlu0 %v4261_v28, %s4738_s0 }
0x30d1   :  { %v4263_v6 = vpop.eup %4262 }
0x30d2   :  { %v3227_v58 = vadd.f32 1.0, %v4263_v6 }
0x30d4   :  { %4264 = vrcp.f32 %v3227_v58 }
0x30de   :  { %v4265_v0 = vpop.eup %4264 }
0x30df   :  { %v3231_v47 = vmul.f32 %v4265_v0, %v2683_v30 }
0x3142   :  { %v3234_v46 = vpop.permute.xlu0 %3233 }
0x3143   :  { %v3236_v51 = vmul.f32 %v4265_v0, %v3234_v46 }
0x3145   :  { %3238 = vrot.lane.b32.xlu1 %v3236_v51, %s4734_s23 }
0x31b7   :  { %v3239_v62 = vpop.permute.xlu1 %3238 }
0x31b8   :  { %v3241_v60 = vadd.f32 %v3239_v62, %v3231_v47 }
0x31ba   :  { %4266 = vtanh.f32 %v3241_v60 }
0x31c4   :  { %v4267_v20 = vpop.eup %4266 }
0x31c5   :  { %3244 = vrot.lane.b32.xlu0 %v4267_v20, %s4738_s0  ;;  %s4760_s0 = smov [#allocation29]  }
0x31c6   :  { %s3357_s19 = sshll.u32 %s4760_s0, 4  ;;  %s3358_s19 = int_to_ptr.vmem [resolvable:$true] %s3357_s19 }
0x31c7   :  { %s4645_s28 = scalar_lea.vmem %s3358_s19, 64  ;;  %p4650_p3 = scmp.lt.s32.totalorder %s3358_s19, %s3358_s19 }
0x31c8   :  { %p4646_p2 = scmp.ne.s32.totalorder %s3358_s19, %s4645_s28  ;;  %p4651_p4 = scmp.lt.s32.totalorder %s4645_s28, %s4645_s28 }
0x31c9   :  { %3124 = vperm.xlu0 %4129, %v3122_v13  }
0x31ca   :  { %p4652_p5 = por %p4651_p4, %p4650_p3 }
0x31cc   :  { %p4653_p6 = pnand %p4652_p5, %p4646_p2 }
0x31cd   :  { %1612 = vrot.lane.b32.xlu0 %v5447_v14, %s4744_s11 }
0x31d1   :  { %2744 = vrot.lane.b32.xlu0 %v5801_v55, %s4744_s11 }
0x3237   :  { %v3245_v21 = vpop.permute.xlu0 %3244 }
0x3238   :  { %v3247_v10 = vmul.f32 %v4265_v0, %v3245_v21 }
0x323a   :  { %v3250_v7 = vpack.c.bf16 %v3247_v10, %v3247_v10 }
0x323c   :  { %3252 = vrot.lane.b32.xlu1 %v3250_v7, %s4734_s23 }
0x3240   :  { %3300 = vrot.lane.b32.xlu1 %v2999_v52, %s4744_s11 }
0x3244   :  { %1046 = vrot.lane.b32.xlu1 %v5290_v12, %s4744_s11 }
0x3248   :  { %2178 = vrot.lane.b32.xlu1 %v5613_v24, %s4744_s11  ;;  %v5914_v61 = vpop.permute.xlu0 %3124 }
0x3249   :  { %vm3126_vm2 = vcmp.eq.s32.totalorder %v5914_v61, 1 }
0x324a   :  { %v3127_v14 = vsel %vm3126_vm2, %v3121_v49, %v5813_v54  ;;  %v3248_v36 = vsel %vm3126_vm2, %v3247_v10, %v2682_v18  ;;  %v3249_v37 = vsel %vm3126_vm2, %v3241_v60, %v2683_v30 }
0x324b   :  { %3318 = vrot.lane.b32.xlu0 %v3127_v14, %s4734_s23 }
0x324c   :  { %3329 = vrot.lane.b32.xlu1 %v3248_v36, %s4734_s23  ;;  %v1613_v12 = vpop.permute.xlu0 %1612 }
0x324d   :  { %v1615_v24 = vsel %vm667_vm7, %v5496_v40, %v1613_v12 }
0x324e   :  { %v1616_v55 = vsel %vm1428_vm12, %v1615_v24, 0.0 }
0x324f   :  { %1865 = vst.msk [vmem:[#allocation28 + $0x2] sm:$0x3] %vm1298_vm3, %v1616_v55 }
0x3250   :  { %v2745_v17 = vpop.permute.xlu0 %2744 }
0x3251   :  { %v2747_v54 = vsel %vm667_vm7, %v5850_v15, %v2745_v17 }
0x3252   :  { %v2748_v33 = vsel %vm2560_vm4, %v2747_v54, 0.0 }
0x3253   :  { %2997 = vst.msk [vmem:[#allocation28 + $0x6] sm:$0x3] %vm1298_vm3, %v2748_v33 }
0x32ae   :  { %v3253_v11 = vpop.permute.xlu1 %3252 }
0x32af   :  { %4046 = vmatmul.mubr.msk.bf16.vlgmr.msra.gmra.mrb[76].mxu1 %vm365_vm1, %v3253_v11 }
0x32b2   :  { %v3301_v31 = vpop.permute.xlu1 %3300 }
0x32b6   :  { %v1047_v53 = vpop.permute.xlu1 %1046 }
0x32b7   :  { %v1049_v63 = vsel %vm667_vm7, %v5341_v27, %v1047_v53 }
0x32b8   :  { %v1050_v40 = vsel %vm821_vm10, %v1049_v63, 0.0 }
0x32b9   :  { %1299 = vst.msk [vmem:[#allocation28] sm:$0x3] %vm1298_vm3, %v1050_v40 }
0x32ba   :  { %v2179_v23 = vpop.permute.xlu1 %2178 }
0x32bb   :  { %v2181_v29 = vsel %vm667_vm7, %v5680_v25, %v2179_v23 }
0x32bc   :  { %v2182_v15 = vsel %vm1994_vm14, %v2181_v29, 0.0 }
0x32bd   :  { %2431 = vst.msk [vmem:[#allocation28 + $0x4] sm:$0x3] %vm1298_vm3, %v2182_v15  ;;  %v3319_v38 = vpop.permute.xlu0 %3318 }
0x32be   :  { %3322 = vst.msk [vmem:[#allocation29] sm:$0x3] %vm3321_vm5, %v3319_v38  ;;  %v3330_v3 = vpop.permute.xlu1 %3329 }
0x32bf   :  { %3333 = vst.msk [vmem:[#allocation29 + $0x2] sm:$0x3] %vm3321_vm5, %v3330_v3 }
0x3382   :  { %v3291_v34 = vpop.f32.mrb[76].mxu1 }
0x3383   :  { %v3292_v27 = vadd.f32 %v5798_v1, %v3291_v34  ;;  %v4047_v48 = vpop.f32.mrb[77].mxu1 }
0x3384   :  { %v3294_v35 = vpop.f32.mrb[78].mxu1 }
0x3385   :  { %v3297_v2 = vmul.f32 1.442695, %v3292_v27  ;;  %v4048_v8 = vpop.f32.mrb[79].mxu1  ;;  %3310 = vrot.lane.b32.xlu1 %v3292_v27, %s4744_s11 }
0x3387   :  { %4268 = vpow2.f32 %v3297_v2 }
0x3389   :  { %3335 = vrot.lane.b32.xlu1 %v3249_v37, %s4759_s9 }
0x338a   :  { %4656 = shalt.err (!%p4653_p6)
}
0x338b   :  { %s4657_s11 = scalar_lea.hbm %s6033_s17, 64 }
0x338c   :  { %p4658_p7 = scmp.ne.s32.totalorder %s6033_s17, %s4657_s11  ;;  %p4661_p8 = scmp.lt.u32.totalorder %s4657_s11, %s6033_s17 }
0x338e   :  { %p4663_p9 = pnand %p4661_p8, %p4658_p7 }
0x3390   :  { %4666 = shalt.err (!%p4663_p9)
}
0x3391   :  { %3363 = dma.vmem_to_hbm [thread:$0]  %s3358_s19, 64, %s6033_s17, [#allocation30], %s4734_s23, %s4734_s23, %s4735_s24   ;;  %v4269_v25 = vpop.eup %4268  ;;  %v3128_v45 = vsel %vm3126_vm2, %v5877_v26, %v5874_v16 }
0x3392   :  { %v3303_v1 = vmul.f32 %v4269_v25, %v3301_v31  ;;  %s4761_s16 = smov [#allocation28]   ;;  %s4762_s17 = smov [#allocation31]  }
0x3393   :  { %s3345_s18 = sshll.u32 %s4761_s16, 4  ;;  %s3369_s21 = sshll.u32 %s4762_s17, 4  ;;  %s3346_s18 = int_to_ptr.vmem [resolvable:$true] %s3345_s18  ;;  %s5977_s21 = int_to_ptr.vmem [resolvable:$true] %s3369_s21 }
0x3394   :  { %3305 = vrot.lane.b32.xlu0 %v3303_v1, %s4758_s15  ;;  %s4667_s22 = scalar_lea.vmem %s3346_s18, 160  ;;  %p4672_p11 = scmp.lt.s32.totalorder %s3346_s18, %s3346_s18 }
0x3395   :  { %p4668_p10 = scmp.ne.s32.totalorder %s3346_s18, %s4667_s22  ;;  %p4673_p12 = scmp.lt.s32.totalorder %s4667_s22, %s4667_s22 }
0x3397   :  { %p4674_p13 = por %p4673_p12, %p4672_p11 }
0x3398   :  { %3324 = vrot.lane.b32.xlu0 %v3128_v45, %s4759_s9 }
0x3399   :  { %p4675_p0 = pnand %p4674_p13, %p4668_p10 }
0x33f7   :  { %v3311_v42 = vpop.permute.xlu1 %3310 }
0x33fb   :  { %v3336_v44 = vpop.permute.xlu1 %3335 }
0x33fc   :  { %3339 = vst.msk [vmem:[#allocation31 + $0x2] sm:$0x3] %vm3321_vm5, %v3336_v44 }
0x3406   :  { %v3306_v4 = vpop.permute.xlu0 %3305 }
0x3407   :  { %v3308_v56 = vadd.f32 %v3306_v4, %v3292_v27 }
0x3409   :  { %v3313_v18 = vsel %vm667_vm7, %v3308_v56, %v3311_v42 }
0x340a   :  { %v3314_v39 = vsel %vm3126_vm2, %v3313_v18, 0.0  ;;  %v3325_v50 = vpop.permute.xlu0 %3324 }
0x340b   :  { %3316 = vst.msk [vmem:[#allocation28 + $0x8] sm:$0x3] %vm1298_vm3, %v3314_v39 }
0x340c   :  { %3327 = vst.msk [vmem:[#allocation31] sm:$0x3] %vm3321_vm5, %v3325_v50 }
0x340d   :  { %4678 = shalt.err (!%p4675_p0)
}
0x340e   :  { %s6048_s13 = sld [smem:[#allocation46_spill]] }
0x3414   :  { %s4679_s7 = scalar_lea.hbm %s6048_s13, 160 }
0x3415   :  { %p4680_p1 = scmp.ne.s32.totalorder %s6048_s13, %s4679_s7  ;;  %p4683_p2 = scmp.lt.u32.totalorder %s4679_s7, %s6048_s13 }
0x3417   :  { %p4685_p3 = pnand %p4683_p2, %p4680_p1 }
0x3419   :  { %4688 = shalt.err (!%p4685_p3)
}
0x341a   :  { %3351 = dma.vmem_to_hbm [thread:$0]  %s3346_s18, 160, %s6048_s13, [#allocation4], %s4734_s23, %s4734_s23, %s4735_s24  }
0x341b   :  { %s4689_s15 = scalar_lea.vmem %s5977_s21, 64  ;;  %p4694_p5 = scmp.lt.s32.totalorder %s5977_s21, %s5977_s21 }
0x341c   :  { %p4690_p4 = scmp.ne.s32.totalorder %s5977_s21, %s4689_s15  ;;  %p4695_p6 = scmp.lt.s32.totalorder %s4689_s15, %s4689_s15 }
0x341e   :  { %p4696_p7 = por %p4695_p6, %p4694_p5 }
0x3420   :  { %p4697_p8 = pnand %p4696_p7, %p4690_p4 }
0x3422   :  { %4700 = shalt.err (!%p4697_p8)
}
0x3423   :  { %s6049_s19 = sld [smem:[#allocation47_spill]] }
0x3429   :  { %s4701_s28 = scalar_lea.hbm %s6049_s19, 64 }
0x342a   :  { %p4702_p9 = scmp.ne.s32.totalorder %s6049_s19, %s4701_s28  ;;  %p4705_p10 = scmp.lt.u32.totalorder %s4701_s28, %s6049_s19 }
0x342c   :  { %p4707_p11 = pnand %p4705_p10, %p4702_p9 }
0x342e   :  { %4710 = shalt.err (!%p4707_p11)
}
0x342f   :  { %3375 = dma.vmem_to_hbm [thread:$0]  %s5977_s21, 64, %s6049_s19, [#allocation30], %s4734_s23, %s4734_s23, %s4735_s24  }
0x3430   :  { %4729 = dma.done.wait [#allocation4], 160  }
0x3431   :  { %4730 = vsyncadd [#allocation4], 4294967136 }
0x3432   :  { %4731 = dma.done.wait [#allocation30], 128  }
0x3433   :  { %4732 = vsyncadd [#allocation30], 4294967168 }
0x3434   :  { %3385 = vsyncpa [#allocation3], 1 }
0x3435   :  { %3386 = vsyncpa [#allocation6], 1 }
0x3436   :  { %3387 = vsyncpa [#allocation9], 1 }
0x3437   :  { %3388 = vsyncpa [#allocation12], 1 }
0x3438   :  { %3389 = vsyncpa [#allocation15], 1 }
0x3439   :  { %3390 = vsyncpa [#allocation18], 1 }
0x343a   :  { %3391 = vsyncpa [#allocation21], 1 }
0x343b   :  { %3392 = vsyncpa [#allocation24], 1 }
0x343c   :  { %3393 = vsyncpa [#allocation27], 1 }
0x343d   :  { %3394 = vsyncpa [#allocation4], 1 }
0x343e   :  { %3395 = vsyncpa [#allocation30], 1 }

</bundles_post_ra>
